<compile_context>
chip_gen: v7x
topology: tpu7x:2x2x1
jax: 0.10.0
libtpu: 0.0.40
codegen_flags: <defaults>
</compile_context>

<pallas_src>
import jax
import jax.numpy as jnp
from jax import lax
from jax.experimental import pallas as pl
from jax.experimental.pallas import tpu as pltpu

C = 64                       # conv in/out channels
H_IN = 16                    # input spatial size (input is (N, 64, 16, 16) NCHW)
S_IMG = H_IN * H_IN          # 256 flat pixel-rows per image (channels-last rows)
NCLS = 8                     # fc output features
OUT_PAD = 128                # lane-dense padded fc output width
BN_EPS = 1e-5

# conv tap row-offsets in the two flat layouts
OFF1 = (0, 1, 2, 16, 17, 18, 32, 33, 34)   # conv1: 16-wide image rows
OFF2 = (0, 1, 2, 8, 9, 10, 16, 17, 18)     # conv2: 8-wide compacted pooled rows


def _ru8(v):
    return ((v + 7) // 8) * 8


def branch_kernel(x_ref, w1_ref, sh1_ref, w2_ref, sh2_ref, wfc_ref, bfc_ref,
                  out_ref, wide1, y1, hmax, pool, wide2, y2, tsum):
    """One grid step == one batch tile of images, flattened to (rows, 64)."""
    R = x_ref.shape[0]           # 256 * B flat input rows
    B = out_ref.shape[1]         # images per tile
    P = pool.shape[0]            # 64 * B compacted pooled rows
    m1 = R - 34                  # conv1 rows computed
    mP = R // 2 - 25             # half-compacted pooled rows
    m2 = P - 18                  # conv2 rows computed
    mt = m2 - 4                  # horizontal (qj) partial sums

    # ---- conv1: one wide matmul, then 9-way shifted-slice combine -----------
    wide1[...] = jnp.dot(x_ref[...], w1_ref[...],
                         preferred_element_type=jnp.float32)      # (R, 576)
    acc = wide1[0:m1, 0:C]
    for t in range(1, 9):
        o = OFF1[t]
        acc = acc + wide1[o:o + m1, t * C:(t + 1) * C]
    # folded bn1 shift + relu (scale already folded into w1 columns)
    y1[0:m1, :] = jnp.maximum(acc + sh1_ref[...], 0.0)

    # ---- 2x2 stride-2 max-pool: 4 stride-2 views -> half-compacted map ------
    pm = jnp.maximum(
        jnp.maximum(y1[pl.ds(0, mP, 2), :], y1[pl.ds(1, mP, 2), :]),
        jnp.maximum(y1[pl.ds(16, mP, 2), :], y1[pl.ds(17, mP, 2), :]))
    hmax[0:mP, :] = pm.astype(hmax.dtype)

    # ---- compact to a dense 8x8-per-image map (valid 7x7 in rows/cols 0..6) -
    pool[...] = jnp.zeros_like(pool)
    for b in range(B):
        for pi in range(7):
            pool[64 * b + 8 * pi:64 * b + 8 * pi + 7, :] = \
                hmax[128 * b + 16 * pi:128 * b + 16 * pi + 7, :]

    # ---- conv2 on the compacted map: same wide-matmul + combine structure ---
    wide2[...] = jnp.dot(pool[...], w2_ref[...],
                         preferred_element_type=jnp.float32)      # (P, 576)
    acc2 = wide2[0:m2, 0:C]
    for t in range(1, 9):
        o = OFF2[t]
        acc2 = acc2 + wide2[o:o + m2, t * C:(t + 1) * C]
    y2[0:m2, :] = jnp.maximum(acc2 + sh2_ref[...], 0.0)

    # ---- global average pool (VPU shifted sums + stride-64 gather), then fc -
    ts = y2[0:mt, :]
    for d in range(1, 5):
        ts = ts + y2[d:d + mt, :]
    tsum[0:mt, :] = ts                       # tsum[r] = sum_{qj<5} y2[r+qj]
    feat = tsum[pl.ds(0, B, 64), :]
    for qi in range(1, 5):
        feat = feat + tsum[pl.ds(8 * qi, B, 64), :]   # (B, 64) per-image sums
    out = jnp.dot(feat, wfc_ref[...],
                  preferred_element_type=jnp.float32) + bfc_ref[...]
    out_ref[0] = out.astype(out_ref.dtype)            # lane-dense (B, 128)


def branch_forward(x_nchw, params):
    (w1, b1, g1, beta1, rm1, rv1,
     w2, b2, g2, beta2, rm2, rv2,
     wfc, bfc) = params
    n = x_nchw.shape[0]
    # keep >= 2 grid steps whenever n >= 2 (v7x has 2 TensorCores); cap at 8
    # so the ~8 MiB VMEM footprint fits every generation's default scoped limit.
    b_tile = max(1, min(8, (n + 1) // 2))
    g = -(-n // b_tile)
    n_pad = g * b_tile

    # Fold conv bias + eval-mode BatchNorm: scale -> weight columns, shift kept.
    s1 = g1 / jnp.sqrt(rv1 + BN_EPS)
    sh1 = (beta1 - rm1 * s1 + b1 * s1).reshape(1, C)
    s2 = g2 / jnp.sqrt(rv2 + BN_EPS)
    sh2 = (beta2 - rm2 * s2 + b2 * s2).reshape(1, C)

    # Conv weights OIHW -> wide (Cin, 9*Cout) with BN scale folded, bf16.
    w1t = jnp.transpose(w1, (2, 3, 1, 0)).reshape(9, C, C)        # (tap, ci, co)
    w1w = jnp.transpose(w1t * s1[None, None, :], (1, 0, 2)) \
             .reshape(C, 9 * C).astype(jnp.bfloat16)
    w2t = jnp.transpose(w2, (2, 3, 1, 0)).reshape(9, C, C)
    w2w = jnp.transpose(w2t * s2[None, None, :], (1, 0, 2)) \
             .reshape(C, 9 * C).astype(jnp.bfloat16)

    # fc: pad to a lane-dense 128-wide block; fold the global-avg-pool 1/25.
    wfc_pad = jnp.zeros((C, OUT_PAD), jnp.float32).at[:, :NCLS].set(wfc.T / 25.0)
    bfc_pad = jnp.zeros((1, OUT_PAD), jnp.float32).at[:, :NCLS].set(bfc)

    # NCHW -> NHWC, pad batch, flatten channels-last (one 64-ch row per pixel),
    # cast to bf16 in the wrapper (halves input DMA, removes in-kernel casts).
    x = jnp.transpose(x_nchw, (0, 2, 3, 1))
    x = jnp.pad(x, ((0, n_pad - n), (0, 0), (0, 0), (0, 0)))
    x_flat = x.reshape(n_pad * S_IMG, C).astype(jnp.bfloat16)

    R = b_tile * S_IMG           # flat input rows per tile
    m1 = R - 34                  # conv1 rows
    mP = R // 2 - 25             # half-compacted pooled rows
    P = b_tile * 64              # dense pooled rows (8x8 per image)
    m2 = P - 18                  # conv2 rows
    mt = m2 - 4                  # qj partial-sum rows

    out3 = pl.pallas_call(
        branch_kernel,
        out_shape=jax.ShapeDtypeStruct((g, b_tile, OUT_PAD), jnp.float32),
        grid=(g,),
        in_specs=[
            pl.BlockSpec((R, C), lambda i: (i, 0)),            # x (flat tile)
            pl.BlockSpec((C, 9 * C), lambda i: (0, 0)),        # conv1 wide W
            pl.BlockSpec((1, C), lambda i: (0, 0)),            # bn1 shift
            pl.BlockSpec((C, 9 * C), lambda i: (0, 0)),        # conv2 wide W
            pl.BlockSpec((1, C), lambda i: (0, 0)),            # bn2 shift
            pl.BlockSpec((C, OUT_PAD), lambda i: (0, 0)),      # fc weight (pad)
            pl.BlockSpec((1, OUT_PAD), lambda i: (0, 0)),      # fc bias (pad)
        ],
        out_specs=pl.BlockSpec((1, b_tile, OUT_PAD), lambda i: (i, 0, 0)),
        scratch_shapes=[
            pltpu.VMEM((R, 9 * C), jnp.float32),               # wide1
            pltpu.VMEM((_ru8(m1) + 8, C), jnp.float32),        # y1 (conv1 act)
            pltpu.VMEM((_ru8(mP), C), jnp.bfloat16),           # half-compact pool
            pltpu.VMEM((P, C), jnp.bfloat16),                  # dense 8x8 pool
            pltpu.VMEM((P, 9 * C), jnp.float32),               # wide2
            pltpu.VMEM((_ru8(m2), C), jnp.float32),            # y2 (conv2 act)
            pltpu.VMEM((P + 32, C), jnp.float32),              # qj partial sums
        ],
        compiler_params=pltpu.CompilerParams(
            dimension_semantics=("parallel",)),
    )(x_flat, w1w, sh1, w2w, sh2, wfc_pad, bfc_pad)
    return out3.reshape(n_pad, OUT_PAD)[:n, :NCLS]


def reference_forward(x_nchw, params):
    """Pure-JAX (XLA) reference mirroring the PyTorch forward (eval-mode BN)."""
    (w1, b1, g1, beta1, m1, v1,
     w2, b2, g2, beta2, m2, v2,
     wfc, bfc) = params
    dn = ('NCHW', 'OIHW', 'NCHW')

    def bn(z, g, beta, m, v):
        return ((z - m[None, :, None, None])
                / jnp.sqrt(v + BN_EPS)[None, :, None, None]
                * g[None, :, None, None] + beta[None, :, None, None])

    z = lax.conv_general_dilated(x_nchw, w1, (1, 1), 'VALID',
                                 dimension_numbers=dn) + b1[None, :, None, None]
    z = jnp.maximum(bn(z, g1, beta1, m1, v1), 0.0)
    n, c, h, w = z.shape
    z = z.reshape(n, c, h // 2, 2, w // 2, 2).max(axis=(3, 5))   # maxpool 2x2
    z = lax.conv_general_dilated(z, w2, (1, 1), 'VALID',
                                 dimension_numbers=dn) + b2[None, :, None, None]
    z = jnp.maximum(bn(z, g2, beta2, m2, v2), 0.0)
    z = z.mean(axis=(2, 3))                                      # global avg pool
    return z @ wfc.T + bfc[None, :]


def init_params(key):
    ks = jax.random.split(key, 16)
    kconv = 1.0 / jnp.sqrt(jnp.float32(C * 9))
    kfc = 1.0 / jnp.sqrt(jnp.float32(C))
    w1 = jax.random.uniform(ks[0], (C, C, 3, 3), jnp.float32, -kconv, kconv)
    b1 = jax.random.uniform(ks[1], (C,), jnp.float32, -kconv, kconv)
    w2 = jax.random.uniform(ks[2], (C, C, 3, 3), jnp.float32, -kconv, kconv)
    b2 = jax.random.uniform(ks[3], (C,), jnp.float32, -kconv, kconv)
    g1 = 1.0 + 0.1 * jax.random.normal(ks[4], (C,), jnp.float32)
    beta1 = 0.1 * jax.random.normal(ks[5], (C,), jnp.float32)
    m1 = 0.1 * jax.random.normal(ks[6], (C,), jnp.float32)
    v1 = jax.random.uniform(ks[7], (C,), jnp.float32, 0.5, 1.5)
    g2 = 1.0 + 0.1 * jax.random.normal(ks[8], (C,), jnp.float32)
    beta2 = 0.1 * jax.random.normal(ks[9], (C,), jnp.float32)
    m2 = 0.1 * jax.random.normal(ks[10], (C,), jnp.float32)
    v2 = jax.random.uniform(ks[11], (C,), jnp.float32, 0.5, 1.5)
    wfc = jax.random.uniform(ks[12], (NCLS, C), jnp.float32, -kfc, kfc)
    bfc = jax.random.uniform(ks[13], (NCLS,), jnp.float32, -kfc, kfc)
    return (w1, b1, g1, beta1, m1, v1,
            w2, b2, g2, beta2, m2, v2,
            wfc, bfc)


if __name__ == "__main__":
    key = jax.random.PRNGKey(0)
    kx, kp = jax.random.split(key)
    x = jax.random.normal(kx, (2, C, H_IN, H_IN), jnp.float32)   # NCHW like PyTorch
    params = init_params(kp)

    out = jax.jit(branch_forward)(x, params)
    out = jax.block_until_ready(out)
    assert out.shape == (2, NCLS), out.shape

    ref = reference_forward(x, params)
    err = float(jnp.max(jnp.abs(out - ref)))
    if err > 2e-2:
        raise AssertionError(f"Pallas kernel mismatch vs reference: max abs err={err}")

    print("KERNEL_OK")
</pallas_src>

<mosaic_0001>
module attributes {stable_mosaic.version = 11 : i64} {
  func.func @branch_kernel(%arg0: i32, %arg1: memref<256x64xbf16, #tpu.memory_space<vmem>>, %arg2: memref<64x576xbf16, #tpu.memory_space<vmem>>, %arg3: memref<1x64xf32, #tpu.memory_space<vmem>>, %arg4: memref<64x576xbf16, #tpu.memory_space<vmem>>, %arg5: memref<1x64xf32, #tpu.memory_space<vmem>>, %arg6: memref<64x128xf32, #tpu.memory_space<vmem>>, %arg7: memref<1x128xf32, #tpu.memory_space<vmem>>, %arg8: memref<1x1x128xf32, #tpu.memory_space<vmem>>, %arg9: memref<256x576xf32, #tpu.memory_space<vmem>>, %arg10: memref<232x64xf32, #tpu.memory_space<vmem>>, %arg11: memref<104x64xbf16, #tpu.memory_space<vmem>>, %arg12: memref<64x64xbf16, #tpu.memory_space<vmem>>, %arg13: memref<64x576xf32, #tpu.memory_space<vmem>>, %arg14: memref<48x64xf32, #tpu.memory_space<vmem>>, %arg15: memref<96x64xf32, #tpu.memory_space<vmem>>) attributes {dimension_semantics = [#tpu.dimension_semantics<parallel>], iteration_bounds = array<i64: 2>, scalar_prefetch = 0 : i64, scratch_operands = 7 : i64, tpu.core_type = #tpu.core_type<tc>, window_params = [{transform_indices = @transform_0, window_bounds = array<i64: 256, 64>}, {pipeline_mode = #tpu.pipeline_mode<synchronous>, transform_indices = @transform_1, window_bounds = array<i64: 64, 576>}, {pipeline_mode = #tpu.pipeline_mode<synchronous>, transform_indices = @transform_2, window_bounds = array<i64: 1, 64>}, {pipeline_mode = #tpu.pipeline_mode<synchronous>, transform_indices = @transform_3, window_bounds = array<i64: 64, 576>}, {pipeline_mode = #tpu.pipeline_mode<synchronous>, transform_indices = @transform_4, window_bounds = array<i64: 1, 64>}, {pipeline_mode = #tpu.pipeline_mode<synchronous>, transform_indices = @transform_5, window_bounds = array<i64: 64, 128>}, {pipeline_mode = #tpu.pipeline_mode<synchronous>, transform_indices = @transform_6, window_bounds = array<i64: 1, 128>}, {transform_indices = @transform_7, window_bounds = array<i64: 1, 1, 128>}]} {
    %c0 = arith.constant 0 : index
    %c0_0 = arith.constant 0 : index
    %0 = vector.load %arg1[%c0, %c0_0] : memref<256x64xbf16, #tpu.memory_space<vmem>>, vector<256x64xbf16>
    %c0_1 = arith.constant 0 : index
    %c0_2 = arith.constant 0 : index
    %1 = vector.load %arg2[%c0_1, %c0_2] : memref<64x576xbf16, #tpu.memory_space<vmem>>, vector<64x576xbf16>
    %cst = arith.constant dense<0.000000e+00> : vector<256x576xf32>
    %2 = tpu.matmul %0, %1, %cst {dimension_numbers = #tpu.dot_dimension_numbers<[1], [0], [0], [1], [0, 0, 1, 1], [], []>} : vector<256x64xbf16>, vector<64x576xbf16>, vector<256x576xf32> -> vector<256x576xf32>
    %c0_3 = arith.constant 0 : index
    %c0_4 = arith.constant 0 : index
    %3 = vector.load %arg9[%c0_3, %c0_4] : memref<256x576xf32, #tpu.memory_space<vmem>>, vector<256x576xf32>
    tpu.vector_store %arg9[%c0_3, %c0_4], %2 {strides = array<i32>} : memref<256x576xf32, #tpu.memory_space<vmem>>, vector<256x576xf32>,
    %c0_5 = arith.constant 0 : index
    %c0_6 = arith.constant 0 : index
    %4 = vector.load %arg9[%c0_5, %c0_6] : memref<256x576xf32, #tpu.memory_space<vmem>>, vector<222x64xf32>
    %c1 = arith.constant 1 : index
    %c64 = arith.constant 64 : index
    %5 = vector.load %arg9[%c1, %c64] : memref<256x576xf32, #tpu.memory_space<vmem>>, vector<222x64xf32>
    %6 = arith.addf %4, %5 : vector<222x64xf32>
    %c2 = arith.constant 2 : index
    %c128 = arith.constant 128 : index
    %7 = vector.load %arg9[%c2, %c128] : memref<256x576xf32, #tpu.memory_space<vmem>>, vector<222x64xf32>
    %8 = arith.addf %6, %7 : vector<222x64xf32>
    %c16 = arith.constant 16 : index
    %c192 = arith.constant 192 : index
    %9 = vector.load %arg9[%c16, %c192] : memref<256x576xf32, #tpu.memory_space<vmem>>, vector<222x64xf32>
    %10 = arith.addf %8, %9 : vector<222x64xf32>
    %c17 = arith.constant 17 : index
    %c256 = arith.constant 256 : index
    %11 = vector.load %arg9[%c17, %c256] : memref<256x576xf32, #tpu.memory_space<vmem>>, vector<222x64xf32>
    %12 = arith.addf %10, %11 : vector<222x64xf32>
    %c18 = arith.constant 18 : index
    %c320 = arith.constant 320 : index
    %13 = vector.load %arg9[%c18, %c320] : memref<256x576xf32, #tpu.memory_space<vmem>>, vector<222x64xf32>
    %14 = arith.addf %12, %13 : vector<222x64xf32>
    %c32 = arith.constant 32 : index
    %c384 = arith.constant 384 : index
    %15 = vector.load %arg9[%c32, %c384] : memref<256x576xf32, #tpu.memory_space<vmem>>, vector<222x64xf32>
    %16 = arith.addf %14, %15 : vector<222x64xf32>
    %c33 = arith.constant 33 : index
    %c448 = arith.constant 448 : index
    %17 = vector.load %arg9[%c33, %c448] : memref<256x576xf32, #tpu.memory_space<vmem>>, vector<222x64xf32>
    %18 = arith.addf %16, %17 : vector<222x64xf32>
    %c34 = arith.constant 34 : index
    %c512 = arith.constant 512 : index
    %19 = vector.load %arg9[%c34, %c512] : memref<256x576xf32, #tpu.memory_space<vmem>>, vector<222x64xf32>
    %20 = arith.addf %18, %19 : vector<222x64xf32>
    %c0_7 = arith.constant 0 : index
    %c0_8 = arith.constant 0 : index
    %21 = vector.load %arg3[%c0_7, %c0_8] : memref<1x64xf32, #tpu.memory_space<vmem>>, vector<1x64xf32>
    %22 = vector.broadcast %21 : vector<1x64xf32> to vector<222x64xf32>
    %23 = arith.addf %20, %22 : vector<222x64xf32>
    %cst_9 = arith.constant 0.000000e+00 : f32
    %24 = vector.broadcast %cst_9 : f32 to vector<222x64xf32>
    %25 = arith.maximumf %23, %24 : vector<222x64xf32>
    %c0_10 = arith.constant 0 : index
    %c0_11 = arith.constant 0 : index
    %26 = vector.load %arg10[%c0_10, %c0_11] : memref<232x64xf32, #tpu.memory_space<vmem>>, vector<222x64xf32>
    tpu.vector_store %arg10[%c0_10, %c0_11], %25 {strides = array<i32>} : memref<232x64xf32, #tpu.memory_space<vmem>>, vector<222x64xf32>,
    %c0_12 = arith.constant 0 : index
    %c0_13 = arith.constant 0 : index
    %27 = tpu.strided_load %arg10[%c0_12, %c0_13] {strides = array<i32: 2, 1>} : memref<232x64xf32, #tpu.memory_space<vmem>>, vector<103x64xf32>
    %c1_14 = arith.constant 1 : index
    %c0_15 = arith.constant 0 : index
    %28 = tpu.strided_load %arg10[%c1_14, %c0_15] {strides = array<i32: 2, 1>} : memref<232x64xf32, #tpu.memory_space<vmem>>, vector<103x64xf32>
    %29 = arith.maximumf %27, %28 : vector<103x64xf32>
    %c16_16 = arith.constant 16 : index
    %c0_17 = arith.constant 0 : index
    %30 = tpu.strided_load %arg10[%c16_16, %c0_17] {strides = array<i32: 2, 1>} : memref<232x64xf32, #tpu.memory_space<vmem>>, vector<103x64xf32>
    %c17_18 = arith.constant 17 : index
    %c0_19 = arith.constant 0 : index
    %31 = tpu.strided_load %arg10[%c17_18, %c0_19] {strides = array<i32: 2, 1>} : memref<232x64xf32, #tpu.memory_space<vmem>>, vector<103x64xf32>
    %32 = arith.maximumf %30, %31 : vector<103x64xf32>
    %33 = arith.maximumf %29, %32 : vector<103x64xf32>
    %34 = arith.truncf %33 : vector<103x64xf32> to vector<103x64xbf16>
    %c0_20 = arith.constant 0 : index
    %c0_21 = arith.constant 0 : index
    %35 = vector.load %arg11[%c0_20, %c0_21] : memref<104x64xbf16, #tpu.memory_space<vmem>>, vector<103x64xbf16>
    tpu.vector_store %arg11[%c0_20, %c0_21], %34 {strides = array<i32>} : memref<104x64xbf16, #tpu.memory_space<vmem>>, vector<103x64xbf16>,
    %cst_22 = arith.constant 0.000000e+00 : bf16
    %36 = vector.broadcast %cst_22 : bf16 to vector<64x64xbf16>
    %c0_23 = arith.constant 0 : index
    %c0_24 = arith.constant 0 : index
    %37 = vector.load %arg12[%c0_23, %c0_24] : memref<64x64xbf16, #tpu.memory_space<vmem>>, vector<64x64xbf16>
    tpu.vector_store %arg12[%c0_23, %c0_24], %36 {strides = array<i32>} : memref<64x64xbf16, #tpu.memory_space<vmem>>, vector<64x64xbf16>,
    %c0_25 = arith.constant 0 : index
    %c0_26 = arith.constant 0 : index
    %38 = vector.load %arg11[%c0_25, %c0_26] : memref<104x64xbf16, #tpu.memory_space<vmem>>, vector<7x64xbf16>
    %c0_27 = arith.constant 0 : index
    %c0_28 = arith.constant 0 : index
    %39 = vector.load %arg12[%c0_27, %c0_28] : memref<64x64xbf16, #tpu.memory_space<vmem>>, vector<7x64xbf16>
    tpu.vector_store %arg12[%c0_27, %c0_28], %38 {strides = array<i32>} : memref<64x64xbf16, #tpu.memory_space<vmem>>, vector<7x64xbf16>,
    %c16_29 = arith.constant 16 : index
    %c0_30 = arith.constant 0 : index
    %40 = vector.load %arg11[%c16_29, %c0_30] : memref<104x64xbf16, #tpu.memory_space<vmem>>, vector<7x64xbf16>
    %c8 = arith.constant 8 : index
    %c0_31 = arith.constant 0 : index
    %41 = vector.load %arg12[%c8, %c0_31] : memref<64x64xbf16, #tpu.memory_space<vmem>>, vector<7x64xbf16>
    tpu.vector_store %arg12[%c8, %c0_31], %40 {strides = array<i32>} : memref<64x64xbf16, #tpu.memory_space<vmem>>, vector<7x64xbf16>,
    %c32_32 = arith.constant 32 : index
    %c0_33 = arith.constant 0 : index
    %42 = vector.load %arg11[%c32_32, %c0_33] : memref<104x64xbf16, #tpu.memory_space<vmem>>, vector<7x64xbf16>
    %c16_34 = arith.constant 16 : index
    %c0_35 = arith.constant 0 : index
    %43 = vector.load %arg12[%c16_34, %c0_35] : memref<64x64xbf16, #tpu.memory_space<vmem>>, vector<7x64xbf16>
    tpu.vector_store %arg12[%c16_34, %c0_35], %42 {strides = array<i32>} : memref<64x64xbf16, #tpu.memory_space<vmem>>, vector<7x64xbf16>,
    %c48 = arith.constant 48 : index
    %c0_36 = arith.constant 0 : index
    %44 = vector.load %arg11[%c48, %c0_36] : memref<104x64xbf16, #tpu.memory_space<vmem>>, vector<7x64xbf16>
    %c24 = arith.constant 24 : index
    %c0_37 = arith.constant 0 : index
    %45 = vector.load %arg12[%c24, %c0_37] : memref<64x64xbf16, #tpu.memory_space<vmem>>, vector<7x64xbf16>
    tpu.vector_store %arg12[%c24, %c0_37], %44 {strides = array<i32>} : memref<64x64xbf16, #tpu.memory_space<vmem>>, vector<7x64xbf16>,
    %c64_38 = arith.constant 64 : index
    %c0_39 = arith.constant 0 : index
    %46 = vector.load %arg11[%c64_38, %c0_39] : memref<104x64xbf16, #tpu.memory_space<vmem>>, vector<7x64xbf16>
    %c32_40 = arith.constant 32 : index
    %c0_41 = arith.constant 0 : index
    %47 = vector.load %arg12[%c32_40, %c0_41] : memref<64x64xbf16, #tpu.memory_space<vmem>>, vector<7x64xbf16>
    tpu.vector_store %arg12[%c32_40, %c0_41], %46 {strides = array<i32>} : memref<64x64xbf16, #tpu.memory_space<vmem>>, vector<7x64xbf16>,
    %c80 = arith.constant 80 : index
    %c0_42 = arith.constant 0 : index
    %48 = vector.load %arg11[%c80, %c0_42] : memref<104x64xbf16, #tpu.memory_space<vmem>>, vector<7x64xbf16>
    %c40 = arith.constant 40 : index
    %c0_43 = arith.constant 0 : index
    %49 = vector.load %arg12[%c40, %c0_43] : memref<64x64xbf16, #tpu.memory_space<vmem>>, vector<7x64xbf16>
    tpu.vector_store %arg12[%c40, %c0_43], %48 {strides = array<i32>} : memref<64x64xbf16, #tpu.memory_space<vmem>>, vector<7x64xbf16>,
    %c96 = arith.constant 96 : index
    %c0_44 = arith.constant 0 : index
    %50 = vector.load %arg11[%c96, %c0_44] : memref<104x64xbf16, #tpu.memory_space<vmem>>, vector<7x64xbf16>
    %c48_45 = arith.constant 48 : index
    %c0_46 = arith.constant 0 : index
    %51 = vector.load %arg12[%c48_45, %c0_46] : memref<64x64xbf16, #tpu.memory_space<vmem>>, vector<7x64xbf16>
    tpu.vector_store %arg12[%c48_45, %c0_46], %50 {strides = array<i32>} : memref<64x64xbf16, #tpu.memory_space<vmem>>, vector<7x64xbf16>,
    %c0_47 = arith.constant 0 : index
    %c0_48 = arith.constant 0 : index
    %52 = vector.load %arg12[%c0_47, %c0_48] : memref<64x64xbf16, #tpu.memory_space<vmem>>, vector<64x64xbf16>
    %c0_49 = arith.constant 0 : index
    %c0_50 = arith.constant 0 : index
    %53 = vector.load %arg4[%c0_49, %c0_50] : memref<64x576xbf16, #tpu.memory_space<vmem>>, vector<64x576xbf16>
    %cst_51 = arith.constant dense<0.000000e+00> : vector<64x576xf32>
    %54 = tpu.matmul %52, %53, %cst_51 {dimension_numbers = #tpu.dot_dimension_numbers<[1], [0], [0], [1], [0, 0, 1, 1], [], []>} : vector<64x64xbf16>, vector<64x576xbf16>, vector<64x576xf32> -> vector<64x576xf32>
    %c0_52 = arith.constant 0 : index
    %c0_53 = arith.constant 0 : index
    %55 = vector.load %arg13[%c0_52, %c0_53] : memref<64x576xf32, #tpu.memory_space<vmem>>, vector<64x576xf32>
    tpu.vector_store %arg13[%c0_52, %c0_53], %54 {strides = array<i32>} : memref<64x576xf32, #tpu.memory_space<vmem>>, vector<64x576xf32>,
    %c0_54 = arith.constant 0 : index
    %c0_55 = arith.constant 0 : index
    %56 = vector.load %arg13[%c0_54, %c0_55] : memref<64x576xf32, #tpu.memory_space<vmem>>, vector<46x64xf32>
    %c1_56 = arith.constant 1 : index
    %c64_57 = arith.constant 64 : index
    %57 = vector.load %arg13[%c1_56, %c64_57] : memref<64x576xf32, #tpu.memory_space<vmem>>, vector<46x64xf32>
    %58 = arith.addf %56, %57 : vector<46x64xf32>
    %c2_58 = arith.constant 2 : index
    %c128_59 = arith.constant 128 : index
    %59 = vector.load %arg13[%c2_58, %c128_59] : memref<64x576xf32, #tpu.memory_space<vmem>>, vector<46x64xf32>
    %60 = arith.addf %58, %59 : vector<46x64xf32>
    %c8_60 = arith.constant 8 : index
    %c192_61 = arith.constant 192 : index
    %61 = vector.load %arg13[%c8_60, %c192_61] : memref<64x576xf32, #tpu.memory_space<vmem>>, vector<46x64xf32>
    %62 = arith.addf %60, %61 : vector<46x64xf32>
    %c9 = arith.constant 9 : index
    %c256_62 = arith.constant 256 : index
    %63 = vector.load %arg13[%c9, %c256_62] : memref<64x576xf32, #tpu.memory_space<vmem>>, vector<46x64xf32>
    %64 = arith.addf %62, %63 : vector<46x64xf32>
    %c10 = arith.constant 10 : index
    %c320_63 = arith.constant 320 : index
    %65 = vector.load %arg13[%c10, %c320_63] : memref<64x576xf32, #tpu.memory_space<vmem>>, vector<46x64xf32>
    %66 = arith.addf %64, %65 : vector<46x64xf32>
    %c16_64 = arith.constant 16 : index
    %c384_65 = arith.constant 384 : index
    %67 = vector.load %arg13[%c16_64, %c384_65] : memref<64x576xf32, #tpu.memory_space<vmem>>, vector<46x64xf32>
    %68 = arith.addf %66, %67 : vector<46x64xf32>
    %c17_66 = arith.constant 17 : index
    %c448_67 = arith.constant 448 : index
    %69 = vector.load %arg13[%c17_66, %c448_67] : memref<64x576xf32, #tpu.memory_space<vmem>>, vector<46x64xf32>
    %70 = arith.addf %68, %69 : vector<46x64xf32>
    %c18_68 = arith.constant 18 : index
    %c512_69 = arith.constant 512 : index
    %71 = vector.load %arg13[%c18_68, %c512_69] : memref<64x576xf32, #tpu.memory_space<vmem>>, vector<46x64xf32>
    %72 = arith.addf %70, %71 : vector<46x64xf32>
    %c0_70 = arith.constant 0 : index
    %c0_71 = arith.constant 0 : index
    %73 = vector.load %arg5[%c0_70, %c0_71] : memref<1x64xf32, #tpu.memory_space<vmem>>, vector<1x64xf32>
    %74 = vector.broadcast %73 : vector<1x64xf32> to vector<46x64xf32>
    %75 = arith.addf %72, %74 : vector<46x64xf32>
    %cst_72 = arith.constant 0.000000e+00 : f32
    %76 = vector.broadcast %cst_72 : f32 to vector<46x64xf32>
    %77 = arith.maximumf %75, %76 : vector<46x64xf32>
    %c0_73 = arith.constant 0 : index
    %c0_74 = arith.constant 0 : index
    %78 = vector.load %arg14[%c0_73, %c0_74] : memref<48x64xf32, #tpu.memory_space<vmem>>, vector<46x64xf32>
    tpu.vector_store %arg14[%c0_73, %c0_74], %77 {strides = array<i32>} : memref<48x64xf32, #tpu.memory_space<vmem>>, vector<46x64xf32>,
    %c0_75 = arith.constant 0 : index
    %c0_76 = arith.constant 0 : index
    %79 = vector.load %arg14[%c0_75, %c0_76] : memref<48x64xf32, #tpu.memory_space<vmem>>, vector<42x64xf32>
    %c1_77 = arith.constant 1 : index
    %c0_78 = arith.constant 0 : index
    %80 = vector.load %arg14[%c1_77, %c0_78] : memref<48x64xf32, #tpu.memory_space<vmem>>, vector<42x64xf32>
    %81 = arith.addf %79, %80 : vector<42x64xf32>
    %c2_79 = arith.constant 2 : index
    %c0_80 = arith.constant 0 : index
    %82 = vector.load %arg14[%c2_79, %c0_80] : memref<48x64xf32, #tpu.memory_space<vmem>>, vector<42x64xf32>
    %83 = arith.addf %81, %82 : vector<42x64xf32>
    %c3 = arith.constant 3 : index
    %c0_81 = arith.constant 0 : index
    %84 = vector.load %arg14[%c3, %c0_81] : memref<48x64xf32, #tpu.memory_space<vmem>>, vector<42x64xf32>
    %85 = arith.addf %83, %84 : vector<42x64xf32>
    %c4 = arith.constant 4 : index
    %c0_82 = arith.constant 0 : index
    %86 = vector.load %arg14[%c4, %c0_82] : memref<48x64xf32, #tpu.memory_space<vmem>>, vector<42x64xf32>
    %87 = arith.addf %85, %86 : vector<42x64xf32>
    %c0_83 = arith.constant 0 : index
    %c0_84 = arith.constant 0 : index
    %88 = vector.load %arg15[%c0_83, %c0_84] : memref<96x64xf32, #tpu.memory_space<vmem>>, vector<42x64xf32>
    tpu.vector_store %arg15[%c0_83, %c0_84], %87 {strides = array<i32>} : memref<96x64xf32, #tpu.memory_space<vmem>>, vector<42x64xf32>,
    %c0_85 = arith.constant 0 : index
    %c0_86 = arith.constant 0 : index
    %89 = tpu.strided_load %arg15[%c0_85, %c0_86] {strides = array<i32: 64, 1>} : memref<96x64xf32, #tpu.memory_space<vmem>>, vector<1x64xf32>
    %c8_87 = arith.constant 8 : index
    %c0_88 = arith.constant 0 : index
    %90 = tpu.strided_load %arg15[%c8_87, %c0_88] {strides = array<i32: 64, 1>} : memref<96x64xf32, #tpu.memory_space<vmem>>, vector<1x64xf32>
    %91 = arith.addf %89, %90 : vector<1x64xf32>
    %c16_89 = arith.constant 16 : index
    %c0_90 = arith.constant 0 : index
    %92 = tpu.strided_load %arg15[%c16_89, %c0_90] {strides = array<i32: 64, 1>} : memref<96x64xf32, #tpu.memory_space<vmem>>, vector<1x64xf32>
    %93 = arith.addf %91, %92 : vector<1x64xf32>
    %c24_91 = arith.constant 24 : index
    %c0_92 = arith.constant 0 : index
    %94 = tpu.strided_load %arg15[%c24_91, %c0_92] {strides = array<i32: 64, 1>} : memref<96x64xf32, #tpu.memory_space<vmem>>, vector<1x64xf32>
    %95 = arith.addf %93, %94 : vector<1x64xf32>
    %c32_93 = arith.constant 32 : index
    %c0_94 = arith.constant 0 : index
    %96 = tpu.strided_load %arg15[%c32_93, %c0_94] {strides = array<i32: 64, 1>} : memref<96x64xf32, #tpu.memory_space<vmem>>, vector<1x64xf32>
    %97 = arith.addf %95, %96 : vector<1x64xf32>
    %c0_95 = arith.constant 0 : index
    %c0_96 = arith.constant 0 : index
    %98 = vector.load %arg6[%c0_95, %c0_96] : memref<64x128xf32, #tpu.memory_space<vmem>>, vector<64x128xf32>
    %cst_97 = arith.constant dense<0.000000e+00> : vector<1x128xf32>
    %99 = tpu.matmul %97, %98, %cst_97 {dimension_numbers = #tpu.dot_dimension_numbers<[1], [0], [0], [1], [0, 0, 1, 1], [], []>} : vector<1x64xf32>, vector<64x128xf32>, vector<1x128xf32> -> vector<1x128xf32>
    %c0_98 = arith.constant 0 : index
    %c0_99 = arith.constant 0 : index
    %100 = vector.load %arg7[%c0_98, %c0_99] : memref<1x128xf32, #tpu.memory_space<vmem>>, vector<1x128xf32>
    %101 = arith.addf %99, %100 : vector<1x128xf32>
    %c0_100 = arith.constant 0 : index
    %c0_101 = arith.constant 0 : index
    %c0_102 = arith.constant 0 : index
    %102 = vector.load %arg8[%c0_100, %c0_101, %c0_102] : memref<1x1x128xf32, #tpu.memory_space<vmem>>, vector<1x1x128xf32>
    %103 = vector.shape_cast %102 : vector<1x1x128xf32> to vector<1x128xf32>
    %104 = vector.shape_cast %101 : vector<1x128xf32> to vector<1x1x128xf32>
    tpu.vector_store %arg8[%c0_100, %c0_101, %c0_102], %104 {strides = array<i32>} : memref<1x1x128xf32, #tpu.memory_space<vmem>>, vector<1x1x128xf32>,
    return
  }
  func.func @transform_0(%arg0: i32) -> (i32, i32) {
    %c0_i32 = arith.constant 0 : i32
    %c0_i32_0 = arith.constant 0 : i32
    return %arg0, %c0_i32 : i32, i32
  }
  func.func @transform_1(%arg0: i32) -> (i32, i32) {
    %c0_i32 = arith.constant 0 : i32
    %c0_i32_0 = arith.constant 0 : i32
    %c0_i32_1 = arith.constant 0 : i32
    return %c0_i32, %c0_i32_0 : i32, i32
  }
  func.func @transform_2(%arg0: i32) -> (i32, i32) {
    %c0_i32 = arith.constant 0 : i32
    %c0_i32_0 = arith.constant 0 : i32
    %c0_i32_1 = arith.constant 0 : i32
    return %c0_i32, %c0_i32_0 : i32, i32
  }
  func.func @transform_3(%arg0: i32) -> (i32, i32) {
    %c0_i32 = arith.constant 0 : i32
    %c0_i32_0 = arith.constant 0 : i32
    %c0_i32_1 = arith.constant 0 : i32
    return %c0_i32, %c0_i32_0 : i32, i32
  }
  func.func @transform_4(%arg0: i32) -> (i32, i32) {
    %c0_i32 = arith.constant 0 : i32
    %c0_i32_0 = arith.constant 0 : i32
    %c0_i32_1 = arith.constant 0 : i32
    return %c0_i32, %c0_i32_0 : i32, i32
  }
  func.func @transform_5(%arg0: i32) -> (i32, i32) {
    %c0_i32 = arith.constant 0 : i32
    %c0_i32_0 = arith.constant 0 : i32
    %c0_i32_1 = arith.constant 0 : i32
    return %c0_i32, %c0_i32_0 : i32, i32
  }
  func.func @transform_6(%arg0: i32) -> (i32, i32) {
    %c0_i32 = arith.constant 0 : i32
    %c0_i32_0 = arith.constant 0 : i32
    %c0_i32_1 = arith.constant 0 : i32
    return %c0_i32, %c0_i32_0 : i32, i32
  }
  func.func @transform_7(%arg0: i32) -> (i32, i32, i32) {
    %c0_i32 = arith.constant 0 : i32
    %c0_i32_0 = arith.constant 0 : i32
    %c0_i32_1 = arith.constant 0 : i32
    return %arg0, %c0_i32, %c0_i32_0 : i32, i32, i32
  }
}

</mosaic_0001>

<bundles_post_ra>
// kernel: branch_forward.1
= control target key start
LH: loop header
LB: loop body
LE: loop exit
PB: predicated region body
PF: predicated region fallthrough
CT: control target
= control target key end

     0   :  { %12 = vsyncpa [#allocation10], 0  ;;  %s5899_s0 = inlined_call_operand.vmem [shape: bf16[512,64], index: 0, kind: input, shape index: {}]   ;;  %s5900_s1 = inlined_call_operand.vmem [shape: bf16[64,576], index: 1, kind: input, shape index: {}]   ;;  %s5901_s2 = inlined_call_operand.vmem [shape: f32[1,64], index: 2, kind: input, shape index: {}]   ;;  %s5902_s3 = inlined_call_operand.vmem [shape: bf16[64,576], index: 3, kind: input, shape index: {}]   ;;  %s5903_s4 = inlined_call_operand.vmem [shape: f32[1,64], index: 4, kind: input, shape index: {}]   ;;  %s5904_s5 = inlined_call_operand.vmem [shape: f32[64,128], index: 5, kind: input, shape index: {}]   ;;  %s5905_s6 = inlined_call_operand.vmem [shape: f32[1,128], index: 6, kind: input, shape index: {}]   ;;  %s5906_s7 = inlined_call_operand.hbm [shape: f32[2,1,128], index: 7, kind: output, shape index: {}]  }
   0x1   :  { %14 = vsyncpa [#allocation10 + $0x1], 0  ;;  %s4323_s24 = smov 0   ;;  %s4325_s25 = smov 0  }
   0x2   :  { %s4327_s26 = smov 0   ;;  %s4329_s27 = smov 0  }
   0x3 LB: > { %s4344_s28 = sadd.s32 4294967295, %s4275_s27   ;;  %s3758_s29 = sadd.s32 4294967294, %s4275_s27   ;;  %s4275_s27 = sphi %s4329_s27, %s6051_s27   ;;  %s4271_s26 = sphi %s4327_s26, %s6050_s26   ;;  %s4267_s25 = sphi %s4325_s25, %s6049_s25   ;;  %s4263_s24 = sphi %s4323_s24, %s6048_s24  }
   0x4   : > { %s4348_s30 = sadd.s32 1, %s4275_s27   ;;  %s179_s8 = sadd.s32 1, %s4271_s26 }
   0x5   : > { %s176_s9 = ssub.s32 %s4275_s27, %s4348_s30  ;;  %p189_p0 = scmp.ne.s32.totalorder %s4271_s26, %s4267_s25 }
   0x6   : > { %p177_p1 = scmp.eq.s32.totalorder %s176_s9, 0  ;;  %p190_p2 = scmp.eq.s32.totalorder %s4344_s28, 1 }
   0x7   : > { %p195_p3 = scmp.ne.s32.totalorder %s4267_s25, %s4263_s24  ;;  %p196_p4 = scmp.eq.s32.totalorder %s3758_s29, 1 }
   0x8   : > { %s4359_s10 = scalar_select %p177_p1, %s4271_s26, %s179_s8  }
   0x9   : > { %p4361_p5 = por %p190_p2, %p189_p0  ;;  %p4365_p6 = por %p196_p4, %p195_p3 }
   0xa   : > { %p3761_p7 = scmp.ge.s32.totalorder %s4275_s27, 1  ;;  %p241_p8 = scmp.lt.s32.totalorder %s4275_s27, 3 }
   0xc   : > { %p242_p9 = pnand %p3761_p7, %p241_p8 }
   0xe   : > { %245 = sbr.rel (%p242_p9) target bundleno = 1276 (0x4fc), region = 48 }
  0x15   : > { %v4083_v0 = vld [vmem:[%s5900_s1 + $0x4] ss:$20 sps:$4 sm:$0xff]   ;;  %s3762_s15 = sshll.u32 %s4344_s28, 5  ;;  %v4085_v1 = vld [vmem:[%s5900_s1 + $0xc] ss:$20 sps:$4 sm:$0xff]   ;;  %v5907_v2 = vmov 0  }
  0x16   : > { %600 = vmatprep.mubr.bf16.mxu0 %v5907_v2  ;;  %793 = vmatprep.mubr.bf16.mxu1 %v5907_v2  ;;  %p273_p10 = scmp.lt.s32.totalorder %s3762_s15, 63  ;;  %vm519_vm0 = vcmask 523264   ;;  %v4087_v3 = vld [vmem:[%s5900_s1] ss:$20 sps:$4 sm:$0xff]   ;;  %v4088_v4 = vld [vmem:[%s5900_s1 + $0x8] ss:$20 sps:$4 sm:$0xff]  }
  0x17   : > { %568 = vmatprep.subr.bf16.mxu0 %v4083_v0  ;;  %2792 = vst.msk [vmem:[#allocation5] sm:$0xff] %vm519_vm0, %v5907_v2  ;;  %2793 = vst.msk [vmem:[#allocation5 + $0x8] sm:$0xff] %vm519_vm0, %v5907_v2  ;;  %761 = vmatprep.subr.bf16.mxu1 %v4085_v1  ;;  %v4089_v5 = vld [vmem:[%s5900_s1 + $0x2c] ss:$20 sps:$4 sm:$0xff]   ;;  %v4091_v6 = vld [vmem:[%s5900_s1 + $0x34] ss:$20 sps:$4 sm:$0xff]  }
  0x18   : > { %2794 = vst.msk [vmem:[#allocation5 + $0x10] sm:$0xff] %vm519_vm0, %v5907_v2  ;;  %2795 = vst.msk [vmem:[#allocation5 + $0x18] sm:$0xff] %vm519_vm0, %v5907_v2  ;;  %s6053_s15 = smov (!%p273_p10, %s3762_s15), 63  ;;  %569 = vmatpush1.bf16.msra.mxu0 %v4087_v3  ;;  %762 = vmatpush1.bf16.msra.mxu1 %v4088_v4  ;;  %v4093_v7 = vld [vmem:[%s5900_s1 + $0x28] ss:$20 sps:$4 sm:$0xff]   ;;  %vm1333_vm1 = vcmask 1046528  }
  0x19   : > { %570 = vmatprep.subr.bf16.mxu0 %v4089_v5  ;;  %v4094_v8 = vld [vmem:[%s5900_s1 + $0x30] ss:$20 sps:$4 sm:$0xff]   ;;  %763 = vmatprep.subr.bf16.mxu1 %v4091_v6  ;;  %v4095_v9 = vld [vmem:[%s5900_s1 + $0x54] ss:$20 sps:$4 sm:$0xff]   ;;  %s3763_s19 = sshll.u32 %s6053_s15, 2  ;;  %vm1557_vm2 = vcmask 1045504  }
  0x1a   : > { %v4097_v10 = vld [vmem:[%s5900_s1 + $0x5c] ss:$20 sps:$4 sm:$0xff]   ;;  %v4100_v12 = vld [vmem:[%s5900_s1 + $0x58] ss:$20 sps:$4 sm:$0xff]   ;;  %s4427_s18 = scalar_lea.vmem %s5899_s0, %s3763_s19  ;;  %v4106_v16 = vld [vmem:[%s5900_s1 + $0x80] ss:$20 sps:$4 sm:$0xff]  }
  0x1b   : > { %v4099_v11 = vld [vmem:[%s5900_s1 + $0x50] ss:$20 sps:$4 sm:$0xff]   ;;  %v4105_v15 = vld [vmem:[%s5900_s1 + $0x78] ss:$20 sps:$4 sm:$0xff]   ;;  %v4125_v22 = vld [vmem:[%s5900_s1 + $0x60] ss:$20 sps:$4 sm:$0xff]  }
  0x1c   : > { %571 = vmatpush1.bf16.msra.mxu0 %v4093_v7  ;;  %764 = vmatpush1.bf16.msra.mxu1 %v4094_v8  ;;  %v4101_v13 = vld [vmem:[%s5900_s1 + $0x7c] ss:$20 sps:$4 sm:$0xff]   ;;  %v4103_v14 = vld [vmem:[%s5900_s1 + $0x84] ss:$20 sps:$4 sm:$0xff]   ;;  %v4445_v18 = vld [vmem:[%s4427_s18 + $0x8] sm:$0xff]   ;;  %s4278_s17 = smov 64  }
  0x1d   : > { %572 = vmatprep.subr.bf16.mxu0 %v4095_v9  ;;  %765 = vmatprep.subr.bf16.mxu1 %v4097_v10  ;;  %v4436_v17 = vld [vmem:[%s4427_s18] sm:$0xff]   ;;  %v4123_v20 = vld [vmem:[%s5900_s1 + $0x38] ss:$20 sps:$4 sm:$0xff]   ;;  %v4460_v21 = vld [vmem:[%s4427_s18 + $0x10] sm:$0xff]   ;;  %vm2773_vm3 = vcmask 519168   ;;  %vm2805_vm6 = vcmask 523268  }
  0x1e   : > { %v4122_v19 = vld [vmem:[%s5900_s1 + $0x10] ss:$20 sps:$4 sm:$0xff]   ;;  %v4126_v23 = vld [vmem:[%s5900_s1 + $0x88] ss:$20 sps:$4 sm:$0xff]   ;;  %vm2787_vm4 = vsmask.f32 3328 }
  0x1f   : > { %v4475_v24 = vld [vmem:[%s4427_s18 + $0x18] sm:$0xff]   ;;  %v4484_v25 = vld [vmem:[%s4427_s18 + $0x20] sm:$0xff]   ;;  %v4112_v26 = vld [vmem:[%s4427_s18 + $0x28] sm:$0xff]   ;;  %vm2806_vm7 = vsmask.f32 7424  ;;  %vm2633_vm9 = vcmask 521216  }
  0x20   : > { %573 = vmatpush1.bf16.msra.mxu0 %v4099_v11  ;;  %766 = vmatpush1.bf16.msra.mxu1 %v4100_v12  ;;  %v4113_v27 = vld [vmem:[%s4427_s18 + $0x30] sm:$0xff]   ;;  %v4114_v28 = vld [vmem:[%s4427_s18 + $0x38] sm:$0xff]   ;;  %v4115_v29 = vld [vmem:[%s4427_s18 + $0x40] sm:$0xff]   ;;  %vm4280_vm10 = vmmov 0   ;;  %s270_s13 = sand.u32 1, %s4267_s25   ;;  %s3899_s14 = sshll.u32 %s4344_s28, 4 }
  0x21   : > { %574 = vmatprep.subr.bf16.mxu0 %v4101_v13  ;;  %767 = vmatprep.subr.bf16.mxu1 %v4103_v14  ;;  %v4116_v30 = vld [vmem:[%s4427_s18 + $0x48] sm:$0xff]   ;;  %v4117_v31 = vld [vmem:[%s4427_s18 + $0x50] sm:$0xff]   ;;  %v4118_v32 = vld [vmem:[%s4427_s18 + $0x58] sm:$0xff]   ;;  %s271_s16 = scalar_lea.vmem [#allocation9], %s270_s13  ;;  %s5857_s22 = scalar_lea.hbm %s5906_s7, %s3899_s14 }
  0x22   : > { %v4119_v33 = vld [vmem:[%s4427_s18 + $0x60] sm:$0xff]   ;;  %v4120_v34 = vld [vmem:[%s4427_s18 + $0x68] sm:$0xff]   ;;  %v4121_v35 = vld [vmem:[%s4427_s18 + $0x70] sm:$0xff]   ;;  %s3691_s23 = scalar_lea.sflag [#allocation10], %s270_s13  ;;  %s4282_s28 = smov [#allocation9]  }
  0x23   : > { %v4124_v36 = vld [vmem:[%s4427_s18 + $0x78] sm:$0xff]   ;;  %vm5386_vm5 = vmand %vm2773_vm3, %vm2787_vm4  ;;  %s3703_s18 = sshll.u32 %s271_s16, 4  ;;  %s4217_s29 = sshll.u32 %s4282_s28, 4  ;;  %s5859_s18 = int_to_ptr.vmem [resolvable:$true] %s3703_s18  ;;  %s4218_s29 = int_to_ptr.vmem [resolvable:$false] %s4217_s29 }
  0x24   : > { %575 = vmatpush1.bf16.msra.mxu0 %v4105_v15  ;;  %768 = vmatpush1.bf16.msra.mxu1 %v4106_v16  ;;  %vm5478_vm8 = vmand %vm2805_vm6, %vm2806_vm7  ;;  %s4213_s19 = scalar_lea.vmem %s5859_s18, 16  ;;  %s4219_s8 = scalar_lea.vmem %s4218_s29, 32 }
  0x25   : > { %3952 = vmatprep.subr.bf16.mxu0 %v4122_v19  ;;  %p4214_p11 = scmp.ne.s32.totalorder %s5859_s18, %s4213_s19  ;;  %p4220_p0 = scmp.lt.s32.totalorder %s5859_s18, %s4218_s29 }
  0x26   : > { %p4221_p1 = scmp.lt.s32.totalorder %s4219_s8, %s4213_s19 }
  0x27   : > { %3800 = vmatmul.mubr.msk.bf16.vlgmr.msra.gmra.mrb[0].mxu0 %vm519_vm0, %v4436_v17  ;;  %3816 = vmatmul.mubr.msk.bf16.vlgmr.msra.gmra.mrb[0].mxu1 %vm519_vm0, %v4436_v17  ;;  %p4215_p12 = pnand %p4214_p11, %p4361_p5 }
  0x28   : > { %610 = vmatprep.mubr.bf16.mxu0 %v5907_v2  ;;  %803 = vmatprep.mubr.bf16.mxu1 %v5907_v2  ;;  %p4222_p2 = por %p4221_p1, %p4220_p0 }
  0x29   : > { %3953 = vmatpush3.bf16.msra.mxu0 %v4122_v19  ;;  %p4216_p13 = pneg %p4215_p12 }
  0x2a   : > { %3954 = vmatprep.subr.bf16.mxu0 %v4123_v20 }
  0x2b   : > { %p4223_p3 = pnand %p4222_p2, %p4216_p13 }
  0x2d   : > { %3955 = vmatpush3.bf16.msra.mxu0 %v4123_v20 }
  0x2e   : > { %3956 = vmatprep.subr.bf16.mxu0 %v4125_v22 }
  0x2f   : > { %3801 = vmatmul.mubr.msk.bf16.gmra.mrb[4].mxu0 %vm519_vm0, %v4445_v18  ;;  %3817 = vmatmul.mubr.msk.bf16.gmra.mrb[4].mxu1 %vm519_vm0, %v4445_v18 }
  0x30   : > { %620 = vmatprep.mubr.bf16.mxu0 %v5907_v2  ;;  %813 = vmatprep.mubr.bf16.mxu1 %v5907_v2 }
  0x31   : > { %3957 = vmatpush3.bf16.msra.mxu0 %v4125_v22 }
  0x32   : > { %3958 = vmatprep.subr.bf16.mxu0 %v4126_v23 }
  0x35   : > { %3959 = vmatpush3.bf16.msra.mxu0 %v4126_v23 }
  0x37   : > { %3802 = vmatmul.mubr.msk.bf16.gmra.mrb[8].mxu0 %vm519_vm0, %v4460_v21  ;;  %3818 = vmatmul.mubr.msk.bf16.gmra.mrb[8].mxu1 %vm519_vm0, %v4460_v21 }
  0x38   : > { %630 = vmatprep.mubr.bf16.mxu0 %v5907_v2  ;;  %823 = vmatprep.mubr.bf16.mxu1 %v5907_v2 }
  0x3f   : > { %3803 = vmatmul.mubr.msk.bf16.gmra.mrb[12].mxu0 %vm519_vm0, %v4475_v24  ;;  %3819 = vmatmul.mubr.msk.bf16.gmra.mrb[12].mxu1 %vm519_vm0, %v4475_v24 }
  0x40   : > { %640 = vmatprep.mubr.bf16.mxu0 %v5907_v2  ;;  %833 = vmatprep.mubr.bf16.mxu1 %v5907_v2 }
  0x47   : > { %3804 = vmatmul.mubr.msk.bf16.gmra.mrb[16].mxu0 %vm519_vm0, %v4484_v25  ;;  %3820 = vmatmul.mubr.msk.bf16.gmra.mrb[16].mxu1 %vm519_vm0, %v4484_v25 }
  0x48   : > { %650 = vmatprep.mubr.bf16.mxu0 %v5907_v2  ;;  %843 = vmatprep.mubr.bf16.mxu1 %v5907_v2 }
  0x4f   : > { %3805 = vmatmul.mubr.msk.bf16.gmra.mrb[20].mxu0 %vm519_vm0, %v4112_v26  ;;  %3821 = vmatmul.mubr.msk.bf16.gmra.mrb[20].mxu1 %vm519_vm0, %v4112_v26 }
  0x50   : > { %660 = vmatprep.mubr.bf16.mxu0 %v5907_v2  ;;  %853 = vmatprep.mubr.bf16.mxu1 %v5907_v2 }
  0x57   : > { %3806 = vmatmul.mubr.msk.bf16.gmra.mrb[24].mxu0 %vm519_vm0, %v4113_v27  ;;  %3822 = vmatmul.mubr.msk.bf16.gmra.mrb[24].mxu1 %vm519_vm0, %v4113_v27 }
  0x58   : > { %670 = vmatprep.mubr.bf16.mxu0 %v5907_v2  ;;  %863 = vmatprep.mubr.bf16.mxu1 %v5907_v2 }
  0x5f   : > { %3807 = vmatmul.mubr.msk.bf16.gmra.mrb[28].mxu0 %vm519_vm0, %v4114_v28  ;;  %3823 = vmatmul.mubr.msk.bf16.gmra.mrb[28].mxu1 %vm519_vm0, %v4114_v28 }
  0x60   : > { %680 = vmatprep.mubr.bf16.mxu0 %v5907_v2  ;;  %873 = vmatprep.mubr.bf16.mxu1 %v5907_v2 }
  0x67   : > { %3808 = vmatmul.mubr.msk.bf16.gmra.mrb[32].mxu0 %vm519_vm0, %v4115_v29  ;;  %3824 = vmatmul.mubr.msk.bf16.gmra.mrb[32].mxu1 %vm519_vm0, %v4115_v29 }
  0x68   : > { %690 = vmatprep.mubr.bf16.mxu0 %v5907_v2  ;;  %883 = vmatprep.mubr.bf16.mxu1 %v5907_v2 }
  0x6f   : > { %3809 = vmatmul.mubr.msk.bf16.gmra.mrb[36].mxu0 %vm519_vm0, %v4116_v30  ;;  %3825 = vmatmul.mubr.msk.bf16.gmra.mrb[36].mxu1 %vm519_vm0, %v4116_v30 }
  0x70   : > { %700 = vmatprep.mubr.bf16.mxu0 %v5907_v2  ;;  %893 = vmatprep.mubr.bf16.mxu1 %v5907_v2 }
  0x77   : > { %3810 = vmatmul.mubr.msk.bf16.gmra.mrb[40].mxu0 %vm519_vm0, %v4117_v31  ;;  %3826 = vmatmul.mubr.msk.bf16.gmra.mrb[40].mxu1 %vm519_vm0, %v4117_v31 }
  0x78   : > { %710 = vmatprep.mubr.bf16.mxu0 %v5907_v2  ;;  %903 = vmatprep.mubr.bf16.mxu1 %v5907_v2 }
  0x7f   : > { %3811 = vmatmul.mubr.msk.bf16.gmra.mrb[44].mxu0 %vm519_vm0, %v4118_v32  ;;  %3827 = vmatmul.mubr.msk.bf16.gmra.mrb[44].mxu1 %vm519_vm0, %v4118_v32 }
  0x80   : > { %720 = vmatprep.mubr.bf16.mxu0 %v5907_v2  ;;  %913 = vmatprep.mubr.bf16.mxu1 %v5907_v2 }
  0x87   : > { %3812 = vmatmul.mubr.msk.bf16.gmra.mrb[48].mxu0 %vm519_vm0, %v4119_v33  ;;  %3828 = vmatmul.mubr.msk.bf16.gmra.mrb[48].mxu1 %vm519_vm0, %v4119_v33 }
  0x88   : > { %730 = vmatprep.mubr.bf16.mxu0 %v5907_v2  ;;  %923 = vmatprep.mubr.bf16.mxu1 %v5907_v2 }
  0x8f   : > { %3813 = vmatmul.mubr.msk.bf16.gmra.mrb[52].mxu0 %vm519_vm0, %v4120_v34  ;;  %3829 = vmatmul.mubr.msk.bf16.gmra.mrb[52].mxu1 %vm519_vm0, %v4120_v34 }
  0x90   : > { %740 = vmatprep.mubr.bf16.mxu0 %v5907_v2  ;;  %933 = vmatprep.mubr.bf16.mxu1 %v5907_v2 }
  0x97   : > { %3814 = vmatmul.mubr.msk.bf16.gmra.mrb[56].mxu0 %vm519_vm0, %v4121_v35  ;;  %3830 = vmatmul.mubr.msk.bf16.gmra.mrb[56].mxu1 %vm519_vm0, %v4121_v35 }
  0x98   : > { %750 = vmatprep.mubr.bf16.mxu0 %v5907_v2  ;;  %943 = vmatprep.mubr.bf16.mxu1 %v5907_v2 }
  0x9f   : > { %3815 = vmatmul.mubr.msk.bf16.gmra.mrb[60].mxu0 %vm519_vm0, %v4124_v36  ;;  %3831 = vmatmul.mubr.msk.bf16.gmra.mrb[60].mxu1 %vm519_vm0, %v4124_v36 }
  0xa0   : > { %3960 = vmatprep.mubr.msk.bf16.mxu0 %vm519_vm0, %v4436_v17  ;;  %3015 = vmatprep.mubr.bf16.mxu1 %v5907_v2 }
  0xa7   : > { %3961 = vmatmul.mubr.msk.bf16.vlgmr.msra.gmra.mrb[64].mxu0 %vm519_vm0, %v4445_v18 }
  0xa8   : > { %3964 = vmatprep.mubr.msk.bf16.mxu0 %vm519_vm0, %v4460_v21 }
  0xaf   : > { %3965 = vmatmul.mubr.msk.bf16.gmra.mrb[68].mxu0 %vm519_vm0, %v4475_v24 }
  0xb0   : > { %3968 = vmatprep.mubr.msk.bf16.mxu0 %vm519_vm0, %v4484_v25 }
  0xb7   : > { %3969 = vmatmul.mubr.msk.bf16.gmra.mrb[72].mxu0 %vm519_vm0, %v4112_v26 }
  0xb8   : > { %3972 = vmatprep.mubr.msk.bf16.mxu0 %vm519_vm0, %v4113_v27 }
  0xbf   : > { %3973 = vmatmul.mubr.msk.bf16.gmra.mrb[76].mxu0 %vm519_vm0, %v4114_v28 }
  0xc0   : > { %3976 = vmatprep.mubr.msk.bf16.mxu0 %vm519_vm0, %v4115_v29 }
  0xc7   : > { %3977 = vmatmul.mubr.msk.bf16.gmra.mrb[80].mxu0 %vm519_vm0, %v4116_v30 }
  0xc8   : > { %3980 = vmatprep.mubr.msk.bf16.mxu0 %vm519_vm0, %v4117_v31 }
  0xcf   : > { %3981 = vmatmul.mubr.msk.bf16.gmra.mrb[84].mxu0 %vm519_vm0, %v4118_v32 }
  0xd0   : > { %3984 = vmatprep.mubr.msk.bf16.mxu0 %vm519_vm0, %v4119_v33 }
  0xd7   : > { %3985 = vmatmul.mubr.msk.bf16.gmra.mrb[88].mxu0 %vm519_vm0, %v4120_v34 }
  0xd8   : > { %3988 = vmatprep.mubr.msk.bf16.mxu0 %vm519_vm0, %v4121_v35 }
  0xdf   : > { %3989 = vmatmul.mubr.msk.bf16.gmra.mrb[92].mxu0 %vm519_vm0, %v4124_v36 }
  0xfa   : > { %v602_v37 = vpop.f32.mrb[0].mxu0  ;;  %v795_v38 = vpop.f32.mrb[0].mxu1 }
  0xfb   : > { %1115 = vst [vmem:[#allocation2] sm:$0xff] %v602_v37  ;;  %v604_v39 = vpop.f32.mrb[1].mxu0  ;;  %v797_v40 = vpop.f32.mrb[1].mxu1 }
  0xfc   : > { %1116 = vst [vmem:[#allocation2 + $0x8] sm:$0xff] %v604_v39  ;;  %v606_v41 = vpop.f32.mrb[2].mxu0  ;;  %v799_v42 = vpop.f32.mrb[2].mxu1 }
  0xfd   : > { %1120 = vst [vmem:[#allocation2 + $0x28] sm:$0xff] %v606_v41  ;;  %v4567_v43 = vpop.f32.mrb[3].mxu0  ;;  %v801_v44 = vpop.f32.mrb[3].mxu1  ;;  %v1335_v51 = vrot.slane %v606_v41, 1 }
  0xfe   : > { %v5910_v56 = vrot.slane %v4567_v43, 2 }
 0x102   : > { %v612_v45 = vpop.f32.mrb[4].mxu0  ;;  %v805_v46 = vpop.f32.mrb[4].mxu1  ;;  %v1303_v47 = vld [vmem:[#allocation2] sm:$0xfe] }
 0x103   : > { %1125 = vst [vmem:[#allocation2 + $0x50] sm:$0xff] %v612_v45  ;;  %v614_v48 = vpop.f32.mrb[5].mxu0  ;;  %1127 = vst [vmem:[#allocation2 + $0x60] sm:$0xff] %v805_v46  ;;  %v807_v49 = vpop.f32.mrb[5].mxu1  ;;  %v1334_v50 = vrot.slane %v1303_v47, 1  ;;  %v1337_v52 = vrot.slane %v612_v45, 1 }
 0x104   : > { %v616_v53 = vpop.f32.mrb[6].mxu0  ;;  %v4569_v54 = vpop.f32.mrb[6].mxu1  ;;  %v1561_v55 = vrot.slane %v614_v48, 2 }
 0x105   : > { %1130 = vst [vmem:[#allocation2 + $0x78] sm:$0xff] %v616_v53  ;;  %v618_v57 = vpop.f32.mrb[7].mxu0  ;;  %v1336_v58 = vsel %vm1333_vm1, %v1334_v50, %v1335_v51  ;;  %v811_v59 = vpop.f32.mrb[7].mxu1  ;;  %v1338_v60 = vsel %vm1333_vm1, %v1335_v51, %v1337_v52  ;;  %v1339_v61 = vrot.slane %v616_v53, 1  ;;  %v1957_v8 = vrot.slane %v4569_v54, 2 }
 0x106   : > { %1389 = vrot.lane.b32.xlu0 %v1336_v58, %s4278_s17  ;;  %1391 = vrot.lane.b32.xlu1 %v1338_v60, %s4278_s17  ;;  %v1563_v62 = vrot.slane %v618_v57, 2  ;;  %v4579_v63 = vsel %vm1557_vm2, %v5910_v56, %v1561_v55  ;;  %v5909_v14 = vrot.slane %v4569_v54, 1 }
 0x107   : > { %v1340_v0 = vsel %vm1333_vm1, %v1337_v52, %v1339_v61 }
 0x108   : > { %v4583_v1 = vsel %vm1557_vm2, %v1561_v55, %v1563_v62 }
 0x10a   : > { %v622_v3 = vpop.f32.mrb[8].mxu0  ;;  %v815_v4 = vpop.f32.mrb[8].mxu1  ;;  %1673 = vrot.lane.b32.xlu0 %v614_v48, %s4278_s17  ;;  %1675 = vrot.lane.b32.xlu1 %v618_v57, %s4278_s17  ;;  %v1952_v5 = vld [vmem:[#allocation2 + $0x60] sm:$0xfc] }
 0x10b   : > { %1135 = vst [vmem:[#allocation2 + $0xa0] sm:$0xff] %v622_v3  ;;  %v624_v6 = vpop.f32.mrb[9].mxu0  ;;  %v817_v7 = vpop.f32.mrb[9].mxu1  ;;  %v1341_v9 = vrot.slane %v622_v3, 1  ;;  %v1844_v10 = vrot.slane %v815_v4, 1  ;;  %v1959_v11 = vrot.slane %v815_v4, 2 }
 0x10c   : > { %v626_v12 = vpop.f32.mrb[10].mxu0  ;;  %1138 = vst [vmem:[#allocation2 + $0xb8] sm:$0xff] %v817_v7  ;;  %v819_v13 = vpop.f32.mrb[10].mxu1  ;;  %v1565_v15 = vrot.slane %v624_v6, 2  ;;  %v1956_v18 = vrot.slane %v1952_v5, 2 }
 0x10d   : > { %1140 = vst [vmem:[#allocation2 + $0xc8] sm:$0xff] %v626_v12  ;;  %v628_v16 = vpop.f32.mrb[11].mxu0  ;;  %v4589_v17 = vpop.f32.mrb[11].mxu1  ;;  %v1342_v19 = vsel %vm1333_vm1, %v1339_v61, %v1341_v9  ;;  %v1343_v20 = vrot.slane %v626_v12, 1  ;;  %v1960_v21 = vsel %vm1557_vm2, %v1957_v8, %v1959_v11  ;;  %v1846_v23 = vrot.slane %v819_v13, 1 }
 0x10e   : > { %1393 = vrot.lane.b32.xlu0 %v1340_v0, %s4278_s17  ;;  %1143 = vst [vmem:[#allocation2 + $0xe0] sm:$0xff] %v4589_v17  ;;  %1395 = vrot.lane.b32.xlu1 %v1342_v19, %s4278_s17  ;;  %v1567_v22 = vrot.slane %v628_v16, 2  ;;  %v1961_v24 = vrot.slane %v819_v13, 2  ;;  %v4598_v26 = vsel %vm1557_vm2, %v1563_v62, %v1565_v15  ;;  %v4603_v27 = vsel %vm1333_vm1, %v5909_v14, %v1844_v10 }
 0x10f   : > { %v1344_v25 = vsel %vm1333_vm1, %v1341_v9, %v1343_v20  ;;  %v4609_v29 = vsel %vm1333_vm1, %v1844_v10, %v1846_v23  ;;  %v1958_v31 = vsel %vm1557_vm2, %v1956_v18, %v1957_v8  ;;  %v2210_v34 = vrot.slane %v4589_v17, 1 }
 0x110   : > { %v4606_v28 = vsel %vm1557_vm2, %v1959_v11, %v1961_v24  ;;  %v4612_v30 = vsel %vm1557_vm2, %v1565_v15, %v1567_v22 }
 0x112   : > { %v825_v32 = vpop.f32.mrb[12].mxu1  ;;  %v632_v33 = vpop.f32.mrb[12].mxu0  ;;  %2011 = vrot.lane.b32.xlu0 %v1958_v31, %s4278_s17  ;;  %1679 = vrot.lane.b32.xlu1 %v628_v16, %s4278_s17 }
 0x113   : > { %1145 = vst [vmem:[#allocation2 + $0xf0] sm:$0xff] %v632_v33  ;;  %v4618_v35 = vpop.f32.mrb[13].mxu0  ;;  %v827_v36 = vpop.f32.mrb[13].mxu1  ;;  %v1848_v37 = vrot.slane %v825_v32, 1  ;;  %v1963_v38 = vrot.slane %v825_v32, 2  ;;  %v1345_v44 = vrot.slane %v632_v33, 1 }
 0x114   : > { %1148 = vst [vmem:[#allocation2 + $0x108] sm:$0xff] %v827_v36  ;;  %v636_v39 = vpop.f32.mrb[14].mxu0  ;;  %v829_v40 = vpop.f32.mrb[14].mxu1  ;;  %v1569_v41 = vrot.slane %v4618_v35, 2  ;;  %v2212_v42 = vrot.slane %v827_v36, 1 }
 0x115   : > { %1150 = vst [vmem:[#allocation2 + $0x118] sm:$0xff] %v636_v39  ;;  %v638_v45 = vpop.f32.mrb[15].mxu0  ;;  %v831_v46 = vpop.f32.mrb[15].mxu1  ;;  %v1964_v47 = vsel %vm1557_vm2, %v1961_v24, %v1963_v38  ;;  %v1347_v48 = vrot.slane %v636_v39, 1  ;;  %v1850_v49 = vrot.slane %v829_v40, 1  ;;  %v1965_v50 = vrot.slane %v829_v40, 2 }
 0x116   : > { %1677 = vrot.lane.b32.xlu0 %v624_v6, %s4278_s17  ;;  %1153 = vst [vmem:[#allocation2 + $0x130] sm:$0xff] %v831_v46  ;;  %2013 = vrot.lane.b32.xlu1 %v1960_v21, %s4278_s17  ;;  %v1571_v51 = vrot.slane %v638_v45, 2  ;;  %v2213_v52 = vsel %vm1333_vm1, %v2210_v34, %v2212_v42  ;;  %v4628_v53 = vsel %vm1333_vm1, %v1343_v20, %v1345_v44  ;;  %v2214_v58 = vrot.slane %v831_v46, 1  ;;  %v2179_v0 = vld [vmem:[#allocation2 + $0xb8] sm:$0xfe] }
 0x117   : > { %v4631_v55 = vsel %vm1333_vm1, %v1345_v44, %v1347_v48  ;;  %v4634_v57 = vsel %vm1557_vm2, %v1963_v38, %v1965_v50  ;;  %v4637_v59 = vsel %vm1333_vm1, %v1846_v23, %v1848_v37  ;;  %v4640_v60 = vsel %vm1557_vm2, %v1567_v22, %v1569_v41 }
 0x118   : > { %5922 = vst [vmem:[#allocation12_spill] sm:$0xff] %v4640_v60  ;;  %v4643_v61 = vsel %vm1333_vm1, %v1848_v37, %v1850_v49  ;;  %v4646_v62 = vsel %vm1557_vm2, %v1569_v41, %v1571_v51  ;;  %v4649_v3 = vsel %vm1333_vm1, %v2212_v42, %v2214_v58  ;;  %v2209_v12 = vrot.slane %v2179_v0, 1 }
 0x119   : > { %5923 = vst [vmem:[#allocation13_spill] sm:$0xff] %v4643_v61  ;;  %5924 = vst [vmem:[#allocation14_spill] sm:$0xff] %v4646_v62 }
 0x11a   : > { %v835_v4 = vpop.f32.mrb[16].mxu1  ;;  %v642_v5 = vpop.f32.mrb[16].mxu0  ;;  %1397 = vrot.lane.b32.xlu0 %v1344_v25, %s4278_s17  ;;  %1683 = vrot.lane.b32.xlu1 %v638_v45, %s4278_s17  ;;  %v2211_v41 = vsel %vm1333_vm1, %v2209_v12, %v2210_v34 }
 0x11b   : > { %1155 = vst [vmem:[#allocation2 + $0x140] sm:$0xff] %v642_v5  ;;  %v4653_v6 = vpop.f32.mrb[17].mxu0  ;;  %v837_v7 = vpop.f32.mrb[17].mxu1  ;;  %v1349_v8 = vrot.slane %v642_v5, 1  ;;  %v1852_v9 = vrot.slane %v835_v4, 1  ;;  %v1967_v10 = vrot.slane %v835_v4, 2 }
 0x11c   : > { %1158 = vst [vmem:[#allocation2 + $0x158] sm:$0xff] %v837_v7  ;;  %v646_v11 = vpop.f32.mrb[18].mxu0  ;;  %v839_v13 = vpop.f32.mrb[18].mxu1  ;;  %v1573_v15 = vrot.slane %v4653_v6, 2  ;;  %v2216_v16 = vrot.slane %v837_v7, 1 }
 0x11d   : > { %1160 = vst [vmem:[#allocation2 + $0x168] sm:$0xff] %v646_v11  ;;  %v4656_v18 = vpop.f32.mrb[19].mxu0  ;;  %v841_v19 = vpop.f32.mrb[19].mxu1  ;;  %v1350_v20 = vsel %vm1333_vm1, %v1347_v48, %v1349_v8  ;;  %v4660_v21 = vsel %vm1557_vm2, %v1965_v50, %v1967_v10  ;;  %v1854_v22 = vrot.slane %v839_v13, 1  ;;  %v1969_v23 = vrot.slane %v839_v13, 2 }
 0x11e   : > { %2015 = vrot.lane.b32.xlu0 %v4606_v28, %s4278_s17  ;;  %2017 = vrot.lane.b32.xlu1 %v1964_v47, %s4278_s17  ;;  %1163 = vst [vmem:[#allocation2 + $0x180] sm:$0xff] %v841_v19  ;;  %v1575_v24 = vrot.slane %v4656_v18, 2  ;;  %v4667_v25 = vsel %vm1333_vm1, %v2214_v58, %v2216_v16  ;;  %v1351_v31 = vrot.slane %v646_v11, 1  ;;  %v2218_v32 = vrot.slane %v841_v19, 1 }
 0x11f   : > { %v4670_v33 = vsel %vm1557_vm2, %v1967_v10, %v1969_v23  ;;  %v4673_v36 = vsel %vm1557_vm2, %v1571_v51, %v1573_v15  ;;  %v4676_v37 = vsel %vm1333_vm1, %v1850_v49, %v1852_v9  ;;  %v4679_v28 = vsel %vm1333_vm1, %v1852_v9, %v1854_v22 }
 0x120   : > { %5925 = vst [vmem:[#allocation15_spill] sm:$0xff] %v4673_v36  ;;  %5926 = vst [vmem:[#allocation16_spill] sm:$0xff] %v4676_v37  ;;  %v4682_v38 = vsel %vm1333_vm1, %v1349_v8, %v1351_v31  ;;  %v4685_v39 = vsel %vm1333_vm1, %v2216_v16, %v2218_v32  ;;  %v4688_v40 = vsel %vm1557_vm2, %v1573_v15, %v1575_v24 }
 0x121   : > { %5927 = vst [vmem:[#allocation17_spill] sm:$0xff] %v4679_v28  ;;  %5928 = vst [vmem:[#allocation18_spill] sm:$0xff] %v4688_v40 }
 0x122   : > { %2264 = vrot.lane.b32.xlu0 %v2211_v41, %s4278_s17  ;;  %v652_v42 = vpop.f32.mrb[20].mxu0  ;;  %2266 = vrot.lane.b32.xlu1 %v2213_v52, %s4278_s17  ;;  %v845_v44 = vpop.f32.mrb[20].mxu1 }
 0x123   : > { %1165 = vst [vmem:[#allocation2 + $0x190] sm:$0xff] %v652_v42  ;;  %v4695_v45 = vpop.f32.mrb[21].mxu0  ;;  %v847_v46 = vpop.f32.mrb[21].mxu1  ;;  %v1856_v47 = vrot.slane %v845_v44, 1  ;;  %v1971_v48 = vrot.slane %v845_v44, 2  ;;  %v1353_v49 = vrot.slane %v652_v42, 1 }
 0x124   : > { %1168 = vst [vmem:[#allocation2 + $0x1a8] sm:$0xff] %v847_v46  ;;  %v849_v50 = vpop.f32.mrb[22].mxu1  ;;  %v656_v51 = vpop.f32.mrb[22].mxu0  ;;  %v1577_v17 = vrot.slane %v4695_v45, 2  ;;  %v2220_v58 = vrot.slane %v847_v46, 1 }
 0x125   : > { %v851_v34 = vpop.f32.mrb[23].mxu1  ;;  %1170 = vst [vmem:[#allocation2 + $0x1b8] sm:$0xff] %v656_v51  ;;  %v4698_v0 = vpop.f32.mrb[23].mxu0  ;;  %v4701_v52 = vsel %vm1557_vm2, %v1969_v23, %v1971_v48  ;;  %v4704_v4 = vsel %vm1333_vm1, %v1351_v31, %v1353_v49  ;;  %v1355_v5 = vrot.slane %v656_v51, 1  ;;  %v1858_v7 = vrot.slane %v849_v50, 1 }
 0x126   : > { %1681 = vrot.lane.b32.xlu0 %v4618_v35, %s4278_s17  ;;  %1401 = vrot.lane.b32.xlu1 %v4631_v55, %s4278_s17  ;;  %1173 = vst [vmem:[#allocation2 + $0x1d0] sm:$0xff] %v851_v34  ;;  %v1579_v8 = vrot.slane %v4698_v0, 2  ;;  %v4712_v9 = vsel %vm1333_vm1, %v2218_v32, %v2220_v58  ;;  %v1973_v10 = vrot.slane %v849_v50, 2  ;;  %v2222_v11 = vrot.slane %v851_v34, 1 }
 0x127   : > { %v4715_v12 = vsel %vm1333_vm1, %v1353_v49, %v1355_v5  ;;  %v4718_v13 = vsel %vm1333_vm1, %v1854_v22, %v1856_v47  ;;  %v4721_v15 = vsel %vm1557_vm2, %v1575_v24, %v1577_v17  ;;  %v4724_v35 = vsel %vm1333_vm1, %v1856_v47, %v1858_v7 }
 0x128   : > { %5929 = vst [vmem:[#allocation19_spill] sm:$0xff] %v4718_v13  ;;  %5930 = vst [vmem:[#allocation20_spill] sm:$0xff] %v4721_v15  ;;  %v4727_v55 = vsel %vm1557_vm2, %v1971_v48, %v1973_v10  ;;  %v4730_v16 = vsel %vm1333_vm1, %v2220_v58, %v2222_v11  ;;  %v4733_v19 = vsel %vm1557_vm2, %v1577_v17, %v1579_v8 }
 0x129   : > { %5931 = vst [vmem:[#allocation21_spill] sm:$0xff] %v4724_v35  ;;  %5932 = vst [vmem:[#allocation22_spill] sm:$0xff] %v4733_v19 }
 0x12a   : > { %1399 = vrot.lane.b32.xlu0 %v4628_v53, %s4278_s17  ;;  %1403 = vrot.lane.b32.xlu1 %v1350_v20, %s4278_s17  ;;  %v855_v22 = vpop.f32.mrb[24].mxu1  ;;  %v662_v23 = vpop.f32.mrb[24].mxu0 }
 0x12b   : > { %v857_v24 = vpop.f32.mrb[25].mxu1  ;;  %1175 = vst [vmem:[#allocation2 + $0x1e0] sm:$0xff] %v662_v23  ;;  %v4738_v31 = vpop.f32.mrb[25].mxu0  ;;  %v1357_v32 = vrot.slane %v662_v23, 1  ;;  %v1975_v41 = vrot.slane %v855_v22, 2  ;;  %v1860_v42 = vrot.slane %v855_v22, 1 }
 0x12c   : > { %1178 = vst [vmem:[#allocation2 + $0x1f8] sm:$0xff] %v857_v24  ;;  %v666_v44 = vpop.f32.mrb[26].mxu0  ;;  %v859_v46 = vpop.f32.mrb[26].mxu1  ;;  %v1581_v47 = vrot.slane %v4738_v31, 2  ;;  %v2224_v48 = vrot.slane %v857_v24, 1 }
 0x12d   : > { %1180 = vst [vmem:[#allocation2 + $0x208] sm:$0xff] %v666_v44  ;;  %v4741_v49 = vpop.f32.mrb[27].mxu0  ;;  %v861_v53 = vpop.f32.mrb[27].mxu1  ;;  %v4744_v20 = vsel %vm1333_vm1, %v1355_v5, %v1357_v32  ;;  %v4747_v50 = vsel %vm1557_vm2, %v1973_v10, %v1975_v41  ;;  %v1359_v51 = vrot.slane %v666_v44, 1  ;;  %v1977_v17 = vrot.slane %v859_v46, 2 }
 0x12e   : > { %2019 = vrot.lane.b32.xlu0 %v4634_v57, %s4278_s17  ;;  %1687 = vrot.lane.b32.xlu1 %v4656_v18, %s4278_s17  ;;  %1183 = vst [vmem:[#allocation2 + $0x220] sm:$0xff] %v861_v53  ;;  %v1583_v58 = vrot.slane %v4741_v49, 2  ;;  %v4755_v34 = vsel %vm1333_vm1, %v2222_v11, %v2224_v48  ;;  %v2226_v22 = vrot.slane %v861_v53, 1  ;;  %v4764_v23 = vsel %vm1557_vm2, %v1579_v8, %v1581_v47 }
 0x12f   : > { %v4758_v5 = vsel %vm1333_vm1, %v1357_v32, %v1359_v51  ;;  %v4761_v10 = vsel %vm1557_vm2, %v1975_v41, %v1977_v17  ;;  %5933 = vst [vmem:[#allocation23_spill] sm:$0xff] %v4764_v23  ;;  %v4767_v57 = vsel %vm1333_vm1, %v1858_v7, %v1860_v42  ;;  %v1862_v24 = vrot.slane %v859_v46, 1 }
 0x130   : > { %5934 = vst [vmem:[#allocation24_spill] sm:$0xff] %v4767_v57  ;;  %v4770_v18 = vsel %vm1333_vm1, %v2224_v48, %v2226_v22  ;;  %v4773_v11 = vsel %vm1557_vm2, %v1581_v47, %v1583_v58 }
 0x131   : > { %5935 = vst [vmem:[#allocation25_spill] sm:$0xff] %v4773_v11  ;;  %v4780_v8 = vsel %vm1333_vm1, %v1860_v42, %v1862_v24 }
 0x132   : > { %2268 = vrot.lane.b32.xlu0 %v4649_v3, %s4278_s17  ;;  %2021 = vrot.lane.b32.xlu1 %v4660_v21, %s4278_s17  ;;  %v672_v32 = vpop.f32.mrb[28].mxu0  ;;  %v865_v41 = vpop.f32.mrb[28].mxu1  ;;  %5936 = vst [vmem:[#allocation26_spill] sm:$0xff] %v4780_v8 }
 0x133   : > { %1185 = vst [vmem:[#allocation2 + $0x230] sm:$0xff] %v672_v32  ;;  %v4782_v7 = vpop.f32.mrb[29].mxu0  ;;  %v867_v44 = vpop.f32.mrb[29].mxu1  ;;  %v1361_v48 = vrot.slane %v672_v32, 1  ;;  %v1979_v46 = vrot.slane %v865_v41, 2  ;;  %v1864_v53 = vrot.slane %v865_v41, 1 }
 0x134   : > { %1188 = vst [vmem:[#allocation2 + $0x248] sm:$0xff] %v867_v44  ;;  %v676_v47 = vpop.f32.mrb[30].mxu0  ;;  %v869_v2 = vpop.f32.mrb[30].mxu1  ;;  %v1585_v3 = vrot.slane %v4782_v7, 2  ;;  %v2228_v14 = vrot.slane %v867_v44, 1 }
 0x135   : > { %1190 = vst [vmem:[#allocation2 + $0x258] sm:$0xff] %v676_v47  ;;  %v4785_v21 = vpop.f32.mrb[31].mxu0  ;;  %v871_v56 = vpop.f32.mrb[31].mxu1  ;;  %v4788_v42 = vsel %vm1333_vm1, %v1359_v51, %v1361_v48  ;;  %v4791_v11 = vsel %vm1557_vm2, %v1977_v17, %v1979_v46  ;;  %v1363_v8 = vrot.slane %v676_v47, 1  ;;  %v1981_v32 = vrot.slane %v869_v2, 2 }
 0x136   : > { %1685 = vrot.lane.b32.xlu0 %v4653_v6, %s4278_s17  ;;  %2270 = vrot.lane.b32.xlu1 %v4667_v25, %s4278_s17  ;;  %1193 = vst [vmem:[#allocation2 + $0x270] sm:$0xff] %v871_v56  ;;  %v1587_v41 = vrot.slane %v4785_v21, 2  ;;  %v4799_v44 = vsel %vm1333_vm1, %v2226_v22, %v2228_v14  ;;  %v2230_v19 = vrot.slane %v871_v56, 1  ;;  %v4802_v51 = vsel %vm1557_vm2, %v1583_v58, %v1585_v3 }
 0x137   : > { %5937 = vst [vmem:[#allocation27_spill] sm:$0xff] %v4802_v51  ;;  %v4805_v17 = vsel %vm1333_vm1, %v1361_v48, %v1363_v8  ;;  %v4808_v47 = vsel %vm1557_vm2, %v1979_v46, %v1981_v32  ;;  %v4811_v6 = vsel %vm1333_vm1, %v1862_v24, %v1864_v53  ;;  %v1866_v25 = vrot.slane %v869_v2, 1 }
 0x138   : > { %5938 = vst [vmem:[#allocation28_spill] sm:$0xff] %v4811_v6  ;;  %v4814_v23 = vsel %vm1333_vm1, %v2228_v14, %v2230_v19  ;;  %v4817_v22 = vsel %vm1557_vm2, %v1585_v3, %v1587_v41 }
 0x139   : > { %5939 = vst [vmem:[#allocation29_spill] sm:$0xff] %v4817_v22  ;;  %v4820_v56 = vsel %vm1333_vm1, %v1864_v53, %v1866_v25 }
 0x13a   : > { %5940 = vst [vmem:[#allocation30_spill] sm:$0xff] %v4820_v56  ;;  %2023 = vrot.lane.b32.xlu0 %v4670_v33, %s4278_s17  ;;  %2025 = vrot.lane.b32.xlu1 %v4701_v52, %s4278_s17  ;;  %v682_v58 = vpop.f32.mrb[32].mxu0  ;;  %v875_v48 = vpop.f32.mrb[32].mxu1 }
 0x13b   : > { %1195 = vst [vmem:[#allocation2 + $0x280] sm:$0xff] %v682_v58  ;;  %v4826_v24 = vpop.f32.mrb[33].mxu0  ;;  %v877_v2 = vpop.f32.mrb[33].mxu1  ;;  %v1365_v14 = vrot.slane %v682_v58, 1  ;;  %v1983_v46 = vrot.slane %v875_v48, 2  ;;  %v1868_v51 = vrot.slane %v875_v48, 1 }
 0x13c   : > { %1198 = vst [vmem:[#allocation2 + $0x298] sm:$0xff] %v877_v2  ;;  %v686_v3 = vpop.f32.mrb[34].mxu0  ;;  %v879_v22 = vpop.f32.mrb[34].mxu1  ;;  %v1589_v53 = vrot.slane %v4826_v24, 2  ;;  %v2232_v56 = vrot.slane %v877_v2, 1 }
 0x13d   : > { %1200 = vst [vmem:[#allocation2 + $0x2a8] sm:$0xff] %v686_v3  ;;  %v4829_v33 = vpop.f32.mrb[35].mxu0  ;;  %v881_v6 = vpop.f32.mrb[35].mxu1  ;;  %v4832_v52 = vsel %vm1333_vm1, %v1363_v8, %v1365_v14  ;;  %v4835_v35 = vsel %vm1557_vm2, %v1981_v32, %v1983_v46  ;;  %v1985_v57 = vrot.slane %v879_v22, 2  ;;  %v1367_v58 = vrot.slane %v686_v3, 1 }
 0x13e   : > { %1405 = vrot.lane.b32.xlu0 %v4682_v38, %s4278_s17  ;;  %1407 = vrot.lane.b32.xlu1 %v4704_v4, %s4278_s17  ;;  %1203 = vst [vmem:[#allocation2 + $0x2c0] sm:$0xff] %v881_v6  ;;  %v1591_v48 = vrot.slane %v4829_v33, 2  ;;  %v4843_v2 = vsel %vm1333_vm1, %v2230_v19, %v2232_v56  ;;  %v2234_v15 = vrot.slane %v881_v6, 1  ;;  %v4846_v8 = vsel %vm1557_vm2, %v1587_v41, %v1589_v53 }
 0x13f   : > { %5941 = vst [vmem:[#allocation31_spill] sm:$0xff] %v4846_v8  ;;  %v4849_v32 = vsel %vm1557_vm2, %v1983_v46, %v1985_v57  ;;  %v4852_v3 = vsel %vm1333_vm1, %v1365_v14, %v1367_v58  ;;  %v4855_v38 = vsel %vm1333_vm1, %v1866_v25, %v1868_v51  ;;  %v1870_v4 = vrot.slane %v879_v22, 1 }
 0x140   : > { %5942 = vst [vmem:[#allocation32_spill] sm:$0xff] %v4855_v38  ;;  %v4858_v40 = vsel %vm1333_vm1, %v2232_v56, %v2234_v15  ;;  %v4861_v19 = vsel %vm1557_vm2, %v1589_v53, %v1591_v48 }
 0x141   : > { %5943 = vst [vmem:[#allocation33_spill] sm:$0xff] %v4861_v19  ;;  %v4864_v6 = vsel %vm1333_vm1, %v1868_v51, %v1870_v4 }
 0x142   : > { %5944 = vst [vmem:[#allocation34_spill] sm:$0xff] %v4864_v6  ;;  %2272 = vrot.lane.b32.xlu0 %v4685_v39, %s4278_s17  ;;  %1691 = vrot.lane.b32.xlu1 %v4698_v0, %s4278_s17  ;;  %v692_v41 = vpop.f32.mrb[36].mxu0  ;;  %v885_v14 = vpop.f32.mrb[36].mxu1 }
 0x143   : > { %1205 = vst [vmem:[#allocation2 + $0x2d0] sm:$0xff] %v692_v41  ;;  %v4870_v25 = vpop.f32.mrb[37].mxu0  ;;  %v887_v22 = vpop.f32.mrb[37].mxu1  ;;  %v1987_v56 = vrot.slane %v885_v14, 2  ;;  %v1369_v46 = vrot.slane %v692_v41, 1  ;;  %v1872_v8 = vrot.slane %v885_v14, 1 }
 0x144   : > { %v696_v53 = vpop.f32.mrb[38].mxu0  ;;  %1208 = vst [vmem:[#allocation2 + $0x2e8] sm:$0xff] %v887_v22  ;;  %v889_v19 = vpop.f32.mrb[38].mxu1  ;;  %v1593_v51 = vrot.slane %v4870_v25, 2  ;;  %v2236_v6 = vrot.slane %v887_v22, 1 }
 0x145   : > { %1210 = vst [vmem:[#allocation2 + $0x2f8] sm:$0xff] %v696_v53  ;;  %v4873_v39 = vpop.f32.mrb[39].mxu0  ;;  %v891_v38 = vpop.f32.mrb[39].mxu1  ;;  %v4876_v0 = vsel %vm1557_vm2, %v1985_v57, %v1987_v56  ;;  %v4879_v28 = vsel %vm1333_vm1, %v1367_v58, %v1369_v46  ;;  %v1371_v13 = vrot.slane %v696_v53, 1  ;;  %v1989_v37 = vrot.slane %v889_v19, 2 }
 0x146   : > { %1689 = vrot.lane.b32.xlu0 %v4695_v45, %s4278_s17  ;;  %2274 = vrot.lane.b32.xlu1 %v4712_v9, %s4278_s17  ;;  %1213 = vst [vmem:[#allocation2 + $0x310] sm:$0xff] %v891_v38  ;;  %v1595_v41 = vrot.slane %v4873_v39, 2  ;;  %v4887_v14 = vsel %vm1333_vm1, %v2234_v15, %v2236_v6  ;;  %v2238_v22 = vrot.slane %v891_v38, 1  ;;  %v4890_v57 = vsel %vm1333_vm1, %v1870_v4, %v1872_v8 }
 0x147   : > { %5945 = vst [vmem:[#allocation35_spill] sm:$0xff] %v4890_v57  ;;  %v4893_v58 = vsel %vm1333_vm1, %v1369_v46, %v1371_v13  ;;  %v4896_v53 = vsel %vm1557_vm2, %v1987_v56, %v1989_v37  ;;  %v4899_v45 = vsel %vm1557_vm2, %v1591_v48, %v1593_v51  ;;  %v1874_v36 = vrot.slane %v889_v19, 1 }
 0x148   : > { %5946 = vst [vmem:[#allocation36_spill] sm:$0xff] %v4899_v45  ;;  %v4902_v9 = vsel %vm1333_vm1, %v2236_v6, %v2238_v22  ;;  %v4905_v15 = vsel %vm1557_vm2, %v1593_v51, %v1595_v41 }
 0x149   : > { %5947 = vst [vmem:[#allocation37_spill] sm:$0xff] %v4905_v15  ;;  %v4912_v56 = vsel %vm1333_vm1, %v1872_v8, %v1874_v36 }
 0x14a   : > { %1409 = vrot.lane.b32.xlu0 %v4715_v12, %s4278_s17  ;;  %1411 = vrot.lane.b32.xlu1 %v4744_v20, %s4278_s17  ;;  %v702_v38 = vpop.f32.mrb[40].mxu0  ;;  %v895_v4 = vpop.f32.mrb[40].mxu1  ;;  %5948 = vst [vmem:[#allocation38_spill] sm:$0xff] %v4912_v56 }
 0x14b   : > { %1215 = vst [vmem:[#allocation2 + $0x320] sm:$0xff] %v702_v38  ;;  %v4914_v48 = vpop.f32.mrb[41].mxu0  ;;  %v897_v6 = vpop.f32.mrb[41].mxu1  ;;  %v1373_v46 = vrot.slane %v702_v38, 1  ;;  %v1991_v19 = vrot.slane %v895_v4, 2  ;;  %v1876_v45 = vrot.slane %v895_v4, 1 }
 0x14c   : > { %5949 = vst [vmem:[#allocation39_spill] sm:$0xff] %v4914_v48  ;;  %v706_v51 = vpop.f32.mrb[42].mxu0  ;;  %1218 = vst [vmem:[#allocation2 + $0x338] sm:$0xff] %v897_v6  ;;  %v899_v15 = vpop.f32.mrb[42].mxu1  ;;  %v1597_v12 = vrot.slane %v4914_v48, 2  ;;  %v2240_v57 = vrot.slane %v897_v6, 1 }
 0x14d   : > { %1220 = vst [vmem:[#allocation2 + $0x348] sm:$0xff] %v706_v51  ;;  %v4917_v20 = vpop.f32.mrb[43].mxu0  ;;  %v901_v60 = vpop.f32.mrb[43].mxu1  ;;  %v4920_v8 = vsel %vm1333_vm1, %v1371_v13, %v1373_v46  ;;  %v4923_v56 = vsel %vm1557_vm2, %v1989_v37, %v1991_v19  ;;  %v1375_v62 = vrot.slane %v706_v51, 1  ;;  %v1993_v38 = vrot.slane %v899_v15, 2 }
 0x14e   : > { %2027 = vrot.lane.b32.xlu0 %v4727_v55, %s4278_s17  ;;  %1695 = vrot.lane.b32.xlu1 %v4741_v49, %s4278_s17  ;;  %1223 = vst [vmem:[#allocation2 + $0x360] sm:$0xff] %v901_v60  ;;  %v1599_v4 = vrot.slane %v4917_v20, 2  ;;  %v4931_v6 = vsel %vm1333_vm1, %v2238_v22, %v2240_v57  ;;  %v2242_v61 = vrot.slane %v901_v60, 1  ;;  %v4934_v13 = vsel %vm1557_vm2, %v1595_v41, %v1597_v12 }
 0x14f   : > { %5950 = vst [vmem:[#allocation40_spill] sm:$0xff] %v4934_v13  ;;  %v4937_v37 = vsel %vm1333_vm1, %v1373_v46, %v1375_v62  ;;  %v4940_v51 = vsel %vm1557_vm2, %v1991_v19, %v1993_v38  ;;  %v4943_v55 = vsel %vm1333_vm1, %v1874_v36, %v1876_v45  ;;  %v1878_v49 = vrot.slane %v899_v15, 1 }
 0x150   : > { %5951 = vst [vmem:[#allocation41_spill] sm:$0xff] %v4940_v51  ;;  %5952 = vst [vmem:[#allocation42_spill] sm:$0xff] %v4943_v55  ;;  %v4946_v48 = vsel %vm1333_vm1, %v2240_v57, %v2242_v61  ;;  %v4949_v22 = vsel %vm1557_vm2, %v1597_v12, %v1599_v4 }
 0x151   : > { %5953 = vst [vmem:[#allocation43_spill] sm:$0xff] %v4946_v48  ;;  %5954 = vst [vmem:[#allocation44_spill] sm:$0xff] %v4949_v22  ;;  %v4952_v60 = vsel %vm1333_vm1, %v1876_v45, %v1878_v49 }
 0x152   : > { %5955 = vst [vmem:[#allocation45_spill] sm:$0xff] %v4952_v60  ;;  %2276 = vrot.lane.b32.xlu0 %v4730_v16, %s4278_s17  ;;  %2029 = vrot.lane.b32.xlu1 %v4747_v50, %s4278_s17  ;;  %v712_v41 = vpop.f32.mrb[44].mxu0  ;;  %v905_v46 = vpop.f32.mrb[44].mxu1 }
 0x153   : > { %1225 = vst [vmem:[#allocation2 + $0x370] sm:$0xff] %v712_v41  ;;  %v4958_v36 = vpop.f32.mrb[45].mxu0  ;;  %v907_v15 = vpop.f32.mrb[45].mxu1  ;;  %v1377_v57 = vrot.slane %v712_v41, 1  ;;  %v1995_v19 = vrot.slane %v905_v46, 2  ;;  %v1880_v13 = vrot.slane %v905_v46, 1 }
 0x154   : > { %5956 = vst [vmem:[#allocation46_spill] sm:$0xff] %v4958_v36  ;;  %v716_v12 = vpop.f32.mrb[46].mxu0  ;;  %1228 = vst [vmem:[#allocation2 + $0x388] sm:$0xff] %v907_v15  ;;  %v909_v22 = vpop.f32.mrb[46].mxu1  ;;  %v1601_v45 = vrot.slane %v4958_v36, 2  ;;  %v2244_v60 = vrot.slane %v907_v15, 1 }
 0x155   : > { %1230 = vst [vmem:[#allocation2 + $0x398] sm:$0xff] %v716_v12  ;;  %v4961_v16 = vpop.f32.mrb[47].mxu0  ;;  %v911_v55 = vpop.f32.mrb[47].mxu1  ;;  %v4964_v50 = vsel %vm1333_vm1, %v1375_v62, %v1377_v57  ;;  %v4967_v48 = vsel %vm1557_vm2, %v1993_v38, %v1995_v19  ;;  %v1379_v51 = vrot.slane %v716_v12, 1  ;;  %v1997_v41 = vrot.slane %v909_v22, 2 }
 0x156   : > { %5957 = vst [vmem:[#allocation47_spill] sm:$0xff] %v4967_v48  ;;  %1693 = vrot.lane.b32.xlu0 %v4738_v31, %s4278_s17  ;;  %2278 = vrot.lane.b32.xlu1 %v4755_v34, %s4278_s17  ;;  %1233 = vst [vmem:[#allocation2 + $0x3b0] sm:$0xff] %v911_v55  ;;  %v1603_v46 = vrot.slane %v4961_v16, 2  ;;  %v4975_v15 = vsel %vm1333_vm1, %v2242_v61, %v2244_v60  ;;  %v2246_v36 = vrot.slane %v911_v55, 1  ;;  %v1882_v34 = vrot.slane %v909_v22, 1 }
 0x157   : > { %v4978_v62 = vsel %vm1557_vm2, %v1599_v4, %v1601_v45  ;;  %v4981_v38 = vsel %vm1333_vm1, %v1377_v57, %v1379_v51  ;;  %v4984_v12 = vsel %vm1557_vm2, %v1995_v19, %v1997_v41  ;;  %v4987_v31 = vsel %vm1333_vm1, %v1878_v49, %v1880_v13 }
 0x158   : > { %5958 = vst [vmem:[#allocation48_spill] sm:$0xff] %v4978_v62  ;;  %5959 = vst [vmem:[#allocation49_spill] sm:$0xff] %v4984_v12  ;;  %v4990_v48 = vsel %vm1333_vm1, %v2244_v60, %v2246_v36  ;;  %v4993_v61 = vsel %vm1557_vm2, %v1601_v45, %v1603_v46  ;;  %v4996_v55 = vsel %vm1333_vm1, %v1880_v13, %v1882_v34 }
 0x159   : > { %5960 = vst [vmem:[#allocation50_spill] sm:$0xff] %v4987_v31  ;;  %5961 = vst [vmem:[#allocation51_spill] sm:$0xff] %v4990_v48 }
 0x15a   : > { %5962 = vst [vmem:[#allocation52_spill] sm:$0xff] %v4993_v61  ;;  %5963 = vst [vmem:[#allocation53_spill] sm:$0xff] %v4996_v55  ;;  %1413 = vrot.lane.b32.xlu0 %v4758_v5, %s4278_s17  ;;  %1415 = vrot.lane.b32.xlu1 %v4788_v42, %s4278_s17  ;;  %v722_v4 = vpop.f32.mrb[48].mxu0  ;;  %v915_v57 = vpop.f32.mrb[48].mxu1 }
 0x15b   : > { %1235 = vst [vmem:[#allocation2 + $0x3c0] sm:$0xff] %v722_v4  ;;  %v5002_v49 = vpop.f32.mrb[49].mxu0  ;;  %v917_v22 = vpop.f32.mrb[49].mxu1  ;;  %v1381_v60 = vrot.slane %v722_v4, 1  ;;  %v1999_v19 = vrot.slane %v915_v57, 2  ;;  %v1884_v62 = vrot.slane %v915_v57, 1 }
 0x15c   : > { %5964 = vst [vmem:[#allocation54_spill] sm:$0xff] %v5002_v49  ;;  %v726_v45 = vpop.f32.mrb[50].mxu0  ;;  %1238 = vst [vmem:[#allocation2 + $0x3d8] sm:$0xff] %v917_v22  ;;  %v919_v61 = vpop.f32.mrb[50].mxu1  ;;  %v1605_v13 = vrot.slane %v5002_v49, 2  ;;  %v2248_v55 = vrot.slane %v917_v22, 1 }
 0x15d   : > { %1240 = vst [vmem:[#allocation2 + $0x3e8] sm:$0xff] %v726_v45  ;;  %v5005_v5 = vpop.f32.mrb[51].mxu0  ;;  %v921_v31 = vpop.f32.mrb[51].mxu1  ;;  %v5008_v42 = vsel %vm1333_vm1, %v1379_v51, %v1381_v60  ;;  %v5011_v48 = vsel %vm1557_vm2, %v1997_v41, %v1999_v19  ;;  %v2001_v12 = vrot.slane %v919_v61, 2  ;;  %v1383_v4 = vrot.slane %v726_v45, 1 }
 0x15e   : > { %5965 = vst [vmem:[#allocation55_spill] sm:$0xff] %v5011_v48  ;;  %2031 = vrot.lane.b32.xlu0 %v4761_v10, %s4278_s17  ;;  %1699 = vrot.lane.b32.xlu1 %v4785_v21, %s4278_s17  ;;  %1243 = vst [vmem:[#allocation2 + $0x400] sm:$0xff] %v921_v31  ;;  %v1607_v57 = vrot.slane %v5005_v5, 2  ;;  %v5019_v22 = vsel %vm1333_vm1, %v2246_v36, %v2248_v55  ;;  %v2250_v49 = vrot.slane %v921_v31, 1  ;;  %v1886_v21 = vrot.slane %v919_v61, 1 }
 0x15f   : > { %v5022_v51 = vsel %vm1557_vm2, %v1603_v46, %v1605_v13  ;;  %v5025_v41 = vsel %vm1557_vm2, %v1999_v19, %v2001_v12  ;;  %v5028_v45 = vsel %vm1333_vm1, %v1381_v60, %v1383_v4  ;;  %v5031_v10 = vsel %vm1333_vm1, %v1882_v34, %v1884_v62  ;;  %v4129_v46 = vld [vmem:[%s5902_s3 + $0x4] ss:$20 sps:$4 sm:$0xff]  }
 0x160   : > { %5966 = vst [vmem:[#allocation56_spill] sm:$0xff] %v5022_v51  ;;  %5967 = vst [vmem:[#allocation57_spill] sm:$0xff] %v5025_v41  ;;  %v5034_v48 = vsel %vm1333_vm1, %v2248_v55, %v2250_v49  ;;  %v5037_v36 = vsel %vm1557_vm2, %v1605_v13, %v1607_v57  ;;  %v5043_v31 = vsel %vm1333_vm1, %v1884_v62, %v1886_v21  ;;  %v4127_v55 = vld [vmem:[%s5902_s3] ss:$20 sps:$4 sm:$0xff]   ;;  %2983 = vmatprep.subr.bf16.mxu1 %v4129_v46 }
 0x161   : > { %5968 = vst [vmem:[#allocation58_spill] sm:$0xff] %v5028_v45  ;;  %5969 = vst [vmem:[#allocation59_spill] sm:$0xff] %v5031_v10  ;;  %2984 = vmatpush1.bf16.msra.mxu1 %v4127_v55  ;;  %v4130_v55 = vld [vmem:[%s5902_s3 + $0x28] ss:$20 sps:$4 sm:$0xff]  }
 0x162   : > { %5970 = vst [vmem:[#allocation60_spill] sm:$0xff] %v5034_v48  ;;  %5971 = vst [vmem:[#allocation61_spill] sm:$0xff] %v5037_v36  ;;  %2280 = vrot.lane.b32.xlu0 %v4770_v18, %s4278_s17  ;;  %2033 = vrot.lane.b32.xlu1 %v4791_v11, %s4278_s17  ;;  %v5049_v34 = vpop.f32.mrb[52].mxu0  ;;  %v925_v61 = vpop.f32.mrb[52].mxu1 }
 0x163   : > { %5972 = vst [vmem:[#allocation62_spill] sm:$0xff] %v5043_v31  ;;  %1245 = vst [vmem:[#allocation2 + $0x410] sm:$0xff] %v5049_v34  ;;  %v5055_v60 = vpop.f32.mrb[53].mxu0  ;;  %v927_v19 = vpop.f32.mrb[53].mxu1  ;;  %v2003_v62 = vrot.slane %v925_v61, 2  ;;  %v5914_v13 = vrot.slane %v5049_v34, 1 }
 0x164   : > { %v1888_v18 = vrot.slane %v925_v61, 1  ;;  %v736_v36 = vpop.f32.mrb[54].mxu0  ;;  %1248 = vst [vmem:[#allocation2 + $0x428] sm:$0xff] %v927_v19  ;;  %v929_v11 = vpop.f32.mrb[54].mxu1  ;;  %v1609_v31 = vrot.slane %v5055_v60, 2  ;;  %v2252_v51 = vrot.slane %v927_v19, 1 }
 0x165   : > { %1250 = vst [vmem:[#allocation2 + $0x438] sm:$0xff] %v736_v36  ;;  %v5059_v10 = vpop.f32.mrb[55].mxu0  ;;  %v931_v48 = vpop.f32.mrb[55].mxu1  ;;  %v5062_v45 = vsel %vm1557_vm2, %v2001_v12, %v2003_v62  ;;  %v5067_v41 = vsel %vm1333_vm1, %v1383_v4, %v5914_v13  ;;  %v2005_v46 = vrot.slane %v929_v11, 2  ;;  %v4132_v61 = vld [vmem:[%s5902_s3 + $0x2c] ss:$20 sps:$4 sm:$0xff]  }
 0x166   : > { %v5073_v19 = vsel %vm1333_vm1, %v1886_v21, %v1888_v18  ;;  %1697 = vrot.lane.b32.xlu0 %v4782_v7, %s4278_s17  ;;  %2282 = vrot.lane.b32.xlu1 %v4799_v44, %s4278_s17  ;;  %1253 = vst [vmem:[#allocation2 + $0x450] sm:$0xff] %v931_v48  ;;  %v5915_v12 = vrot.slane %v5059_v10, 2  ;;  %v5081_v4 = vsel %vm1333_vm1, %v2250_v49, %v2252_v51  ;;  %v2254_v36 = vrot.slane %v931_v48, 1  ;;  %v4135_v49 = vld [vmem:[%s5902_s3 + $0x54] ss:$20 sps:$4 sm:$0xff]  }
 0x167   : > { %5973 = vst [vmem:[#allocation63_spill] sm:$0xff] %v5073_v19  ;;  %v5087_v21 = vsel %vm1557_vm2, %v1607_v57, %v1609_v31  ;;  %v5090_v13 = vsel %vm1557_vm2, %v2003_v62, %v2005_v46  ;;  %2985 = vmatprep.subr.bf16.mxu1 %v4132_v61  ;;  %v1890_v7 = vrot.slane %v929_v11, 1 }
 0x168   : > { %5974 = vst [vmem:[#allocation64_spill] sm:$0xff] %v5087_v21  ;;  %v5093_v44 = vsel %vm1333_vm1, %v2252_v51, %v2254_v36  ;;  %2986 = vmatpush1.bf16.msra.mxu1 %v4130_v55  ;;  %v5098_v48 = vsel %vm1557_vm2, %v1609_v31, %v5915_v12  ;;  %v4133_v31 = vld [vmem:[%s5902_s3 + $0x50] ss:$20 sps:$4 sm:$0xff]  }
 0x169   : > { %5975 = vst [vmem:[#allocation65_spill] sm:$0xff] %v5098_v48  ;;  %v5104_v57 = vsel %vm1333_vm1, %v1888_v18, %v1890_v7  ;;  %2987 = vmatprep.subr.bf16.mxu1 %v4135_v49  ;;  %v4138_v49 = vld [vmem:[%s5902_s3 + $0x7c] ss:$20 sps:$4 sm:$0xff]  }
 0x16a   : > { %5976 = vst [vmem:[#allocation66_spill] sm:$0xff] %v5104_v57  ;;  %1417 = vrot.lane.b32.xlu0 %v4805_v17, %s4278_s17  ;;  %1419 = vrot.lane.b32.xlu1 %v4832_v52, %s4278_s17  ;;  %v742_v51 = vpop.f32.mrb[56].mxu0  ;;  %v5110_v62 = vpop.f32.mrb[56].mxu1 }
 0x16b   : > { %5977 = vst [vmem:[#allocation67_spill] sm:$0xff] %v5110_v62  ;;  %v5115_v11 = vpop.f32.mrb[57].mxu0  ;;  %v937_v61 = vpop.f32.mrb[57].mxu1  ;;  %v2007_v55 = vrot.slane %v5110_v62, 2  ;;  %v5916_v18 = vrot.slane %v5110_v62, 1 }
 0x16c   : > { %v746_v12 = vpop.f32.mrb[58].mxu0  ;;  %1258 = vst [vmem:[#allocation2 + $0x478] sm:$0xff] %v937_v61  ;;  %v5119_v17 = vpop.f32.mrb[58].mxu1  ;;  %v2256_v52 = vrot.slane %v937_v61, 1  ;;  %2988 = vmatpush1.bf16.msra.mxu1 %v4133_v31  ;;  %v4136_v61 = vld [vmem:[%s5902_s3 + $0x78] ss:$20 sps:$4 sm:$0xff]  }
 0x16d   : > { %v748_v51 = vpop.f32.mrb[59].mxu0  ;;  %1262 = vst [vmem:[#allocation2 + $0x498] sm:$0xff] %v5119_v17  ;;  %v941_v48 = vpop.f32.mrb[59].mxu1  ;;  %v5123_v57 = vsel %vm1557_vm2, %v2005_v46, %v2007_v55  ;;  %v5918_v21 = vrot.slane %v5119_v17, 2  ;;  %v5132_v12 = vsel %vm1333_vm1, %v1890_v7, %v5916_v18  ;;  %2989 = vmatprep.subr.bf16.mxu1 %v4138_v49 }
 0x16e   : > { %5978 = vst [vmem:[#allocation68_spill] sm:$0xff] %v5132_v12  ;;  %2035 = vrot.lane.b32.xlu0 %v4808_v47, %s4278_s17  ;;  %1703 = vrot.lane.b32.xlu1 %v4829_v33, %s4278_s17  ;;  %1261 = vst [vmem:[#allocation2 + $0x490] sm:$0xff] %v748_v51  ;;  %v5139_v46 = vsel %vm1333_vm1, %v2254_v36, %v2256_v52  ;;  %v2258_v31 = vrot.slane %v941_v48, 1 }
 0x16f   : > { %1263 = vst [vmem:[#allocation2 + $0x4a0] sm:$0xff] %v941_v48  ;;  %v5147_v7 = vsel %vm1557_vm2, %v2007_v55, %v5918_v21  ;;  %v1501_v48 = vld [vmem:[#allocation2 + $0x8] sm:$0xfc] }
 0x170   : > { %v5150_v47 = vsel %vm1333_vm1, %v2256_v52, %v2258_v31  ;;  %2990 = vmatpush1.bf16.msra.mxu1 %v4136_v61 }
 0x172   : > { %2284 = vrot.lane.b32.xlu0 %v4814_v23, %s4278_s17  ;;  %2037 = vrot.lane.b32.xlu1 %v4835_v35, %s4278_s17  ;;  %v752_v33 = vpop.f32.mrb[60].mxu0  ;;  %v945_v36 = vpop.f32.mrb[60].mxu1  ;;  %v1558_v23 = vrot.slane %v1501_v48, 2 }
 0x173   : > { %v754_v51 = vpop.f32.mrb[61].mxu0  ;;  %v5156_v18 = vpop.f32.mrb[61].mxu1 }
 0x174   : > { %v756_v62 = vpop.f32.mrb[62].mxu0  ;;  %1268 = vst [vmem:[#allocation2 + $0x4c8] sm:$0xff] %v5156_v18  ;;  %v949_v55 = vpop.f32.mrb[62].mxu1  ;;  %v5919_v52 = vrot.slane %v5156_v18, 1  ;;  %v4158_v51 = vld [vmem:[#allocation2] sm:$0xff] }
 0x175   : > { %v758_v49 = vpop.f32.mrb[63].mxu0  ;;  %v951_v61 = vpop.f32.mrb[63].mxu1  ;;  %v1785_v62 = vld [vmem:[#allocation2 + $0x60] sm:$0xfe] }
 0x176   : > { %1701 = vrot.lane.b32.xlu0 %v4826_v24, %s4278_s17  ;;  %2286 = vrot.lane.b32.xlu1 %v4843_v2, %s4278_s17  ;;  %1273 = vst [vmem:[#allocation2 + $0x4f0] sm:$0xff] %v951_v61  ;;  %v5167_v35 = vsel %vm1333_vm1, %v2258_v31, %v5919_v52  ;;  %v4159_v49 = vld [vmem:[#allocation2 + $0x28] sm:$0xff]  ;;  %v5979_v24 = vrot.slane %v4567_v43, 2  ;;  %v1841_v48 = vrot.slane %v1785_v62, 1  ;;  %v5980_v43 = vrot.slane %v4569_v54, 1  ;;  %v4160_v62 = vld [vmem:[#allocation2 + $0x50] sm:$0xff] }
 0x178   : > { %v1390_v33 = vpop.permute.xlu0 %1389  ;;  %v1392_v36 = vpop.permute.xlu1 %1391  ;;  %v1560_v2 = vsel %vm1557_vm2, %v1558_v23, %v5979_v24 }
 0x179   : > { %v1473_v55 = vadd.f32 %v4158_v51, %v1390_v33  ;;  %v1474_v21 = vadd.f32 %v4159_v49, %v1392_v36 }
 0x17a   : > { %2039 = vrot.lane.b32.xlu0 %v4849_v32, %s4278_s17  ;;  %2041 = vrot.lane.b32.xlu1 %v4876_v0, %s4278_s17  ;;  %v3962_v31 = vpop.f32.mrb[64].mxu0  ;;  %v1843_v32 = vsel %vm1333_vm1, %v1841_v48, %v5980_v43 }
 0x17b   : > { %v1641_v61 = vadd.f32 %v1560_v2, %v1473_v55  ;;  %v1642_v52 = vadd.f32 %v4579_v63, %v1474_v21  ;;  %v988_v12 = vpop.f32.mrb[65].mxu0 }
 0x17c   : > { %v1674_v19 = vpop.permute.xlu0 %1673  ;;  %v1676_v33 = vpop.permute.xlu1 %1675 }
 0x17d   : > { %v1757_v51 = vadd.f32 %v1674_v19, %v1641_v61  ;;  %v1758_v36 = vadd.f32 %v1676_v33, %v1642_v52  ;;  %v3963_v49 = vpop.f32.mrb[66].mxu0  ;;  %v4161_v52 = vld [vmem:[#allocation2 + $0x78] sm:$0xff] }
 0x17e   : > { %1421 = vrot.lane.b32.xlu0 %v4852_v3, %s4278_s17  ;;  %1423 = vrot.lane.b32.xlu1 %v4879_v28, %s4278_s17  ;;  %v991_v0 = vpop.f32.mrb[67].mxu0 }
 0x17f   : > { %v1924_v23 = vadd.f32 %v1843_v32, %v1757_v51  ;;  %v1925_v63 = vadd.f32 %v4603_v27, %v1758_v36 }
 0x180   : > { %v1394_v21 = vpop.permute.xlu0 %1393  ;;  %v1396_v12 = vpop.permute.xlu1 %1395 }
 0x181   : > { %v1475_v19 = vadd.f32 %v4160_v62, %v1394_v21  ;;  %v1476_v55 = vadd.f32 %v4161_v52, %v1396_v12 }
 0x182   : > { %2288 = vrot.lane.b32.xlu0 %v4858_v40, %s4278_s17  ;;  %1707 = vrot.lane.b32.xlu1 %v4873_v39, %s4278_s17  ;;  %v3966_v54 = vpop.f32.mrb[68].mxu0 }
 0x183   : > { %v1643_v3 = vadd.f32 %v4583_v1, %v1475_v19  ;;  %1149 = vst.msk [vmem:[#allocation2 + $0x110] sm:$0xff] %vm519_vm0, %v3966_v54  ;;  %v1004_v28 = vpop.f32.mrb[69].mxu0  ;;  %v1644_v27 = vadd.f32 %v4598_v26, %v1476_v55  ;;  %v4162_v1 = vld [vmem:[#allocation2 + $0xb8] sm:$0xff] }
 0x184   : > { %v2012_v24 = vpop.permute.xlu0 %2011  ;;  %1139 = vst.msk [vmem:[#allocation2 + $0xc0] sm:$0xff] %vm519_vm0, %v1004_v28  ;;  %v1680_v2 = vpop.permute.xlu1 %1679 }
 0x185   : > { %v2095_v48 = vadd.f32 %v2012_v24, %v1924_v23  ;;  %v1760_v31 = vadd.f32 %v1680_v2, %v1644_v27  ;;  %v3967_v61 = vpop.f32.mrb[70].mxu0 }
 0x186   : > { %1705 = vrot.lane.b32.xlu0 %v4870_v25, %s4278_s17  ;;  %1154 = vst.msk [vmem:[#allocation2 + $0x138] sm:$0xff] %vm519_vm0, %v3967_v61  ;;  %v1007_v40 = vpop.f32.mrb[71].mxu0  ;;  %2290 = vrot.lane.b32.xlu1 %v4887_v14, %s4278_s17  ;;  %v4163_v14 = vld [vmem:[#allocation2 + $0xe0] sm:$0xff] }
 0x187   : > { %1144 = vst.msk [vmem:[#allocation2 + $0xe8] sm:$0xff] %vm519_vm0, %v1007_v40  ;;  %v2151_v26 = vadd.f32 %v4162_v1, %v2095_v48  ;;  %v1927_v39 = vadd.f32 %v4637_v59, %v1760_v31 }
 0x188   : > { %v1678_v33 = vpop.permute.xlu0 %1677  ;;  %v2014_v51 = vpop.permute.xlu1 %2013 }
 0x189   : > { %v1759_v36 = vadd.f32 %v1678_v33, %v1643_v3  ;;  %v2096_v49 = vadd.f32 %v2014_v51, %v1925_v63  ;;  %v4164_v63 = vld [vmem:[#allocation2 + $0xa0] sm:$0xff] }
 0x18a   : > { %1425 = vrot.lane.b32.xlu0 %v4893_v58, %s4278_s17  ;;  %1427 = vrot.lane.b32.xlu1 %v4920_v8, %s4278_s17  ;;  %v3970_v25 = vpop.f32.mrb[72].mxu0  ;;  %v5209_v58 = vld [vmem:[#allocation2 + $0x110] sm:$0xff]  ;;  %v5236_v51 = vld [vmem:[%s5901_s2] ss:$0 sm:$0xff] }
 0x18b   : > { %v1926_v43 = vadd.f32 %v4609_v29, %v1759_v36  ;;  %v2152_v32 = vadd.f32 %v4163_v14, %v2096_v49  ;;  %1169 = vst.msk [vmem:[#allocation2 + $0x1b0] sm:$0xff] %vm519_vm0, %v3970_v25  ;;  %v1020_v0 = vpop.f32.mrb[73].mxu0  ;;  %v2376_v12 = vld [vmem:[#allocation2 + $0xc0] sm:$0xfc]  ;;  %v2435_v28 = vrot.slane %v5209_v58, 2 }
 0x18c   : > { %v1398_v23 = vpop.permute.xlu0 %1397  ;;  %v5206_v59 = vpop.permute.xlu1 %1683  ;;  %1159 = vst.msk [vmem:[#allocation2 + $0x160] sm:$0xff] %vm519_vm0, %v1020_v0  ;;  %v2432_v55 = vrot.slane %v2376_v12, 2  ;;  %v5981_v36 = vld [vmem:[#allocation39_spill] sm:$0xff] }
 0x18d   : > { %v1477_v21 = vadd.f32 %v4164_v63, %v1398_v23  ;;  %v3971_v62 = vpop.f32.mrb[74].mxu0  ;;  %v4167_v63 = vld [vmem:[#allocation2 + $0xf0] sm:$0xff] }
 0x18e   : > { %2043 = vrot.lane.b32.xlu0 %v4896_v53, %s4278_s17  ;;  %v2377_v29 = vld [vmem:[#allocation2 + $0xe8] sm:$0xff]  ;;  %1711 = vrot.lane.b32.xlu1 %v4917_v20, %s4278_s17  ;;  %1174 = vst.msk [vmem:[#allocation2 + $0x1d8] sm:$0xff] %vm519_vm0, %v3971_v62  ;;  %v1023_v8 = vpop.f32.mrb[75].mxu0 }
 0x18f   : > { %v1645_v19 = vadd.f32 %v4612_v30, %v1477_v21  ;;  %1164 = vst.msk [vmem:[#allocation2 + $0x188] sm:$0xff] %vm519_vm0, %v1023_v8  ;;  %v2433_v54 = vrot.slane %v2377_v29, 2  ;;  %v4165_v20 = vld [vmem:[#allocation2 + $0x108] sm:$0xff]  ;;  %v4166_v30 = vld [vmem:[#allocation2 + $0x130] sm:$0xff] }
 0x190   : > { %v2016_v52 = vpop.permute.xlu0 %2015  ;;  %v2018_v3 = vpop.permute.xlu1 %2017  ;;  %v5982_v29 = vld [vmem:[#allocation13_spill] sm:$0xff] }
 0x191   : > { %v2097_v27 = vadd.f32 %v2016_v52, %v1926_v43  ;;  %v2098_v24 = vadd.f32 %v2018_v3, %v1927_v39  ;;  %v2434_v40 = vsel %vm1557_vm2, %v2432_v55, %v2433_v54  ;;  %v5983_v52 = vld [vmem:[#allocation14_spill] sm:$0xff] }
 0x192   : > { %2292 = vrot.lane.b32.xlu0 %v4902_v9, %s4278_s17  ;;  %2045 = vrot.lane.b32.xlu1 %v4923_v56, %s4278_s17  ;;  %v3974_v53 = vpop.f32.mrb[76].mxu0  ;;  %v2436_v9 = vsel %vm1557_vm2, %v2433_v54, %v2435_v28 }
 0x193   : > { %v5223_v2 = vadd.f32 %v4165_v20, %v2097_v27  ;;  %v5225_v48 = vadd.f32 %v4166_v30, %v2098_v24  ;;  %1189 = vst.msk [vmem:[#allocation2 + $0x250] sm:$0xff] %vm519_vm0, %v3974_v53  ;;  %v1036_v31 = vpop.f32.mrb[77].mxu0  ;;  %v4169_v27 = vld [vmem:[#allocation2 + $0x118] sm:$0xff] }
 0x194   : > { %v2265_v61 = vpop.permute.xlu0 %2264  ;;  %v2267_v1 = vpop.permute.xlu1 %2266  ;;  %1179 = vst.msk [vmem:[#allocation2 + $0x200] sm:$0xff] %vm519_vm0, %v1036_v31  ;;  %v2379_v53 = vld [vmem:[#allocation2 + $0x138] sm:$0xff] }
 0x195   : > { %v2348_v56 = vadd.f32 %v2265_v61, %v2151_v26  ;;  %v2349_v39 = vadd.f32 %v2267_v1, %v2152_v32  ;;  %v3975_v33 = vpop.f32.mrb[78].mxu0  ;;  %v5984_v30 = vld [vmem:[#allocation41_spill] sm:$0xff]  ;;  %v5985_v61 = vld [vmem:[#allocation12_spill] sm:$0xff]  ;;  %v5986_v1 = vld [vmem:[#allocation15_spill] sm:$0xff] }
 0x196   : > { %1709 = vrot.lane.b32.xlu0 %v5981_v36, %s4278_s17  ;;  %2294 = vrot.lane.b32.xlu1 %v4931_v6, %s4278_s17  ;;  %1194 = vst.msk [vmem:[#allocation2 + $0x278] sm:$0xff] %vm519_vm0, %v3975_v33  ;;  %v1039_v49 = vpop.f32.mrb[79].mxu0 }
 0x197   : > { %v2515_v25 = vadd.f32 %v2434_v40, %v2348_v56  ;;  %v2516_v43 = vadd.f32 %v2436_v9, %v2349_v39  ;;  %1184 = vst.msk [vmem:[#allocation2 + $0x228] sm:$0xff] %vm519_vm0, %v1039_v49  ;;  %v2437_v39 = vrot.slane %v2379_v53, 2 }
 0x198   : > { %v1682_v26 = vpop.permute.xlu0 %1681  ;;  %v1402_v14 = vpop.permute.xlu1 %1401 }
 0x199   : > { %v2550_v32 = vadd.f32 %v5236_v51, %v2515_v25  ;;  %v1761_v0 = vadd.f32 %v1682_v26, %v1645_v19  ;;  %v2551_v23 = vadd.f32 %v5236_v51, %v2516_v43  ;;  %v1479_v21 = vadd.f32 %v4167_v63, %v1402_v14  ;;  %v5267_v43 = vld [vmem:[#allocation2 + $0x160] sm:$0xff] }
 0x19a   : > { %1429 = vrot.lane.b32.xlu0 %v4937_v37, %s4278_s17  ;;  %1431 = vrot.lane.b32.xlu1 %v4964_v50, %s4278_s17  ;;  %v3978_v6 = vpop.f32.mrb[80].mxu0  ;;  %v4168_v37 = vld [vmem:[#allocation2 + $0xc8] sm:$0xff] }
 0x19b   : > { %v2578_v12 = vmax.f32 %v2550_v32, 0.0  ;;  %v2579_v62 = vmax.f32 %v2551_v23, 0.0  ;;  %v1928_v8 = vadd.f32 %v5982_v29, %v1761_v0  ;;  %v5252_v55 = vadd.f32 %v5983_v52, %v1479_v21  ;;  %1209 = vst.msk [vmem:[#allocation2 + $0x2f0] sm:$0xff] %vm519_vm0, %v3978_v6  ;;  %v1052_v19 = vpop.f32.mrb[81].mxu0  ;;  %v5987_v26 = vld [vmem:[#allocation43_spill] sm:$0xff]  ;;  %v5989_v0 = vld [vmem:[#allocation16_spill] sm:$0xff] }
 0x19c   : > { %v1400_v54 = vpop.permute.xlu0 %1399  ;;  %v1404_v3 = vpop.permute.xlu1 %1403  ;;  %1199 = vst.msk [vmem:[#allocation2 + $0x2a0] sm:$0xff] %vm519_vm0, %v1052_v19  ;;  %v5988_v14 = vld [vmem:[#allocation47_spill] sm:$0xff]  ;;  %v4170_v6 = vld [vmem:[#allocation2 + $0x158] sm:$0xff]  ;;  %v2438_v29 = vsel %vm1557_vm2, %v2435_v28, %v2437_v39  ;;  %v2439_v52 = vrot.slane %v5267_v43, 2 }
 0x19d   : > { %2606 = vst.msk [vmem:[#allocation3] sm:$0xff] %vm519_vm0, %v2578_v12  ;;  %2607 = vst.msk [vmem:[#allocation3 + $0x8] sm:$0xff] %vm519_vm0, %v2579_v62  ;;  %v1478_v50 = vadd.f32 %v4168_v37, %v1400_v54  ;;  %v1480_v24 = vadd.f32 %v4169_v27, %v1404_v3  ;;  %v3979_v20 = vpop.f32.mrb[82].mxu0  ;;  %v5990_v63 = vld [vmem:[#allocation19_spill] sm:$0xff] }
 0x19e   : > { %2047 = vrot.lane.b32.xlu0 %v5984_v30, %s4278_s17  ;;  %1715 = vrot.lane.b32.xlu1 %v4961_v16, %s4278_s17  ;;  %1214 = vst.msk [vmem:[#allocation2 + $0x318] sm:$0xff] %vm519_vm0, %v3979_v20  ;;  %v1055_v31 = vpop.f32.mrb[83].mxu0  ;;  %v4140_v16 = vld [vmem:[%s5902_s3 + $0x10] ss:$20 sps:$4 sm:$0xff]   ;;  %v4141_v37 = vld [vmem:[%s5902_s3 + $0x38] ss:$20 sps:$4 sm:$0xff]   ;;  %v2440_v20 = vsel %vm1557_vm2, %v2437_v39, %v2439_v52 }
 0x19f   : > { %v1646_v40 = vadd.f32 %v5985_v61, %v1478_v50  ;;  %v1648_v9 = vadd.f32 %v5986_v1, %v1480_v24  ;;  %1204 = vst.msk [vmem:[#allocation2 + $0x2c8] sm:$0xff] %vm519_vm0, %v1055_v31  ;;  %3992 = vmatprep.subr.bf16.mxu0 %v4140_v16  ;;  %v5991_v50 = vld [vmem:[#allocation46_spill] sm:$0xff] }
 0x1a0   : > { %v2020_v56 = vpop.permute.xlu0 %2019  ;;  %v1688_v33 = vpop.permute.xlu1 %1687  ;;  %3993 = vmatpush3.bf16.msra.mxu0 %v4140_v16  ;;  %v4171_v27 = vld [vmem:[#allocation2 + $0x180] sm:$0xff]  ;;  %v4143_v16 = vld [vmem:[%s5902_s3 + $0x88] ss:$20 sps:$4 sm:$0xff]  }
 0x1a1   : > { %v2099_v36 = vadd.f32 %v2020_v56, %v1928_v8  ;;  %v1764_v49 = vadd.f32 %v1688_v33, %v1648_v9  ;;  %v1762_v25 = vadd.f32 %v5206_v59, %v1646_v40  ;;  %3994 = vmatprep.subr.bf16.mxu0 %v4141_v37  ;;  %v4142_v61 = vld [vmem:[%s5902_s3 + $0x60] ss:$20 sps:$4 sm:$0xff]  }
 0x1a2   : > { %2296 = vrot.lane.b32.xlu0 %v5987_v26, %s4278_s17  ;;  %2049 = vrot.lane.b32.xlu1 %v5988_v14, %s4278_s17  ;;  %v3982_v32 = vpop.f32.mrb[84].mxu0  ;;  %v5992_v9 = vld [vmem:[#allocation17_spill] sm:$0xff] }
 0x1a3   : > { %v1929_v23 = vadd.f32 %v5989_v0, %v1762_v25  ;;  %v1931_v21 = vadd.f32 %v5990_v63, %v1764_v49  ;;  %v5278_v12 = vadd.f32 %v4170_v6, %v2099_v36  ;;  %1229 = vst.msk [vmem:[#allocation2 + $0x390] sm:$0xff] %vm519_vm0, %v3982_v32  ;;  %v1068_v59 = vpop.f32.mrb[85].mxu0  ;;  %v2381_v49 = vld [vmem:[#allocation2 + $0x188] sm:$0xff]  ;;  %v5993_v26 = vld [vmem:[#allocation49_spill] sm:$0xff] }
 0x1a4   : > { %v2269_v62 = vpop.permute.xlu0 %2268  ;;  %v2022_v8 = vpop.permute.xlu1 %2021  ;;  %1219 = vst.msk [vmem:[#allocation2 + $0x340] sm:$0xff] %vm519_vm0, %v1068_v59  ;;  %3995 = vmatpush3.bf16.msra.mxu0 %v4141_v37  ;;  %v4172_v0 = vld [vmem:[#allocation2 + $0x1a8] sm:$0xff]  ;;  %v4173_v63 = vld [vmem:[#allocation2 + $0x1d0] sm:$0xff]  ;;  %v2441_v59 = vrot.slane %v2381_v49, 2 }
 0x1a5   : > { %v2350_v19 = vadd.f32 %v2269_v62, %v5223_v2  ;;  %v2100_v54 = vadd.f32 %v2022_v8, %v1929_v23  ;;  %v3983_v3 = vpop.f32.mrb[86].mxu0  ;;  %3996 = vmatprep.subr.bf16.mxu0 %v4142_v61  ;;  %v4175_v8 = vld [vmem:[#allocation2 + $0x168] sm:$0xff] }
 0x1a6   : > { %1713 = vrot.lane.b32.xlu0 %v5991_v50, %s4278_s17  ;;  %2298 = vrot.lane.b32.xlu1 %v4975_v15, %s4278_s17  ;;  %1234 = vst.msk [vmem:[#allocation2 + $0x3b8] sm:$0xff] %vm519_vm0, %v3983_v3  ;;  %v1071_v58 = vpop.f32.mrb[87].mxu0  ;;  %v5994_v3 = vld [vmem:[#allocation51_spill] sm:$0xff]  ;;  %v5996_v50 = vld [vmem:[#allocation18_spill] sm:$0xff] }
 0x1a7   : > { %v2517_v28 = vadd.f32 %v2438_v29, %v2350_v19  ;;  %v5295_v24 = vadd.f32 %v4171_v27, %v2100_v54  ;;  %1224 = vst.msk [vmem:[#allocation2 + $0x368] sm:$0xff] %vm519_vm0, %v1071_v58  ;;  %v5330_v54 = vld [vmem:[#allocation2 + $0x1b0] sm:$0xff]  ;;  %v5995_v37 = vld [vmem:[#allocation55_spill] sm:$0xff] }
 0x1a8   : > { %v1686_v2 = vpop.permute.xlu0 %1685  ;;  %v2271_v53 = vpop.permute.xlu1 %2270  ;;  %3997 = vmatpush3.bf16.msra.mxu0 %v4142_v61 }
 0x1a9   : > { %v2552_v30 = vadd.f32 %v5236_v51, %v2517_v28  ;;  %v1763_v15 = vadd.f32 %v1686_v2, %v5252_v55  ;;  %v2351_v31 = vadd.f32 %v2271_v53, %v5225_v48  ;;  %3998 = vmatprep.subr.bf16.mxu0 %v4143_v16  ;;  %v5997_v28 = vld [vmem:[#allocation20_spill] sm:$0xff]  ;;  %v2442_v53 = vsel %vm1557_vm2, %v2439_v52, %v2441_v59 }
 0x1aa   : > { %1433 = vrot.lane.b32.xlu0 %v4981_v38, %s4278_s17  ;;  %1435 = vrot.lane.b32.xlu1 %v5008_v42, %s4278_s17  ;;  %v3986_v40 = vpop.f32.mrb[88].mxu0 }
 0x1ab   : > { %v2580_v1 = vmax.f32 %v2552_v30, 0.0  ;;  %v1930_v56 = vadd.f32 %v5992_v9, %v1763_v15  ;;  %v2518_v39 = vadd.f32 %v2440_v20, %v2351_v31  ;;  %1249 = vst.msk [vmem:[#allocation2 + $0x430] sm:$0xff] %vm519_vm0, %v3986_v40  ;;  %v1084_v55 = vpop.f32.mrb[89].mxu0  ;;  %v2443_v30 = vrot.slane %v5330_v54, 2  ;;  %v2635_v15 = vld [vmem:[#allocation3] ss:$2 sm:$0xff] }
 0x1ac   : > { %v2024_v48 = vpop.permute.xlu0 %2023  ;;  %v2026_v33 = vpop.permute.xlu1 %2025  ;;  %1239 = vst.msk [vmem:[#allocation2 + $0x3e0] sm:$0xff] %vm519_vm0, %v1084_v55  ;;  %3999 = vmatpush3.bf16.msra.mxu0 %v4143_v16  ;;  %v2661_v31 = vld [vmem:[#allocation3 + $0x1] ss:$2 sm:$0xff] }
 0x1ad   : > { %2608 = vst.msk [vmem:[#allocation3 + $0x10] sm:$0xff] %vm519_vm0, %v2580_v1  ;;  %v2101_v38 = vadd.f32 %v2024_v48, %v1930_v56  ;;  %v2553_v36 = vadd.f32 %v5236_v51, %v2518_v39  ;;  %v2102_v42 = vadd.f32 %v2026_v33, %v1931_v21  ;;  %v3987_v25 = vpop.f32.mrb[90].mxu0  ;;  %v5998_v1 = vld [vmem:[#allocation54_spill] sm:$0xff]  ;;  %v5999_v56 = vld [vmem:[#allocation24_spill] sm:$0xff]  ;;  %v2686_v43 = vmax.f32 %v2635_v15, %v2661_v31 }
 0x1ae   : > { %2051 = vrot.lane.b32.xlu0 %v5993_v26, %s4278_s17  ;;  %1719 = vrot.lane.b32.xlu1 %v5005_v5, %s4278_s17  ;;  %1254 = vst.msk [vmem:[#allocation2 + $0x458] sm:$0xff] %vm519_vm0, %v3987_v25  ;;  %v1087_v14 = vpop.f32.mrb[91].mxu0  ;;  %v4174_v5 = vld [vmem:[#allocation2 + $0x140] sm:$0xff] }
 0x1af   : > { %v2581_v32 = vmax.f32 %v2553_v36, 0.0  ;;  %v5324_v23 = vadd.f32 %v4172_v0, %v2101_v38  ;;  %v5326_v21 = vadd.f32 %v4173_v63, %v2102_v42  ;;  %1244 = vst.msk [vmem:[#allocation2 + $0x408] sm:$0xff] %vm519_vm0, %v1087_v14  ;;  %v2444_v38 = vsel %vm1557_vm2, %v2441_v59, %v2443_v30  ;;  %v6001_v14 = vld [vmem:[#allocation21_spill] sm:$0xff] }
 0x1b0   : > { %v1406_v6 = vpop.permute.xlu0 %1405  ;;  %v1408_v62 = vpop.permute.xlu1 %1407 }
 0x1b1   : > { %2609 = vst.msk [vmem:[#allocation3 + $0x18] sm:$0xff] %vm519_vm0, %v2581_v32  ;;  %v1481_v29 = vadd.f32 %v4174_v5, %v1406_v6  ;;  %v1482_v19 = vadd.f32 %v4175_v8, %v1408_v62  ;;  %v2383_v8 = vld [vmem:[#allocation2 + $0x1d8] sm:$0xff] }
 0x1b2   : > { %2300 = vrot.lane.b32.xlu0 %v5994_v3, %s4278_s17  ;;  %2053 = vrot.lane.b32.xlu1 %v5995_v37, %s4278_s17  ;;  %v3990_v0 = vpop.f32.mrb[92].mxu0  ;;  %v6002_v3 = vld [vmem:[#allocation58_spill] sm:$0xff] }
 0x1b3   : > { %v1649_v58 = vadd.f32 %v5996_v50, %v1481_v29  ;;  %v1650_v27 = vadd.f32 %v5997_v28, %v1482_v19  ;;  %1269 = vst.msk [vmem:[#allocation2 + $0x4d0] sm:$0xff] %vm519_vm0, %v3990_v0  ;;  %v4177_v29 = vld [vmem:[#allocation2 + $0x1b8] sm:$0xff]  ;;  %v1100_v19 = vpop.f32.mrb[93].mxu0  ;;  %v6003_v50 = vld [vmem:[#allocation23_spill] sm:$0xff]  ;;  %v6009_v0 = vrot.slane %v5049_v34, 1 }
 0x1b4   : > { %v2273_v2 = vpop.permute.xlu0 %2272  ;;  %v1692_v20 = vpop.permute.xlu1 %1691  ;;  %1259 = vst.msk [vmem:[#allocation2 + $0x480] sm:$0xff] %vm519_vm0, %v1100_v19  ;;  %v6004_v28 = vld [vmem:[#allocation22_spill] sm:$0xff] }
 0x1b5   : > { %v2352_v61 = vadd.f32 %v2273_v2, %v5278_v12  ;;  %v1766_v40 = vadd.f32 %v1692_v20, %v1650_v27 }
 0x1b6   : > { %1717 = vrot.lane.b32.xlu0 %v5998_v1, %s4278_s17  ;;  %2302 = vrot.lane.b32.xlu1 %v5019_v22, %s4278_s17  ;;  %v6000_v22 = vld [vmem:[#allocation57_spill] sm:$0xff] }
 0x1b7   : > { %v2519_v9 = vadd.f32 %v2442_v53, %v2352_v61  ;;  %v1933_v39 = vadd.f32 %v5999_v56, %v1766_v40  ;;  %v2445_v53 = vrot.slane %v2383_v8, 2  ;;  %v1304_v61 = vld [vmem:[#allocation2 + $0x438] sm:$0x7f]  ;;  %v5370_v40 = vld [vmem:[#allocation2 + $0x200] sm:$0xff]  ;;  %v6006_v56 = vld [vmem:[#allocation28_spill] sm:$0xff] }
 0x1b8   : > { %v2637_v55 = vld [vmem:[#allocation3 + $0x10] ss:$2 sm:$0xff]  ;;  %v2663_v52 = vld [vmem:[#allocation3 + $0x11] ss:$2 sm:$0xff]  ;;  %v1690_v48 = vpop.permute.xlu0 %1689  ;;  %v2275_v33 = vpop.permute.xlu1 %2274 }
 0x1b9   : > { %v2687_v12 = vmax.f32 %v2637_v55, %v2663_v52  ;;  %v2554_v36 = vadd.f32 %v5236_v51, %v2519_v9  ;;  %v1765_v42 = vadd.f32 %v1690_v48, %v1649_v58  ;;  %v2353_v49 = vadd.f32 %v2275_v33, %v5295_v24  ;;  %v4176_v24 = vld [vmem:[#allocation2 + $0x190] sm:$0xff]  ;;  %v4178_v1 = vld [vmem:[#allocation2 + $0x1f8] sm:$0xff]  ;;  %v3991_v55 = vpop.f32.mrb[94].mxu0 }
 0x1ba   : > { %2055 = vrot.lane.b32.xlu0 %v6000_v22, %s4278_s17  ;;  %2057 = vrot.lane.b32.xlu1 %v5062_v45, %s4278_s17  ;;  %v2446_v48 = vsel %vm1557_vm2, %v2443_v30, %v2445_v53  ;;  %1274 = vst.msk [vmem:[#allocation2 + $0x4f8] sm:$0xff] %vm519_vm0, %v3991_v55  ;;  %v5424_v55 = vld [vmem:[#allocation2 + $0x250] sm:$0xff] }
 0x1bb   : > { %v2707_v25 = vmax.f32 %v2686_v43, %v2687_v12  ;;  %v2582_v16 = vmax.f32 %v2554_v36, 0.0  ;;  %v2520_v26 = vadd.f32 %v2444_v38, %v2353_v49  ;;  %v1932_v32 = vadd.f32 %v6001_v14, %v1765_v42  ;;  %v2797_v42 = vld [vmem:[#allocation5] sm:$0xf] }
 0x1bc   : > { %v1410_v63 = vpop.permute.xlu0 %1409  ;;  %v1412_v6 = vpop.permute.xlu1 %1411  ;;  %v1387_v38 = vrot.slane %v1304_v61, 1  ;;  %v2447_v12 = vrot.slane %v5370_v40, 2 }
 0x1bd   : > { %v3902_v59 = vpack.c.bf16 %v2707_v25, %v2707_v25  ;;  %2610 = vst.msk [vmem:[#allocation3 + $0x20] sm:$0xff] %vm519_vm0, %v2582_v16  ;;  %v1483_v62 = vadd.f32 %v4176_v24, %v1410_v63  ;;  %v2555_v5 = vadd.f32 %v5236_v51, %v2520_v26  ;;  %v1484_v45 = vadd.f32 %v4177_v29, %v1412_v6  ;;  %v1103_v25 = vpop.f32.mrb[95].mxu0  ;;  %v4179_v16 = vld [vmem:[#allocation2 + $0x220] sm:$0xff] }
 0x1be   : > { %1437 = vrot.lane.b32.xlu0 %v6002_v3, %s4278_s17  ;;  %1439 = vrot.lane.b32.xlu1 %v5067_v41, %s4278_s17  ;;  %v6005_v41 = vld [vmem:[#allocation60_spill] sm:$0xff]  ;;  %1264 = vst.msk [vmem:[#allocation2 + $0x4a8] sm:$0xff] %vm519_vm0, %v1103_v25  ;;  %v2448_v6 = vsel %vm1557_vm2, %v2445_v53, %v2447_v12  ;;  %v6011_v53 = vld [vmem:[#allocation27_spill] sm:$0xff] }
 0x1bf   : > { %2774 = vst.msk [vmem:[#allocation4] sm:$0xf] %vm2773_vm3, %v3902_v59  ;;  %v2583_v37 = vmax.f32 %v2555_v5, 0.0  ;;  %v1652_v58 = vadd.f32 %v6003_v50, %v1484_v45  ;;  %v1651_v27 = vadd.f32 %v6004_v28, %v1483_v62  ;;  %v6010_v45 = vld [vmem:[#allocation26_spill] sm:$0xff]  ;;  %v4181_v28 = vld [vmem:[#allocation2 + $0x208] sm:$0xff] }
 0x1c0   : > { %v2028_v2 = vpop.permute.xlu0 %2027  ;;  %v1696_v20 = vpop.permute.xlu1 %1695 }
 0x1c1   : > { %2611 = vst.msk [vmem:[#allocation3 + $0x28] sm:$0xff] %vm519_vm0, %v2583_v37  ;;  %v2103_v15 = vadd.f32 %v2028_v2, %v1932_v32  ;;  %v1768_v31 = vadd.f32 %v1696_v20, %v1652_v58  ;;  %v4180_v37 = vld [vmem:[#allocation2 + $0x1e0] sm:$0xff]  ;;  %v1670_v2 = vld [vmem:[#allocation2 + $0x490] sm:$0x3f] }
 0x1c2   : > { %2304 = vrot.lane.b32.xlu0 %v6005_v41, %s4278_s17  ;;  %1723 = vrot.lane.b32.xlu1 %v5059_v10, %s4278_s17 }
 0x1c3   : > { %v5376_v9 = vadd.f32 %v4178_v1, %v2103_v15  ;;  %v5379_v43 = vadd.f32 %v6006_v56, %v1768_v31  ;;  %v6012_v15 = vld [vmem:[#allocation25_spill] sm:$0xff] }
 0x1c4   : > { %v2277_v52 = vpop.permute.xlu0 %2276  ;;  %v2030_v33 = vpop.permute.xlu1 %2029 }
 0x1c5   : > { %v2354_v49 = vadd.f32 %v2277_v52, %v5324_v23  ;;  %v2104_v22 = vadd.f32 %v2030_v33, %v1933_v39 }
 0x1c6   : > { %1721 = vrot.lane.b32.xlu0 %v5055_v60, %s4278_s17  ;;  %1443 = vrot.lane.b32.xlu1 %v1387_v38, %s4278_s17  ;;  %v2796_v54 = vld [vmem:[#allocation4] sm:$0xf]  ;;  %v1388_v60 = vsel %vm1333_vm1, %v6009_v0, %v1387_v38 }
 0x1c7   : > { %v2521_v30 = vadd.f32 %v2446_v48, %v2354_v49  ;;  %v5396_v26 = vadd.f32 %v4179_v16, %v2104_v22  ;;  %v2798_v14 = vsel %vm5386_vm5, %v2796_v54, %v2797_v42  ;;  %v6013_v48 = vld [vmem:[#allocation32_spill] sm:$0xff]  ;;  %v2451_v22 = vrot.slane %v5424_v55, 2 }
 0x1c8   : > { %v5400_v32 = vld [vmem:[#allocation3 + $0x20] ss:$2 sm:$0xff]  ;;  %v5402_v23 = vld [vmem:[#allocation3 + $0x21] ss:$2 sm:$0xff]  ;;  %v1694_v39 = vpop.permute.xlu0 %1693  ;;  %v2279_v63 = vpop.permute.xlu1 %2278  ;;  %2799 = vst [vmem:[#allocation5] sm:$0xf] %v2798_v14 }
 0x1c9   : > { %v2688_v59 = vmax.f32 %v5400_v32, %v5402_v23  ;;  %v2556_v24 = vadd.f32 %v5236_v51, %v2521_v30  ;;  %v1767_v62 = vadd.f32 %v1694_v39, %v1651_v27  ;;  %v2355_v5 = vadd.f32 %v2279_v63, %v5326_v21  ;;  %v2385_v21 = vld [vmem:[#allocation2 + $0x228] sm:$0xff] }
 0x1ca   : > { %1441 = vrot.lane.b32.xlu0 %v1388_v60, %s4278_s17  ;;  %2306 = vrot.lane.b32.xlu1 %v5081_v4, %s4278_s17  ;;  %v2449_v40 = vrot.slane %v2385_v21, 2 }
 0x1cb   : > { %v2584_v34 = vmax.f32 %v2556_v24, 0.0  ;;  %v2522_v29 = vadd.f32 %v2448_v6, %v2355_v5  ;;  %v1934_v8 = vadd.f32 %v6010_v45, %v1767_v62  ;;  %v6015_v24 = vld [vmem:[#allocation30_spill] sm:$0xff] }
 0x1cc   : > { %v1414_v19 = vpop.permute.xlu0 %1413  ;;  %v1416_v3 = vpop.permute.xlu1 %1415  ;;  %v2450_v42 = vsel %vm1557_vm2, %v2447_v12, %v2449_v40  ;;  %v2452_v23 = vsel %vm1557_vm2, %v2449_v40, %v2451_v22 }
 0x1cd   : > { %2612 = vst.msk [vmem:[#allocation3 + $0x30] sm:$0xff] %vm519_vm0, %v2584_v34  ;;  %v1485_v50 = vadd.f32 %v4180_v37, %v1414_v19  ;;  %v2557_v58 = vadd.f32 %v5236_v51, %v2522_v29  ;;  %v1486_v27 = vadd.f32 %v4181_v28, %v1416_v3  ;;  %v2387_v37 = vld [vmem:[#allocation2 + $0x278] sm:$0xff] }
 0x1ce   : > { %2059 = vrot.lane.b32.xlu0 %v5090_v13, %s4278_s17  ;;  %1727 = vrot.lane.b32.xlu1 %v1670_v2, %s4278_s17  ;;  %v4182_v13 = vld [vmem:[#allocation2 + $0x248] sm:$0xff]  ;;  %v2453_v21 = vrot.slane %v2387_v37, 2 }
 0x1cf   : > { %v2585_v4 = vmax.f32 %v2557_v58, 0.0  ;;  %v1654_v20 = vadd.f32 %v6011_v53, %v1486_v27  ;;  %v1653_v31 = vadd.f32 %v6012_v15, %v1485_v50  ;;  %v6017_v58 = vld [vmem:[#allocation29_spill] sm:$0xff]  ;;  %v6018_v53 = vrot.slane %v5156_v18, 1  ;;  %v5467_v15 = vld [vmem:[#allocation2 + $0x2a0] sm:$0xff] }
 0x1d0   : > { %v2032_v61 = vpop.permute.xlu0 %2031  ;;  %v1700_v41 = vpop.permute.xlu1 %1699 }
 0x1d1   : > { %2613 = vst.msk [vmem:[#allocation3 + $0x38] sm:$0xff] %vm519_vm0, %v2585_v4  ;;  %v2105_v1 = vadd.f32 %v2032_v61, %v1934_v8  ;;  %v1770_v56 = vadd.f32 %v1700_v41, %v1654_v20  ;;  %v4186_v61 = vld [vmem:[#allocation2 + $0x298] sm:$0xff] }
 0x1d2   : > { %2308 = vrot.lane.b32.xlu0 %v5093_v44, %s4278_s17  ;;  %2061 = vrot.lane.b32.xlu1 %v5123_v57, %s4278_s17  ;;  %v4183_v57 = vld [vmem:[#allocation2 + $0x270] sm:$0xff] }
 0x1d3   : > { %v5430_v52 = vadd.f32 %v4182_v13, %v2105_v1  ;;  %v5433_v33 = vadd.f32 %v6013_v48, %v1770_v56  ;;  %v2454_v1 = vsel %vm1557_vm2, %v2451_v22, %v2453_v21  ;;  %v2455_v56 = vrot.slane %v5467_v15, 2 }
 0x1d4   : > { %v2281_v38 = vpop.permute.xlu0 %2280  ;;  %v2034_v49 = vpop.permute.xlu1 %2033 }
 0x1d5   : > { %v2356_v25 = vadd.f32 %v2281_v38, %v5376_v9  ;;  %v2106_v54 = vadd.f32 %v2034_v49, %v5379_v43  ;;  %v2808_v38 = vld [vmem:[#allocation5] sm:$0xf0] }
 0x1d6   : > { %1725 = vrot.lane.b32.xlu0 %v5115_v11, %s4278_s17  ;;  %2310 = vrot.lane.b32.xlu1 %v5139_v46, %s4278_s17  ;;  %v2180_v11 = vld [vmem:[#allocation2 + $0x4f0] sm:$0x7f]  ;;  %v6014_v46 = vrot.slane %v5119_v17, 2 }
 0x1d7   : > { %v2523_v44 = vadd.f32 %v2450_v42, %v2356_v25  ;;  %v5443_v30 = vadd.f32 %v4183_v57, %v2106_v54  ;;  %v2262_v29 = vrot.slane %v2180_v11, 1  ;;  %v4187_v25 = vld [vmem:[#allocation2 + $0x2c0] sm:$0xff] }
 0x1d8   : > { %v2641_v16 = vld [vmem:[#allocation3 + $0x30] ss:$2 sm:$0xff]  ;;  %v2667_v14 = vld [vmem:[#allocation3 + $0x31] ss:$2 sm:$0xff]  ;;  %v1698_v12 = vpop.permute.xlu0 %1697  ;;  %v2283_v32 = vpop.permute.xlu1 %2282 }
 0x1d9   : > { %v2689_v39 = vmax.f32 %v2641_v16, %v2667_v14  ;;  %v2558_v9 = vadd.f32 %v5236_v51, %v2523_v44  ;;  %v1769_v43 = vadd.f32 %v1698_v12, %v1653_v31  ;;  %v2357_v0 = vadd.f32 %v2283_v32, %v5396_v26  ;;  %v4184_v26 = vld [vmem:[#allocation2 + $0x230] sm:$0xff] }
 0x1da   : > { %2063 = vrot.lane.b32.xlu0 %v5147_v7, %s4278_s17  ;;  %2065 = vrot.lane.b32.xlu1 %v6014_v46, %s4278_s17  ;;  %v4185_v7 = vld [vmem:[#allocation2 + $0x258] sm:$0xff] }
 0x1db   : > { %v2709_v60 = vmax.f32 %v2688_v59, %v2689_v39  ;;  %v2586_v63 = vmax.f32 %v2558_v9, 0.0  ;;  %v2524_v6 = vadd.f32 %v2452_v23, %v2357_v0  ;;  %v1936_v62 = vadd.f32 %v6015_v24, %v1769_v43  ;;  %v6016_v59 = vld [vmem:[#allocation31_spill] sm:$0xff]  ;;  %v6022_v9 = vld [vmem:[#allocation34_spill] sm:$0xff] }
 0x1dc   : > { %v1418_v5 = vpop.permute.xlu0 %1417  ;;  %v1420_v34 = vpop.permute.xlu1 %1419 }
 0x1dd   : > { %v3904_v45 = vpack.c.bf16 %v2709_v60, %v2709_v60  ;;  %2614 = vst.msk [vmem:[#allocation3 + $0x40] sm:$0xff] %vm519_vm0, %v2586_v63  ;;  %v1487_v8 = vadd.f32 %v4184_v26, %v1418_v5  ;;  %v2559_v19 = vadd.f32 %v5236_v51, %v2524_v6  ;;  %v1488_v3 = vadd.f32 %v4185_v7, %v1420_v34  ;;  %v4147_v60 = vld [vmem:[%s5902_s3 + $0xc] ss:$20 sps:$4 sm:$0xff]  }
 0x1de   : > { %2312 = vrot.lane.b32.xlu0 %v5150_v47, %s4278_s17  ;;  %2314 = vrot.lane.b32.xlu1 %v5167_v35, %s4278_s17  ;;  %v2263_v47 = vsel %vm1333_vm1, %v6018_v53, %v2262_v29  ;;  %v6019_v35 = vld [vmem:[#allocation35_spill] sm:$0xff]  ;;  %v6025_v53 = vld [vmem:[#allocation36_spill] sm:$0xff] }
 0x1df   : > { %2776 = vst.msk [vmem:[#allocation4 + $0x8] sm:$0xf] %vm2773_vm3, %v3904_v45  ;;  %v2587_v17 = vmax.f32 %v2559_v19, 0.0  ;;  %v1656_v50 = vadd.f32 %v6016_v59, %v1488_v3  ;;  %v1655_v28 = vadd.f32 %v6017_v58, %v1487_v8  ;;  %3056 = vmatprep.subr.bf16.mxu1 %v4147_v60  ;;  %v4188_v34 = vld [vmem:[#allocation2 + $0x2e8] sm:$0xff]  ;;  %v4189_v45 = vld [vmem:[#allocation2 + $0x310] sm:$0xff] }
 0x1e0   : > { %v2036_v27 = vpop.permute.xlu0 %2035  ;;  %v1704_v2 = vpop.permute.xlu1 %1703  ;;  %v4150_v8 = vld [vmem:[%s5902_s3 + $0x34] ss:$20 sps:$4 sm:$0xff]  }
 0x1e1   : > { %2615 = vst.msk [vmem:[#allocation3 + $0x48] sm:$0xff] %vm519_vm0, %v2587_v17  ;;  %v2107_v4 = vadd.f32 %v2036_v27, %v1936_v62  ;;  %v1772_v20 = vadd.f32 %v1704_v2, %v1656_v50  ;;  %v2389_v62 = vld [vmem:[#allocation2 + $0x2c8] sm:$0xff]  ;;  %v4190_v17 = vld [vmem:[#allocation2 + $0x280] sm:$0xff]  ;;  %v6023_v27 = vmov 0   ;;  %v6024_v2 = vld [vmem:[#allocation33_spill] sm:$0xff] }
 0x1e2   : > { %2316 = vrot.lane.b32.xlu0 %v2263_v47, %s4278_s17  ;;  %2318 = vrot.lane.b32.xlu1 %v2262_v29, %s4278_s17  ;;  %v2457_v7 = vrot.slane %v2389_v62, 2  ;;  %v4191_v50 = vld [vmem:[#allocation2 + $0x2a8] sm:$0xff] }
 0x1e3   : > { %v1939_v31 = vadd.f32 %v6019_v35, %v1772_v20  ;;  %v5472_v40 = vadd.f32 %v4186_v61, %v2107_v4  ;;  %v4154_v20 = vld [vmem:[%s5902_s3 + $0x5c] ss:$20 sps:$4 sm:$0xff]  }
 0x1e4   : > { %v2285_v41 = vpop.permute.xlu0 %2284  ;;  %v2038_v18 = vpop.permute.xlu1 %2037  ;;  %v2458_v35 = vsel %vm1557_vm2, %v2455_v56, %v2457_v7 }
 0x1e5   : > { %v2358_v55 = vadd.f32 %v2285_v41, %v5430_v52  ;;  %v2108_v13 = vadd.f32 %v2038_v18, %v5433_v33  ;;  %v2456_v52 = vsel %vm1557_vm2, %v2453_v21, %v2455_v56  ;;  %v4148_v21 = vld [vmem:[%s5902_s3 + $0x30] ss:$20 sps:$4 sm:$0xff]   ;;  %v4152_v18 = vld [vmem:[%s5902_s3 + $0x58] ss:$20 sps:$4 sm:$0xff]  }
 0x1e6   : > { %v4139_v42 = vld [vmem:[#allocation4 + $0x8] ss:$0 sps:$4 sm:$0xff]  }
 0x1e7   : > { %v2525_v49 = vadd.f32 %v2454_v1, %v2358_v55  ;;  %v5482_v54 = vadd.f32 %v4187_v25, %v2108_v13  ;;  %v2809_v33 = vsel %vm5478_vm8, %v4139_v42, %v2808_v38  ;;  %v6026_v13 = vld [vmem:[#allocation42_spill] sm:$0xff] }
 0x1e8   : > { %v5484_v44 = vld [vmem:[#allocation3 + $0x40] ss:$2 sm:$0xff]  ;;  %v5486_v22 = vld [vmem:[#allocation3 + $0x41] ss:$2 sm:$0xff]  ;;  %v1702_v57 = vpop.permute.xlu0 %1701  ;;  %v2287_v16 = vpop.permute.xlu1 %2286  ;;  %2810 = vst [vmem:[#allocation5] sm:$0xf0] %v2809_v33 }
 0x1e9   : > { %v2690_v14 = vmax.f32 %v5484_v44, %v5486_v22  ;;  %v2560_v12 = vadd.f32 %v5236_v51, %v2525_v49  ;;  %v1771_v32 = vadd.f32 %v1702_v57, %v1655_v28  ;;  %v2359_v23 = vadd.f32 %v2287_v16, %v5443_v30  ;;  %v4145_v30 = vld [vmem:[%s5902_s3 + $0x8] ss:$20 sps:$4 sm:$0xff]   ;;  %v5518_v28 = vld [vmem:[#allocation2 + $0x2f0] sm:$0xff]  ;;  %v4157_v42 = vld [vmem:[%s5902_s3 + $0x84] ss:$20 sps:$4 sm:$0xff]  }
 0x1ea   : > { %v2459_v61 = vrot.slane %v5518_v28, 2  ;;  %v6028_v22 = vld [vmem:[#allocation40_spill] sm:$0xff] }
 0x1eb   : > { %v2588_v39 = vmax.f32 %v2560_v12, 0.0  ;;  %v1938_v43 = vadd.f32 %v6022_v9, %v1771_v32  ;;  %v2526_v0 = vadd.f32 %v2456_v52, %v2359_v23  ;;  %v4155_v32 = vld [vmem:[%s5902_s3 + $0x80] ss:$20 sps:$4 sm:$0xff]  }
 0x1ec   : > { %v2040_v11 = vpop.permute.xlu0 %2039  ;;  %v2042_v46 = vpop.permute.xlu1 %2041 }
 0x1ed   : > { %2616 = vst.msk [vmem:[#allocation3 + $0x50] sm:$0xff] %vm519_vm0, %v2588_v39  ;;  %v2109_v63 = vadd.f32 %v2040_v11, %v1938_v43  ;;  %v2561_v6 = vadd.f32 %v5236_v51, %v2526_v0  ;;  %v2110_v24 = vadd.f32 %v2042_v46, %v1939_v31  ;;  %v6027_v43 = vld [vmem:[#allocation38_spill] sm:$0xff] }
 0x1ef   : > { %v2589_v5 = vmax.f32 %v2561_v6, 0.0  ;;  %v5504_v29 = vadd.f32 %v4188_v34, %v2109_v63  ;;  %v5506_v26 = vadd.f32 %v4189_v45, %v2110_v24  ;;  %v5511_v37 = vld [vmem:[#allocation5] sm:$0xff] }
 0x1f0   : > { %v1422_v19 = vpop.permute.xlu0 %1421  ;;  %v1424_v3 = vpop.permute.xlu1 %1423  ;;  %3885 = vmatmul.mubr.msk.bf16.vlgmr.msra.gmra.mrb[64].mxu1 %vm519_vm0, %v5511_v37  ;;  %4000 = vmatprep.mubr.msk.bf16.mxu0 %vm519_vm0, %v5511_v37  ;;  %v4193_v24 = vld [vmem:[#allocation2 + $0x2f8] sm:$0xff] }
 0x1f1   : > { %2617 = vst.msk [vmem:[#allocation3 + $0x58] sm:$0xff] %vm519_vm0, %v2589_v5  ;;  %v1489_v59 = vadd.f32 %v4190_v17, %v1422_v19  ;;  %v1490_v58 = vadd.f32 %v4191_v50, %v1424_v3  ;;  %3025 = vmatprep.mubr.bf16.mxu1 %v6023_v27  ;;  %3057 = vmatpush1.bf16.msra.mxu1 %v4145_v30  ;;  %v2391_v30 = vld [vmem:[#allocation2 + $0x318] sm:$0xff]  ;;  %v2392_v17 = vld [vmem:[#allocation2 + $0x340] sm:$0xff] }
 0x1f2   : > { %3058 = vmatprep.subr.bf16.mxu1 %v4150_v8  ;;  %v6029_v5 = vld [vmem:[#allocation37_spill] sm:$0xff]  ;;  %v2461_v8 = vrot.slane %v2391_v30, 2 }
 0x1f3   : > { %v1657_v4 = vadd.f32 %v6024_v2, %v1489_v59  ;;  %v1658_v47 = vadd.f32 %v6025_v53, %v1490_v58  ;;  %v4194_v59 = vld [vmem:[#allocation2 + $0x338] sm:$0xff]  ;;  %v2463_v53 = vrot.slane %v2392_v17, 2 }
 0x1f4   : > { %v2289_v15 = vpop.permute.xlu0 %2288  ;;  %v1708_v31 = vpop.permute.xlu1 %1707  ;;  %v6030_v58 = vld [vmem:[#allocation50_spill] sm:$0xff]  ;;  %v2462_v2 = vsel %vm1557_vm2, %v2459_v61, %v2461_v8 }
 0x1f5   : > { %v2360_v41 = vadd.f32 %v2289_v15, %v5472_v40  ;;  %v1774_v1 = vadd.f32 %v1708_v31, %v1658_v47  ;;  %3059 = vmatpush1.bf16.msra.mxu1 %v4148_v21  ;;  %v2460_v40 = vsel %vm1557_vm2, %v2457_v7, %v2459_v61  ;;  %v2812_v47 = vld [vmem:[#allocation5 + $0x8] sm:$0xf] }
 0x1f6   : > { %3060 = vmatprep.subr.bf16.mxu1 %v4154_v20 }
 0x1f7   : > { %v2527_v55 = vadd.f32 %v2458_v35, %v2360_v41  ;;  %v1941_v38 = vadd.f32 %v6026_v13, %v1774_v1  ;;  %v4195_v41 = vld [vmem:[#allocation2 + $0x360] sm:$0xff] }
 0x1f8   : > { %v2645_v56 = vld [vmem:[#allocation3 + $0x50] ss:$2 sm:$0xff]  ;;  %v2671_v49 = vld [vmem:[#allocation3 + $0x51] ss:$2 sm:$0xff]  ;;  %v1706_v25 = vpop.permute.xlu0 %1705  ;;  %v2291_v57 = vpop.permute.xlu1 %2290 }
 0x1f9   : > { %v2691_v16 = vmax.f32 %v2645_v56, %v2671_v49  ;;  %v2562_v52 = vadd.f32 %v5236_v51, %v2527_v55  ;;  %v1773_v33 = vadd.f32 %v1706_v25, %v1657_v4  ;;  %v2361_v12 = vadd.f32 %v2291_v57, %v5482_v54  ;;  %3061 = vmatpush1.bf16.msra.mxu1 %v4152_v18  ;;  %v4192_v54 = vld [vmem:[#allocation2 + $0x2d0] sm:$0xff] }
 0x1fa   : > { %3062 = vmatprep.subr.bf16.mxu1 %v4157_v42  ;;  %v2464_v49 = vsel %vm1557_vm2, %v2461_v8, %v2463_v53 }
 0x1fb   : > { %v2711_v23 = vmax.f32 %v2690_v14, %v2691_v16  ;;  %v2590_v39 = vmax.f32 %v2562_v52, 0.0  ;;  %v2528_v9 = vadd.f32 %v2460_v40, %v2361_v12  ;;  %v1940_v0 = vadd.f32 %v6027_v43, %v1773_v33  ;;  %v6031_v16 = vld [vmem:[#allocation45_spill] sm:$0xff] }
 0x1fc   : > { %v1426_v11 = vpop.permute.xlu0 %1425  ;;  %v1428_v46 = vpop.permute.xlu1 %1427 }
 0x1fd   : > { %v3906_v60 = vpack.c.bf16 %v2711_v23, %v2711_v23  ;;  %2618 = vst.msk [vmem:[#allocation3 + $0x60] sm:$0xff] %vm519_vm0, %v2590_v39  ;;  %v1491_v63 = vadd.f32 %v4192_v54, %v1426_v11  ;;  %v2563_v6 = vadd.f32 %v5236_v51, %v2528_v9  ;;  %v1492_v62 = vadd.f32 %v4193_v24, %v1428_v46  ;;  %v4197_v9 = vld [vmem:[#allocation2 + $0x348] sm:$0xff] }
 0x1fe   : > { %3063 = vmatpush1.bf16.msra.mxu1 %v4155_v32  ;;  %v4196_v32 = vld [vmem:[#allocation2 + $0x320] sm:$0xff]  ;;  %v6032_v46 = vld [vmem:[#allocation48_spill] sm:$0xff] }
 0x1ff   : > { %2778 = vst.msk [vmem:[#allocation4 + $0x10] sm:$0xf] %vm2773_vm3, %v3906_v60  ;;  %v2591_v44 = vmax.f32 %v2563_v6, 0.0  ;;  %v1660_v14 = vadd.f32 %v6028_v22, %v1492_v62  ;;  %v1659_v34 = vadd.f32 %v6029_v5, %v1491_v63  ;;  %v6033_v54 = vld [vmem:[#allocation44_spill] sm:$0xff]  ;;  %v6034_v5 = vld [vmem:[#allocation59_spill] sm:$0xff] }
 0x200   : > { %v2044_v45 = vpop.permute.xlu0 %2043  ;;  %v1712_v19 = vpop.permute.xlu1 %1711  ;;  %v4198_v22 = vld [vmem:[#allocation2 + $0x388] sm:$0xff] }
 0x201   : > { %2619 = vst.msk [vmem:[#allocation3 + $0x68] sm:$0xff] %vm519_vm0, %v2591_v44  ;;  %v2111_v7 = vadd.f32 %v2044_v45, %v1940_v0  ;;  %v1776_v3 = vadd.f32 %v1712_v19, %v1660_v14  ;;  %v2393_v0 = vld [vmem:[#allocation2 + $0x368] sm:$0xff]  ;;  %v2394_v44 = vld [vmem:[#allocation2 + $0x390] sm:$0xff] }
 0x202   : > { %v2465_v6 = vrot.slane %v2393_v0, 2  ;;  %v2396_v0 = vld [vmem:[#allocation2 + $0x3e0] sm:$0xff] }
 0x203   : > { %v2167_v50 = vadd.f32 %v4194_v59, %v2111_v7  ;;  %v1943_v28 = vadd.f32 %v6030_v58, %v1776_v3  ;;  %v2467_v7 = vrot.slane %v2394_v44, 2  ;;  %v4199_v58 = vld [vmem:[#allocation2 + $0x3b0] sm:$0xff] }
 0x204   : > { %v2293_v21 = vpop.permute.xlu0 %2292  ;;  %v2046_v4 = vpop.permute.xlu1 %2045  ;;  %v2466_v8 = vsel %vm1557_vm2, %v2463_v53, %v2465_v6 }
 0x205   : > { %v2362_v20 = vadd.f32 %v2293_v21, %v5504_v29  ;;  %v2112_v15 = vadd.f32 %v2046_v4, %v1941_v38 }
 0x206   : > { %v2811_v35 = vld [vmem:[#allocation4 + $0x10] sm:$0xf] }
 0x207   : > { %v2529_v31 = vadd.f32 %v2462_v2, %v2362_v20  ;;  %v2168_v1 = vadd.f32 %v4195_v41, %v2112_v15  ;;  %v2813_v18 = vsel %vm5386_vm5, %v2811_v35, %v2812_v47  ;;  %v2468_v15 = vsel %vm1557_vm2, %v2465_v6, %v2467_v7 }
 0x208   : > { %v2647_v55 = vld [vmem:[#allocation3 + $0x60] ss:$2 sm:$0xff]  ;;  %v2673_v13 = vld [vmem:[#allocation3 + $0x61] ss:$2 sm:$0xff]  ;;  %v1710_v42 = vpop.permute.xlu0 %1709  ;;  %v2295_v56 = vpop.permute.xlu1 %2294  ;;  %2814 = vst [vmem:[#allocation5 + $0x8] sm:$0xf] %v2813_v18 }
 0x209   : > { %v2692_v61 = vmax.f32 %v2647_v55, %v2673_v13  ;;  %v2564_v25 = vadd.f32 %v5236_v51, %v2529_v31  ;;  %v1775_v57 = vadd.f32 %v1710_v42, %v1659_v34  ;;  %v2363_v29 = vadd.f32 %v2295_v56, %v5506_v26  ;;  %v6035_v42 = vld [vmem:[#allocation53_spill] sm:$0xff] }
 0x20a   : > { %v2471_v6 = vrot.slane %v2396_v0, 2  ;;  %v2398_v0 = vld [vmem:[#allocation2 + $0x430] sm:$0xff] }
 0x20b   : > { %v2592_v38 = vmax.f32 %v2564_v25, 0.0  ;;  %v2530_v40 = vadd.f32 %v2464_v49, %v2363_v29  ;;  %v1942_v52 = vadd.f32 %v6031_v16, %v1775_v57  ;;  %v4200_v25 = vld [vmem:[#allocation2 + $0x370] sm:$0xff]  ;;  %v2395_v16 = vld [vmem:[#allocation2 + $0x3b8] sm:$0xff] }
 0x20c   : > { %v1430_v33 = vpop.permute.xlu0 %1429  ;;  %v1432_v12 = vpop.permute.xlu1 %1431 }
 0x20d   : > { %2620 = vst.msk [vmem:[#allocation3 + $0x70] sm:$0xff] %vm519_vm0, %v2592_v38  ;;  %v1493_v23 = vadd.f32 %v4196_v32, %v1430_v33  ;;  %v2565_v39 = vadd.f32 %v5236_v51, %v2530_v40  ;;  %v1494_v43 = vadd.f32 %v4197_v9, %v1432_v12  ;;  %v4201_v38 = vld [vmem:[#allocation2 + $0x398] sm:$0xff]  ;;  %v6037_v33 = vld [vmem:[#allocation52_spill] sm:$0xff] }
 0x20f   : > { %v2593_v11 = vmax.f32 %v2565_v39, 0.0  ;;  %v1662_v60 = vadd.f32 %v6032_v46, %v1494_v43  ;;  %v1661_v26 = vadd.f32 %v6033_v54, %v1493_v23  ;;  %v2469_v23 = vrot.slane %v2395_v16, 2  ;;  %v4202_v46 = vld [vmem:[#allocation2 + $0x3d8] sm:$0xff]  ;;  %v4208_v16 = vld [vmem:[#allocation2 + $0x3e8] sm:$0xff] }
 0x210   : > { %v2048_v63 = vpop.permute.xlu0 %2047  ;;  %v1716_v24 = vpop.permute.xlu1 %1715 }
 0x211   : > { %2621 = vst.msk [vmem:[#allocation3 + $0x78] sm:$0xff] %vm519_vm0, %v2593_v11  ;;  %v2113_v62 = vadd.f32 %v2048_v63, %v1942_v52  ;;  %v1778_v30 = vadd.f32 %v1716_v24, %v1662_v60  ;;  %v6038_v11 = vld [vmem:[#allocation63_spill] sm:$0xff] }
 0x213   : > { %v2169_v14 = vadd.f32 %v4198_v22, %v2113_v62  ;;  %v1945_v34 = vadd.f32 %v6034_v5, %v1778_v30  ;;  %v2820_v30 = vld [vmem:[#allocation5 + $0x8] sm:$0xf0]  ;;  %v4203_v5 = vld [vmem:[#allocation2 + $0x400] sm:$0xff] }
 0x214   : > { %v2297_v45 = vpop.permute.xlu0 %2296  ;;  %v2050_v19 = vpop.permute.xlu1 %2049 }
 0x215   : > { %v2364_v3 = vadd.f32 %v2297_v45, %v2167_v50  ;;  %v2114_v17 = vadd.f32 %v2050_v19, %v1943_v28 }
 0x217   : > { %v2531_v59 = vadd.f32 %v2466_v8, %v2364_v3  ;;  %v2170_v21 = vadd.f32 %v4199_v58, %v2114_v17 }
 0x218   : > { %v2649_v2 = vld [vmem:[#allocation3 + $0x70] ss:$2 sm:$0xff]  ;;  %v2675_v4 = vld [vmem:[#allocation3 + $0x71] ss:$2 sm:$0xff]  ;;  %v1714_v47 = vpop.permute.xlu0 %1713  ;;  %v2299_v20 = vpop.permute.xlu1 %2298 }
 0x219   : > { %v2693_v35 = vmax.f32 %v2649_v2, %v2675_v4  ;;  %v2566_v31 = vadd.f32 %v5236_v51, %v2531_v59  ;;  %v1777_v41 = vadd.f32 %v1714_v47, %v1661_v26  ;;  %v2365_v18 = vadd.f32 %v2299_v20, %v2168_v1  ;;  %v6039_v20 = vld [vmem:[#allocation62_spill] sm:$0xff] }
 0x21a   : > { %v2470_v26 = vsel %vm1557_vm2, %v2467_v7, %v2469_v23  ;;  %v2472_v59 = vsel %vm1557_vm2, %v2469_v23, %v2471_v6 }
 0x21b   : > { %v2713_v55 = vmax.f32 %v2692_v61, %v2693_v35  ;;  %v2594_v53 = vmax.f32 %v2566_v31, 0.0  ;;  %v2532_v13 = vadd.f32 %v2468_v15, %v2365_v18  ;;  %v1944_v50 = vadd.f32 %v6035_v42, %v1777_v41  ;;  %v6036_v61 = vld [vmem:[#allocation56_spill] sm:$0xff] }
 0x21c   : > { %v1434_v28 = vpop.permute.xlu0 %1433  ;;  %v1436_v56 = vpop.permute.xlu1 %1435 }
 0x21d   : > { %v3908_v49 = vpack.c.bf16 %v2713_v55, %v2713_v55  ;;  %2622 = vst.msk [vmem:[#allocation3 + $0x80] sm:$0xff] %vm519_vm0, %v2594_v53  ;;  %v1495_v57 = vadd.f32 %v4200_v25, %v1434_v28  ;;  %v2567_v29 = vadd.f32 %v5236_v51, %v2532_v13  ;;  %v1496_v40 = vadd.f32 %v4201_v38, %v1436_v56  ;;  %v2397_v13 = vld [vmem:[#allocation2 + $0x408] sm:$0xff]  ;;  %v4206_v56 = vld [vmem:[#allocation2 + $0x450] sm:$0xff]  ;;  %v4207_v38 = vld [vmem:[#allocation2 + $0x3c0] sm:$0xff] }
 0x21e   : > { %v2473_v25 = vrot.slane %v2397_v13, 2 }
 0x21f   : > { %2780 = vst.msk [vmem:[#allocation4 + $0x18] sm:$0xf] %vm2773_vm3, %v3908_v49  ;;  %v2595_v1 = vmax.f32 %v2567_v29, 0.0  ;;  %v1664_v52 = vadd.f32 %v6036_v61, %v1496_v40  ;;  %v1663_v12 = vadd.f32 %v6037_v33, %v1495_v57  ;;  %v6040_v61 = vld [vmem:[#allocation61_spill] sm:$0xff]  ;;  %v6041_v33 = vld [vmem:[#allocation64_spill] sm:$0xff] }
 0x220   : > { %v2052_v32 = vpop.permute.xlu0 %2051  ;;  %v1720_v39 = vpop.permute.xlu1 %1719  ;;  %v2474_v23 = vsel %vm1557_vm2, %v2471_v6, %v2473_v25 }
 0x221   : > { %2623 = vst.msk [vmem:[#allocation3 + $0x88] sm:$0xff] %vm519_vm0, %v2595_v1  ;;  %v2115_v9 = vadd.f32 %v2052_v32, %v1944_v50  ;;  %v1780_v43 = vadd.f32 %v1720_v39, %v1664_v52  ;;  %v4205_v50 = vld [vmem:[#allocation2 + $0x428] sm:$0xff] }
 0x223   : > { %v1947_v51 = vadd.f32 %v6038_v11, %v1780_v43  ;;  %v2171_v60 = vadd.f32 %v4202_v46, %v2115_v9 }
 0x224   : > { %v2301_v54 = vpop.permute.xlu0 %2300  ;;  %v2054_v63 = vpop.permute.xlu1 %2053 }
 0x225   : > { %v2366_v24 = vadd.f32 %v2301_v54, %v2169_v14  ;;  %v2116_v62 = vadd.f32 %v2054_v63, %v1945_v34  ;;  %v5590_v14 = vld [vmem:[%s5901_s2] ss:$0 sm:$0xff] }
 0x226   : > { %v4144_v44 = vld [vmem:[#allocation4 + $0x18] ss:$0 sps:$4 sm:$0xff]  }
 0x227   : > { %v2533_v22 = vadd.f32 %v2470_v26, %v2366_v24  ;;  %v5582_v45 = vadd.f32 %v4203_v5, %v2116_v62  ;;  %v2821_v58 = vsel %vm5478_vm8, %v4144_v44, %v2820_v30  ;;  %v2475_v62 = vrot.slane %v2398_v0, 2 }
 0x228   : > { %v2651_v8 = vld [vmem:[#allocation3 + $0x80] ss:$2 sm:$0xff]  ;;  %v2677_v19 = vld [vmem:[#allocation3 + $0x81] ss:$2 sm:$0xff]  ;;  %v1718_v3 = vpop.permute.xlu0 %1717  ;;  %v2303_v17 = vpop.permute.xlu1 %2302  ;;  %2822 = vst [vmem:[#allocation5 + $0x8] sm:$0xf0] %v2821_v58 }
 0x229   : > { %v2694_v7 = vmax.f32 %v2651_v8, %v2677_v19  ;;  %v2568_v34 = vadd.f32 %v5590_v14, %v2533_v22  ;;  %v1779_v2 = vadd.f32 %v1718_v3, %v1663_v12  ;;  %v2367_v4 = vadd.f32 %v2303_v17, %v2170_v21  ;;  %v6043_v19 = vld [vmem:[#allocation66_spill] sm:$0xff]  ;;  %v4209_v58 = vld [vmem:[#allocation2 + $0x410] sm:$0xff] }
 0x22a   : > { %v2476_v17 = vsel %vm1557_vm2, %v2473_v25, %v2475_v62 }
 0x22b   : > { %v2596_v47 = vmax.f32 %v2568_v34, 0.0  ;;  %v1946_v15 = vadd.f32 %v6039_v20, %v1779_v2  ;;  %v2534_v35 = vadd.f32 %v2472_v59, %v2367_v4  ;;  %v2399_v4 = vld [vmem:[#allocation2 + $0x458] sm:$0xff] }
 0x22c   : > { %v2056_v31 = vpop.permute.xlu0 %2055  ;;  %v2058_v41 = vpop.permute.xlu1 %2057  ;;  %v6044_v20 = vld [vmem:[#allocation65_spill] sm:$0xff] }
 0x22d   : > { %2624 = vst.msk [vmem:[#allocation3 + $0x90] sm:$0xff] %vm519_vm0, %v2596_v47  ;;  %v2117_v18 = vadd.f32 %v2056_v31, %v1946_v15  ;;  %v2569_v55 = vadd.f32 %v5590_v14, %v2534_v35  ;;  %v2118_v53 = vadd.f32 %v2058_v41, %v1947_v51  ;;  %v6042_v51 = vld [vmem:[#allocation68_spill] sm:$0xff]  ;;  %v2477_v35 = vrot.slane %v2399_v4, 2 }
 0x22e   : > { %v4212_v4 = vld [vmem:[#allocation2 + $0x4c8] sm:$0xff] }
 0x22f   : > { %v2597_v42 = vmax.f32 %v2569_v55, 0.0  ;;  %v5596_v28 = vadd.f32 %v4205_v50, %v2117_v18  ;;  %v5598_v21 = vadd.f32 %v4206_v56, %v2118_v53  ;;  %v5600_v29 = vld [vmem:[#allocation5 + $0x8] sm:$0xff]  ;;  %v1302_v55 = vld [vmem:[#allocation2 + $0x438] sm:$0x3f]  ;;  %v2478_v25 = vsel %vm1557_vm2, %v2475_v62, %v2477_v35 }
 0x230   : > { %v1438_v49 = vpop.permute.xlu0 %1437  ;;  %v1440_v57 = vpop.permute.xlu1 %1439  ;;  %3886 = vmatmul.mubr.msk.bf16.gmra.mrb[68].mxu1 %vm519_vm0, %v5600_v29  ;;  %4001 = vmatmul.mubr.msk.bf16.vlgmr.msra.gmra.mrb[96].mxu0 %vm519_vm0, %v5600_v29  ;;  %v2400_v50 = vld [vmem:[#allocation2 + $0x480] sm:$0xff]  ;;  %v4210_v56 = vld [vmem:[#allocation2 + $0x478] sm:$0xff] }
 0x231   : > { %2625 = vst.msk [vmem:[#allocation3 + $0x98] sm:$0xff] %vm519_vm0, %v2597_v42  ;;  %v1497_v40 = vadd.f32 %v4207_v38, %v1438_v49  ;;  %v1498_v1 = vadd.f32 %v4208_v16, %v1440_v57  ;;  %3035 = vmatprep.mubr.bf16.mxu1 %v6023_v27  ;;  %v1812_v42 = vld [vmem:[#allocation2 + $0x498] sm:$0x7f]  ;;  %v2824_v38 = vld [vmem:[#allocation5 + $0x10] sm:$0xf] }
 0x233   : > { %v1665_v52 = vadd.f32 %v6040_v61, %v1497_v40  ;;  %v1666_v12 = vadd.f32 %v6041_v33, %v1498_v1  ;;  %v1894_v1 = vrot.slane %v1812_v42, 1  ;;  %v2479_v61 = vrot.slane %v2400_v50, 2 }
 0x234   : > { %v2305_v32 = vpop.permute.xlu0 %2304  ;;  %v1724_v39 = vpop.permute.xlu1 %1723 }
 0x235   : > { %v2368_v9 = vadd.f32 %v2305_v32, %v2171_v60  ;;  %v1782_v43 = vadd.f32 %v1724_v39, %v1666_v12  ;;  %v6045_v12 = vrot.slane %v5059_v10, 2  ;;  %v2480_v10 = vsel %vm1557_vm2, %v2477_v35, %v2479_v61 }
 0x237   : > { %v2535_v11 = vadd.f32 %v2474_v23, %v2368_v9  ;;  %v1949_v46 = vadd.f32 %v6042_v51, %v1782_v43  ;;  %v4211_v23 = vld [vmem:[#allocation2 + $0x4a0] sm:$0xff] }
 0x238   : > { %v2653_v54 = vld [vmem:[#allocation3 + $0x90] ss:$2 sm:$0xff]  ;;  %v2679_v26 = vld [vmem:[#allocation3 + $0x91] ss:$2 sm:$0xff]  ;;  %v1722_v63 = vpop.permute.xlu0 %1721  ;;  %v1444_v24 = vpop.permute.xlu1 %1443 }
 0x239   : > { %v2695_v30 = vmax.f32 %v2653_v54, %v2679_v26  ;;  %v2570_v44 = vadd.f32 %v5590_v14, %v2535_v11  ;;  %v1781_v22 = vadd.f32 %v1722_v63, %v1665_v52  ;;  %v1500_v53 = vadd.f32 %v1444_v24, %v1302_v55  ;;  %v6046_v54 = vld [vmem:[#allocation67_spill] sm:$0xff] }
 0x23a   : > { %v6047_v26 = vrot.slane %v6046_v54, 1 }
 0x23b   : > { %v2715_v5 = vmax.f32 %v2694_v7, %v2695_v30  ;;  %v2598_v8 = vmax.f32 %v2570_v44, 0.0  ;;  %v1948_v6 = vadd.f32 %v6043_v19, %v1781_v22  ;;  %v1668_v32 = vadd.f32 %v6045_v12, %v1500_v53  ;;  %v2401_v44 = vld [vmem:[#allocation2 + $0x4a8] sm:$0xff]  ;;  %v2402_v22 = vld [vmem:[#allocation2 + $0x4d0] sm:$0xff] }
 0x23c   : > { %v1442_v3 = vpop.permute.xlu0 %1441  ;;  %v2307_v60 = vpop.permute.xlu1 %2306  ;;  %v1895_v63 = vsel %vm1333_vm1, %v6047_v26, %v1894_v1  ;;  %v2150_v53 = vld [vmem:[#allocation2 + $0x4f0] sm:$0x3f] }
 0x23d   : > { %v3910_v59 = vpack.c.bf16 %v2715_v5, %v2715_v5  ;;  %2626 = vst.msk [vmem:[#allocation3 + $0xa0] sm:$0xff] %vm519_vm0, %v2598_v8  ;;  %v1499_v34 = vadd.f32 %v4209_v58, %v1442_v3  ;;  %v2369_v2 = vadd.f32 %v2307_v60, %v5582_v45  ;;  %v2483_v58 = vrot.slane %v2402_v22, 2 }
 0x23f   : > { %2782 = vst.msk [vmem:[#allocation4 + $0x20] sm:$0xf] %vm2773_vm3, %v3910_v59  ;;  %v2536_v47 = vadd.f32 %v2476_v17, %v2369_v2  ;;  %v1667_v7 = vadd.f32 %v6044_v20, %v1499_v34  ;;  %v2481_v59 = vrot.slane %v2401_v44, 2  ;;  %v2403_v20 = vld [vmem:[#allocation2 + $0x4f8] sm:$0xff] }
 0x240   : > { %v2060_v15 = vpop.permute.xlu0 %2059  ;;  %v1728_v31 = vpop.permute.xlu1 %1727 }
 0x241   : > { %v2119_v41 = vadd.f32 %v2060_v15, %v1948_v6  ;;  %v2571_v18 = vadd.f32 %v5590_v14, %v2536_v47  ;;  %v1784_v51 = vadd.f32 %v1728_v31, %v1668_v32  ;;  %v2484_v55 = vsel %vm1557_vm2, %v2481_v59, %v2483_v58 }
 0x243   : > { %v2599_v13 = vmax.f32 %v2571_v18, 0.0  ;;  %v2175_v49 = vadd.f32 %v4210_v56, %v2119_v41  ;;  %v1951_v17 = vadd.f32 %v1894_v1, %v1784_v51  ;;  %v2482_v41 = vsel %vm1557_vm2, %v2479_v61, %v2481_v59 }
 0x244   : > { %v2309_v45 = vpop.permute.xlu0 %2308  ;;  %v2062_v57 = vpop.permute.xlu1 %2061  ;;  %v2485_v18 = vrot.slane %v2403_v20, 2 }
 0x245   : > { %2627 = vst.msk [vmem:[#allocation3 + $0xa8] sm:$0xff] %vm519_vm0, %v2599_v13  ;;  %v2370_v40 = vadd.f32 %v2309_v45, %v5596_v28  ;;  %v2120_v16 = vadd.f32 %v2062_v57, %v1949_v46 }
 0x246   : > { %v2823_v52 = vld [vmem:[#allocation4 + $0x20] sm:$0xf] }
 0x247   : > { %v2537_v33 = vadd.f32 %v2478_v25, %v2370_v40  ;;  %v2176_v39 = vadd.f32 %v4211_v23, %v2120_v16  ;;  %v2825_v9 = vsel %vm5386_vm5, %v2823_v52, %v2824_v38 }
 0x248   : > { %v1726_v43 = vpop.permute.xlu0 %1725  ;;  %v2311_v0 = vpop.permute.xlu1 %2310  ;;  %2826 = vst [vmem:[#allocation5 + $0x10] sm:$0xf] %v2825_v9 }
 0x249   : > { %v2572_v11 = vadd.f32 %v5590_v14, %v2537_v33  ;;  %v1783_v28 = vadd.f32 %v1726_v43, %v1667_v7  ;;  %v2371_v46 = vadd.f32 %v2311_v0, %v5598_v21 }
 0x24b   : > { %v2600_v24 = vmax.f32 %v2572_v11, 0.0  ;;  %v1950_v62 = vadd.f32 %v1895_v63, %v1783_v28  ;;  %v2538_v30 = vadd.f32 %v2480_v10, %v2371_v46  ;;  %v2832_v10 = vld [vmem:[#allocation5 + $0x10] sm:$0xf0] }
 0x24c   : > { %v2655_v5 = vld [vmem:[#allocation3 + $0xa0] ss:$2 sm:$0xff]  ;;  %v2681_v8 = vld [vmem:[#allocation3 + $0xa1] ss:$2 sm:$0xff]  ;;  %v2064_v19 = vpop.permute.xlu0 %2063  ;;  %v2066_v6 = vpop.permute.xlu1 %2065 }
 0x24d   : > { %v2696_v3 = vmax.f32 %v2655_v5, %v2681_v8  ;;  %2628 = vst.msk [vmem:[#allocation3 + $0xb0] sm:$0xff] %vm519_vm0, %v2600_v24  ;;  %v2121_v60 = vadd.f32 %v2064_v19, %v1950_v62  ;;  %v2573_v21 = vadd.f32 %v5590_v14, %v2538_v30  ;;  %v2122_v2 = vadd.f32 %v2066_v6, %v1951_v17  ;;  %v2789_v62 = vld [vmem:[#allocation4 + $0x30] sm:$0xf]  ;;  %v2836_v8 = vld [vmem:[#allocation5 + $0x18] sm:$0xf] }
 0x24f   : > { %v2601_v34 = vmax.f32 %v2573_v21, 0.0  ;;  %v2177_v47 = vadd.f32 %v4212_v4, %v2121_v60  ;;  %v2178_v50 = vadd.f32 %v2150_v53, %v2122_v2 }
 0x250   : > { %v2313_v7 = vpop.permute.xlu0 %2312  ;;  %v2315_v15 = vpop.permute.xlu1 %2314 }
 0x251   : > { %2629 = vst.msk [vmem:[#allocation3 + $0xb8] sm:$0xff] %vm519_vm0, %v2601_v34  ;;  %v2372_v35 = vadd.f32 %v2313_v7, %v2175_v49  ;;  %v2373_v31 = vadd.f32 %v2315_v15, %v2176_v39  ;;  %v2486_v49 = vsel %vm1557_vm2, %v2483_v58, %v2485_v18 }
 0x253   : > { %v2539_v13 = vadd.f32 %v2482_v41, %v2372_v35  ;;  %v2540_v42 = vadd.f32 %v2484_v55, %v2373_v31 }
 0x254   : > { %v2317_v56 = vpop.permute.xlu0 %2316  ;;  %v2319_v45 = vpop.permute.xlu1 %2318 }
 0x255   : > { %v2574_v25 = vadd.f32 %v5590_v14, %v2539_v13  ;;  %v2374_v57 = vadd.f32 %v2317_v56, %v2177_v47  ;;  %v2575_v38 = vadd.f32 %v5590_v14, %v2540_v42  ;;  %v2375_v40 = vadd.f32 %v2319_v45, %v2178_v50 }
 0x257   : > { %v2602_v16 = vmax.f32 %v2574_v25, 0.0  ;;  %v2541_v1 = vadd.f32 %v2486_v49, %v2374_v57  ;;  %v2603_v61 = vmax.f32 %v2575_v38, 0.0  ;;  %v2542_v52 = vadd.f32 %v2485_v18, %v2375_v40 }
 0x258   : > { %v2657_v33 = vld [vmem:[#allocation3 + $0xb0] ss:$2 sm:$0xff]  ;;  %v2683_v12 = vld [vmem:[#allocation3 + $0xb1] ss:$2 sm:$0xff] }
 0x259   : > { %v2697_v32 = vmax.f32 %v2657_v33, %v2683_v12  ;;  %2630 = vst.msk [vmem:[#allocation3 + $0xc0] sm:$0xff] %vm519_vm0, %v2602_v16  ;;  %v2576_v23 = vadd.f32 %v5590_v14, %v2541_v1  ;;  %2631 = vst.msk [vmem:[#allocation3 + $0xc8] sm:$0xff] %vm519_vm0, %v2603_v61  ;;  %v2577_v39 = vadd.f32 %v5590_v14, %v2542_v52 }
 0x25b   : > { %v2717_v9 = vmax.f32 %v2696_v3, %v2697_v32  ;;  %v2604_v43 = vmax.f32 %v2576_v23, 0.0  ;;  %v2605_v0 = vmax.f32 %v2577_v39, 0.0 }
 0x25d   : > { %v3912_v11 = vpack.c.bf16 %v2717_v9, %v2717_v9  ;;  %2632 = vst.msk [vmem:[#allocation3 + $0xd0] sm:$0xff] %vm519_vm0, %v2604_v43 }
 0x25e   : > { %2634 = vst.msk [vmem:[#allocation3 + $0xd8] sm:$0x3f] %vm2633_vm9, %v2605_v0 }
 0x25f   : > { %2784 = vst.msk [vmem:[#allocation4 + $0x28] sm:$0xf] %vm2773_vm3, %v3912_v11 }
 0x260   : > { %v2659_v51 = vld [vmem:[#allocation3 + $0xc0] ss:$2 sm:$0x7f]  ;;  %v2685_v28 = vld [vmem:[#allocation3 + $0xc1] ss:$2 sm:$0x7f] }
 0x261   : > { %v2698_v26 = vmax.f32 %v2659_v51, %v2685_v28 }
 0x265   : > { %v2701_v46 = vld [vmem:[#allocation3 + $0xd0] ss:$2 sm:$0x7f]  ;;  %v2704_v54 = vld [vmem:[#allocation3 + $0xd1] ss:$2 sm:$0x7f] }
 0x266   : > { %v2706_v63 = vmax.f32 %v2701_v46, %v2704_v54  ;;  %v4151_v24 = vld [vmem:[#allocation4 + $0x28] ss:$0 sps:$4 sm:$0xff]  }
 0x267   : > { %v2833_v30 = vsel %vm5478_vm8, %v4151_v24, %v2832_v10 }
 0x268   : > { %v2719_v14 = vmax.f32 %v2698_v26, %v2706_v63  ;;  %2834 = vst [vmem:[#allocation5 + $0x10] sm:$0xf0] %v2833_v30 }
 0x26a   : > { %v3914_v44 = vpack.c.bf16 %v2719_v14, %v2719_v14 }
 0x26c   : > { %v2790_v22 = vsel %vm5386_vm5, %v3914_v44, %v2789_v62 }
 0x26d   : > { %2791 = vst [vmem:[#allocation4 + $0x30] sm:$0xf] %v2790_v22 }
 0x26f   : > { %v2841_v5 = vld [vmem:[#allocation5 + $0x10] sm:$0xff] }
 0x270   : > { %3887 = vmatmul.mubr.msk.bf16.gmra.mrb[72].mxu1 %vm519_vm0, %v2841_v5  ;;  %4004 = vmatprep.mubr.msk.bf16.mxu0 %vm519_vm0, %v2841_v5 }
 0x271   : > { %3045 = vmatprep.mubr.bf16.mxu1 %v6023_v27 }
 0x274   : > { %v2835_v19 = vld [vmem:[#allocation4 + $0x30] sm:$0xf] }
 0x275   : > { %v2837_v6 = vsel %vm5386_vm5, %v2835_v19, %v2836_v8 }
 0x276   : > { %2838 = vst [vmem:[#allocation5 + $0x18] sm:$0xf] %v2837_v6 }
 0x27d   : > { %v2842_v48 = vld [vmem:[#allocation5 + $0x18] sm:$0xff] }
 0x27e   : > { %3888 = vmatmul.mubr.msk.bf16.gmra.mrb[76].mxu1 %vm519_vm0, %v2842_v48  ;;  %4005 = vmatmul.mubr.msk.bf16.gmra.mrb[100].mxu0 %vm519_vm0, %v2842_v48 }
 0x27f   : > { %3088 = vmatprep.mubr.bf16.mxu1 %v6023_v27 }
 0x286   : > { %3889 = vmatmul.mubr.msk.bf16.vlgmr.msra.gmra.mrb[80].mxu1 %vm519_vm0, %v5511_v37 }
 0x287   : > { %3098 = vmatprep.mubr.bf16.mxu1 %v6023_v27 }
 0x28e   : > { %3890 = vmatmul.mubr.msk.bf16.gmra.mrb[84].mxu1 %vm519_vm0, %v5600_v29 }
 0x28f   : > { %3108 = vmatprep.mubr.bf16.mxu1 %v6023_v27 }
 0x296   : > { %3891 = vmatmul.mubr.msk.bf16.gmra.mrb[88].mxu1 %vm519_vm0, %v2841_v5 }
 0x297   : > { %3118 = vmatprep.mubr.bf16.mxu1 %v6023_v27 }
 0x29e   : > { %3892 = vmatmul.mubr.msk.bf16.gmra.mrb[92].mxu1 %vm519_vm0, %v2842_v48 }
 0x2c3   : > { %v3017_v36 = vpop.f32.mrb[64].mxu1 }
 0x2c4   : > { %3194 = vst [vmem:[#allocation6] sm:$0xff] %v3017_v36  ;;  %v3019_v3 = vpop.f32.mrb[65].mxu1 }
 0x2c5   : > { %3195 = vst [vmem:[#allocation6 + $0x8] sm:$0xff] %v3019_v3  ;;  %v5669_v60 = vpop.f32.mrb[66].mxu1 }
 0x2c6   : > { %v3023_v37 = vpop.f32.mrb[67].mxu1  ;;  %v3249_v29 = vrot.slane %v5669_v60, 1 }
 0x2c7   : > { %3320 = vrot.lane.b32.xlu1 %v3023_v37, %s4278_s17  ;;  %v3296_v47 = vrot.slane %v3023_v37, 2 }
 0x2cb   : > { %v3240_v21 = vld [vmem:[#allocation6] sm:$0xfe] }
 0x2cc   : > { %v3248_v17 = vrot.slane %v3240_v21, 1  ;;  %v3283_v50 = vld [vmem:[#allocation6 + $0x8] sm:$0xfc] }
 0x2cd   : > { %v3295_v56 = vrot.slane %v3283_v50, 2 }
 0x2ce   : > { %v3250_v59 = vsel %vm1333_vm1, %v3248_v17, %v3249_v29 }
 0x2cf   : > { %3259 = vrot.lane.b32.xlu0 %v3250_v59, %s4278_s17  ;;  %v3297_v57 = vsel %vm1557_vm2, %v3295_v56, %v3296_v47 }
 0x303   : > { %v5675_v27 = vpop.f32.mrb[68].mxu1  ;;  %v4002_v58 = vpop.f32.mrb[96].mxu0 }
 0x304   : > { %3208 = vst.msk [vmem:[#allocation6 + $0x70] sm:$0xff] %vm519_vm0, %v4002_v58  ;;  %v3029_v34 = vpop.f32.mrb[69].mxu1  ;;  %v3163_v2 = vpop.f32.mrb[97].mxu0  ;;  %v3251_v4 = vrot.slane %v5675_v27, 1 }
 0x305   : > { %v5679_v20 = vpop.f32.mrb[70].mxu1  ;;  %v4003_v7 = vpop.f32.mrb[98].mxu0  ;;  %3322 = vrot.lane.b32.xlu0 %v3029_v34, %s4278_s17  ;;  %v3298_v15 = vrot.slane %v3029_v34, 2 }
 0x306   : > { %3213 = vst.msk [vmem:[#allocation6 + $0x98] sm:$0xff] %vm519_vm0, %v4003_v7  ;;  %v3033_v35 = vpop.f32.mrb[71].mxu1  ;;  %v3166_v31 = vpop.f32.mrb[99].mxu0  ;;  %v3252_v41 = vsel %vm1333_vm1, %v3249_v29, %v3251_v4  ;;  %v3253_v18 = vrot.slane %v5679_v20, 1 }
 0x307   : > { %3261 = vrot.lane.b32.xlu1 %v3252_v41, %s4278_s17  ;;  %v3300_v55 = vrot.slane %v3033_v35, 2  ;;  %v5687_v53 = vsel %vm1557_vm2, %v3296_v47, %v3298_v15 }
 0x308   : > { %v3254_v13 = vsel %vm1333_vm1, %v3251_v4, %v3253_v18 }
 0x309   : > { %3263 = vrot.lane.b32.xlu0 %v3254_v13, %s4278_s17  ;;  %v5692_v42 = vsel %vm1557_vm2, %v3298_v15, %v3300_v55 }
 0x30b   : > { %3324 = vrot.lane.b32.xlu1 %v3033_v35, %s4278_s17 }
 0x341   : > { %v3260_v45 = vpop.permute.xlu0 %3259 }
 0x342   : > { %v3277_v25 = vadd.f32 %v3260_v45, %v3017_v36  ;;  %v3321_v36 = vpop.permute.xlu1 %3320 }
 0x343   : > { %v5696_v38 = vpop.f32.mrb[72].mxu1 }
 0x344   : > { %v3312_v40 = vadd.f32 %v3297_v57, %v3277_v25  ;;  %v3039_v49 = vpop.f32.mrb[73].mxu1  ;;  %v3255_v16 = vrot.slane %v5696_v38, 1 }
 0x345   : > { %v3041_v1 = vpop.f32.mrb[74].mxu1  ;;  %3326 = vrot.lane.b32.xlu1 %v3039_v49, %s4278_s17  ;;  %v3302_v61 = vrot.slane %v3039_v49, 2 }
 0x346   : > { %3219 = vst [vmem:[#allocation6 + $0xc8] sm:$0xff] %v3041_v1  ;;  %v5700_v52 = vpop.f32.mrb[75].mxu1  ;;  %v3256_v33 = vsel %vm1333_vm1, %v3253_v18, %v3255_v16  ;;  %v3338_v59 = vadd.f32 %v3321_v36, %v3312_v40 }
 0x347   : > { %3328 = vrot.lane.b32.xlu0 %v5700_v52, %s4278_s17  ;;  %v3304_v12 = vrot.slane %v5700_v52, 2  ;;  %v5707_v32 = vsel %vm1557_vm2, %v3300_v55, %v3302_v61 }
 0x349   : > { %3265 = vrot.lane.b32.xlu1 %v3256_v33, %s4278_s17  ;;  %v5713_v23 = vsel %vm1557_vm2, %v3302_v61, %v3304_v12 }
 0x34d   : > { %v3241_v39 = vld [vmem:[#allocation6 + $0xc8] sm:$0x7f] }
 0x34e   : > { %v3257_v9 = vrot.slane %v3241_v39, 1 }
 0x350   : > { %3269 = vrot.lane.b32.xlu0 %v3257_v9, %s4278_s17  ;;  %v3258_v63 = vsel %vm1333_vm1, %v3255_v16, %v3257_v9 }
 0x351   : > { %v3047_v43 = vpop.f32.mrb[76].mxu1  ;;  %v4006_v0 = vpop.f32.mrb[100].mxu0 }
 0x352   : > { %3228 = vst.msk [vmem:[#allocation6 + $0x110] sm:$0xff] %vm519_vm0, %v4006_v0  ;;  %v3049_v11 = vpop.f32.mrb[77].mxu1  ;;  %v3179_v51 = vpop.f32.mrb[101].mxu0 }
 0x353   : > { %3225 = vst [vmem:[#allocation6 + $0xf8] sm:$0xff] %v3049_v11  ;;  %3218 = vst.msk [vmem:[#allocation6 + $0xc0] sm:$0xff] %vm519_vm0, %v3179_v51  ;;  %v3051_v28 = vpop.f32.mrb[78].mxu1  ;;  %v4007_v46 = vpop.f32.mrb[102].mxu0 }
 0x354   : > { %3233 = vst.msk [vmem:[#allocation6 + $0x138] sm:$0xff] %vm519_vm0, %v4007_v46  ;;  %v3053_v54 = vpop.f32.mrb[79].mxu1  ;;  %v3182_v26 = vpop.f32.mrb[103].mxu0  ;;  %3267 = vrot.lane.b32.xlu0 %v3258_v63, %s4278_s17 }
 0x355   : > { %3223 = vst.msk [vmem:[#allocation6 + $0xe8] sm:$0xff] %vm519_vm0, %v3182_v26 }
 0x359   : > { %v3090_v10 = vpop.f32.mrb[80].mxu1 }
 0x35a   : > { %v3092_v24 = vpop.f32.mrb[81].mxu1  ;;  %v3318_v14 = vld [vmem:[#allocation6 + $0xf8] sm:$0x3f] }
 0x35b   : > { %v3094_v62 = vpop.f32.mrb[82].mxu1  ;;  %3330 = vrot.lane.b32.xlu0 %v3318_v14, %s4278_s17 }
 0x35c   : > { %3201 = vst [vmem:[#allocation6 + $0x38] sm:$0xff] %v3094_v62  ;;  %v3096_v30 = vpop.f32.mrb[83].mxu1 }
 0x361   : > { %v3100_v44 = vpop.f32.mrb[84].mxu1 }
 0x362   : > { %v5723_v22 = vpop.f32.mrb[85].mxu1  ;;  %v3384_v5 = vrot.slane %v3100_v44, 2  ;;  %v3357_v48 = vrot.slane %v3100_v44, 1 }
 0x363   : > { %3207 = vst [vmem:[#allocation6 + $0x68] sm:$0xff] %v5723_v22  ;;  %v3104_v8 = vpop.f32.mrb[86].mxu1  ;;  %v3379_v19 = vld [vmem:[#allocation6 + $0x38] sm:$0xfc] }
 0x364   : > { %v3344_v6 = vld [vmem:[#allocation6 + $0x38] sm:$0xfe]  ;;  %v5726_v3 = vpop.f32.mrb[87].mxu1  ;;  %v3383_v37 = vrot.slane %v3379_v19, 2  ;;  %v3386_v21 = vrot.slane %v3104_v8, 2  ;;  %v3359_v29 = vrot.slane %v3104_v8, 1 }
 0x365   : > { %v3356_v17 = vrot.slane %v3344_v6, 1  ;;  %v3439_v13 = vrot.slane %v5726_v3, 1 }
 0x366   : > { %v3385_v58 = vsel %vm1557_vm2, %v3383_v37, %v3384_v5  ;;  %v3387_v34 = vsel %vm1557_vm2, %v3384_v5, %v3386_v21  ;;  %v3360_v4 = vsel %vm1333_vm1, %v3357_v48, %v3359_v29 }
 0x367   : > { %v3358_v2 = vsel %vm1333_vm1, %v3356_v17, %v3357_v48  ;;  %3394 = vrot.lane.b32.xlu1 %v3385_v58, %s4278_s17  ;;  %3396 = vrot.lane.b32.xlu0 %v3387_v34, %s4278_s17  ;;  %v3610_v17 = vld [vmem:[%s5904_s5 + $0x18] sm:$0xff]  ;;  %v3612_v58 = vld [vmem:[%s5904_s5 + $0x28] sm:$0xff] }
 0x368   : > { %v5734_v47 = vadd.f32 %v3358_v2, %v3338_v59  ;;  %v3611_v59 = vld [vmem:[%s5904_s5 + $0x20] sm:$0xff]  ;;  %v4281_v2 = vmov 0.0  }
 0x369   : > { %v3110_v7 = vpop.f32.mrb[88].mxu1  ;;  %v4034_v34 = vpack.c.bf16 %v3612_v58, %v3611_v59  ;;  %4024 = vmatprep.mubr.msk.f32.mxu1 %vm4280_vm10, %v4281_v2 }
 0x36a   : > { %v5736_v15 = vpop.f32.mrb[89].mxu1  ;;  %v3430_v35 = vld [vmem:[#allocation6 + $0x68] sm:$0xfe]  ;;  %v3388_v31 = vrot.slane %v3110_v7, 2  ;;  %v3361_v41 = vrot.slane %v3110_v7, 1  ;;  %v3614_v7 = vld [vmem:[%s5904_s5 + $0x38] sm:$0xff] }
 0x36b   : > { %v5738_v18 = vpop.f32.mrb[90].mxu1  ;;  %v3438_v55 = vrot.slane %v3430_v35, 1  ;;  %v3441_v50 = vrot.slane %v5736_v15, 1 }
 0x36c   : > { %v5742_v56 = vpop.f32.mrb[91].mxu1  ;;  %v3389_v45 = vsel %vm1557_vm2, %v3386_v21, %v3388_v31  ;;  %v3390_v25 = vrot.slane %v5738_v18, 2  ;;  %v3362_v57 = vsel %vm1333_vm1, %v3359_v29, %v3361_v41  ;;  %v3363_v40 = vrot.slane %v5738_v18, 1 }
 0x36d   : > { %v3440_v49 = vsel %vm1333_vm1, %v3438_v55, %v3439_v13  ;;  %v3442_v16 = vsel %vm1333_vm1, %v3439_v13, %v3441_v50  ;;  %v3443_v1 = vrot.slane %v5742_v56, 1  ;;  %v4279_v21 = vmov 0.0|0.0  }
 0x36e   : > { %3449 = vrot.lane.b32.xlu1 %v3440_v49, %s4278_s17  ;;  %3451 = vrot.lane.b32.xlu0 %v3442_v16, %s4278_s17  ;;  %v3391_v61 = vsel %vm1557_vm2, %v3388_v31, %v3390_v25  ;;  %v5757_v33 = vsel %vm1333_vm1, %v3361_v41, %v3363_v40 }
 0x36f   : > { %v3444_v39 = vsel %vm1333_vm1, %v3441_v50, %v3443_v1  ;;  %4027 = vmatprep.subr.bf16.mxu1 %v4279_v21 }
 0x371   : > { %v3120_v9 = vpop.f32.mrb[92].mxu1 }
 0x372   : > { %3226 = vst [vmem:[#allocation6 + $0x100] sm:$0xff] %v3120_v9  ;;  %v5760_v43 = vpop.f32.mrb[93].mxu1  ;;  %3398 = vrot.lane.b32.xlu1 %v3389_v45, %s4278_s17  ;;  %v3392_v0 = vrot.slane %v3120_v9, 2 }
 0x373   : > { %v3124_v11 = vpop.f32.mrb[94].mxu1  ;;  %v3445_v51 = vrot.slane %v5760_v43, 1 }
 0x374   : > { %v3126_v28 = vpop.f32.mrb[95].mxu1  ;;  %3404 = vrot.lane.b32.xlu0 %v3392_v0, %s4278_s17  ;;  %v3393_v46 = vsel %vm1557_vm2, %v3390_v25, %v3392_v0 }
 0x375   : > { %3232 = vst [vmem:[#allocation6 + $0x130] sm:$0xff] %v3126_v28  ;;  %v3446_v54 = vsel %vm1333_vm1, %v3443_v1, %v3445_v51 }
 0x376   : > { %3400 = vrot.lane.b32.xlu1 %v3391_v61, %s4278_s17 }
 0x377   : > { %v3323_v26 = vpop.permute.xlu0 %3322 }
 0x378   : > { %3402 = vrot.lane.b32.xlu0 %v3393_v46, %s4278_s17 }
 0x379   : > { %v3262_v63 = vpop.permute.xlu1 %3261  ;;  %v3349_v49 = vld [vmem:[#allocation6 + $0x100] sm:$0x7f] }
 0x37a   : > { %3453 = vrot.lane.b32.xlu1 %v3444_v39, %s4278_s17  ;;  %v3278_v10 = vadd.f32 %v3262_v63, %v5669_v60  ;;  %v3365_v61 = vrot.slane %v3349_v49, 1  ;;  %v3473_v63 = vld [vmem:[#allocation6 + $0x70] sm:$0xfc] }
 0x37b   : > { %v3264_v62 = vpop.permute.xlu0 %3263 }
 0x37c   : > { %v3431_v24 = vld [vmem:[#allocation6 + $0x130] sm:$0x7f]  ;;  %v3313_v30 = vadd.f32 %v5687_v53, %v3278_v10  ;;  %v3279_v44 = vadd.f32 %v3264_v62, %v5675_v27  ;;  %v3607_v53 = vld [vmem:[%s5904_s5] sm:$0xff]  ;;  %v3366_v0 = vsel %vm1333_vm1, %v3363_v40, %v3365_v61 }
 0x37d   : > { %v3447_v14 = vrot.slane %v3431_v24, 1  ;;  %v3325_v6 = vpop.permute.xlu1 %3324  ;;  %v3608_v27 = vld [vmem:[%s5904_s5 + $0x8] sm:$0xff]  ;;  %v3485_v24 = vrot.slane %v3473_v63, 2 }
 0x37e   : > { %3455 = vrot.lane.b32.xlu1 %v3446_v54, %s4278_s17  ;;  %v3314_v8 = vadd.f32 %v5692_v42, %v3279_v44  ;;  %v3339_v19 = vadd.f32 %v3323_v26, %v3313_v30  ;;  %v4028_v37 = vpack.c.bf16 %v3608_v27, %v3607_v53  ;;  %v3609_v42 = vld [vmem:[%s5904_s5 + $0x10] sm:$0xff]  ;;  %v3475_v54 = vld [vmem:[#allocation6 + $0xc0] sm:$0xff]  ;;  %v3239_v40 = vld [vmem:[#allocation6 + $0xc8] sm:$0x3f] }
 0x37f   : > { %v3448_v5 = vsel %vm1333_vm1, %v3445_v51, %v3447_v14  ;;  %v4031_v29 = vpack.c.bf16 %v3610_v17, %v3609_v42  ;;  %v3488_v10 = vrot.slane %v3475_v54, 2  ;;  %v3476_v17 = vld [vmem:[#allocation6 + $0xe8] sm:$0xff] }
 0x380   : > { %3457 = vrot.lane.b32.xlu0 %v3448_v5, %s4278_s17  ;;  %v3340_v60 = vadd.f32 %v3325_v6, %v3314_v8  ;;  %v3374_v48 = vadd.f32 %v3360_v4, %v3339_v19  ;;  %4029 = vmatpush3.bf16.msra.mxu1 %v4028_v37  ;;  %v3613_v4 = vld [vmem:[%s5904_s5 + $0x30] sm:$0xff] }
 0x381   : > { %4030 = vmatprep.subr.bf16.mxu1 %v4279_v21  ;;  %v4037_v35 = vpack.c.bf16 %v3614_v7, %v3613_v4 }
 0x382   : > { %3459 = vrot.lane.b32.xlu1 %v3447_v14, %s4278_s17  ;;  %v5778_v36 = vadd.f32 %v3362_v57, %v3340_v60 }
 0x384   : > { %4032 = vmatpush3.bf16.msra.mxu1 %v4031_v29 }
 0x385   : > { %4033 = vmatprep.subr.bf16.mxu1 %v4279_v21 }
 0x388   : > { %4035 = vmatpush3.bf16.msra.mxu1 %v4034_v34  ;;  %v3490_v34 = vrot.slane %v3476_v17, 2 }
 0x389   : > { %4036 = vmatprep.subr.bf16.mxu1 %v4279_v21 }
 0x38c   : > { %4038 = vmatpush3.bf16.msra.mxu1 %v4037_v35  ;;  %v3477_v35 = vld [vmem:[#allocation6 + $0x110] sm:$0xff] }
 0x3b7   : > { %v3327_v31 = vpop.permute.xlu1 %3326 }
 0x3b9   : > { %v3329_v13 = vpop.permute.xlu0 %3328 }
 0x3bb   : > { %v3266_v41 = vpop.permute.xlu1 %3265 }
 0x3bc   : > { %v3280_v55 = vadd.f32 %v3266_v41, %v5679_v20 }
 0x3be   : > { %v3315_v50 = vadd.f32 %v5707_v32, %v3280_v55  ;;  %v3491_v55 = vsel %vm1557_vm2, %v3488_v10, %v3490_v34 }
 0x3c0   : > { %v3341_v45 = vadd.f32 %v3327_v31, %v3315_v50 }
 0x3c2   : > { %v3270_v25 = vpop.permute.xlu0 %3269  ;;  %v3376_v57 = vadd.f32 %v5757_v33, %v3341_v45  ;;  %v3474_v33 = vld [vmem:[#allocation6 + $0x98] sm:$0xff] }
 0x3c3   : > { %v3282_v44 = vadd.f32 %v3270_v25, %v3239_v40  ;;  %v3492_v25 = vrot.slane %v3477_v35, 2 }
 0x3c5   : > { %v3317_v53 = vadd.f32 %v3304_v12, %v3282_v44 }
 0x3c6   : > { %v3268_v16 = vpop.permute.xlu0 %3267 }
 0x3c7   : > { %v3281_v1 = vadd.f32 %v3268_v16, %v5696_v38 }
 0x3c9   : > { %v3316_v39 = vadd.f32 %v5713_v23, %v3281_v1  ;;  %v3486_v23 = vrot.slane %v3474_v33, 2 }
 0x3cb   : > { %v3342_v9 = vadd.f32 %v3329_v13, %v3316_v39  ;;  %v3487_v5 = vsel %vm1557_vm2, %v3485_v24, %v3486_v23 }
 0x3cd   : > { %v3377_v20 = vadd.f32 %v3366_v0, %v3342_v9  ;;  %v3331_v11 = vpop.permute.xlu0 %3330  ;;  %v3493_v9 = vsel %vm1557_vm2, %v3490_v34, %v3492_v25 }
 0x3ce   : > { %v3343_v29 = vadd.f32 %v3331_v11, %v3317_v53 }
 0x3d0   : > { %v3378_v52 = vadd.f32 %v3365_v61, %v3343_v29  ;;  %v3423_v61 = vld [vmem:[#allocation6 + $0x130] sm:$0x3f] }
 0x3d9   : > { %v3395_v51 = vpop.permute.xlu1 %3394  ;;  %v3397_v32 = vpop.permute.xlu0 %3396 }
 0x3da   : > { %v3412_v28 = vadd.f32 %v3395_v51, %v5734_v47  ;;  %v3413_v46 = vadd.f32 %v3397_v32, %v3374_v48  ;;  %v5819_v47 = vld [vmem:[%s5903_s4] ss:$0 sm:$0xff] }
 0x3dc   : > { %v3424_v26 = vadd.f32 %v3412_v28, %v5723_v22  ;;  %v3425_v38 = vadd.f32 %v3413_v46, %v5726_v3  ;;  %v3489_v22 = vsel %vm1557_vm2, %v3486_v23, %v3488_v10 }
 0x3e0   : > { %v3450_v18 = vpop.permute.xlu1 %3449  ;;  %v3452_v14 = vpop.permute.xlu0 %3451 }
 0x3e1   : > { %v3467_v62 = vadd.f32 %v3450_v18, %v3424_v26  ;;  %v3468_v30 = vadd.f32 %v3452_v14, %v3425_v38 }
 0x3e3   : > { %v3502_v3 = vadd.f32 %v3487_v5, %v3467_v62  ;;  %v3503_v8 = vadd.f32 %v3489_v22, %v3468_v30 }
 0x3e4   : > { %v3399_v19 = vpop.permute.xlu1 %3398 }
 0x3e5   : > { %v3515_v6 = vadd.f32 %v5819_v47, %v3502_v3  ;;  %v3414_v60 = vadd.f32 %v3399_v19, %v5778_v36  ;;  %v3516_v48 = vadd.f32 %v5819_v47, %v3503_v8 }
 0x3e6   : > { %v3405_v27 = vpop.permute.xlu0 %3404 }
 0x3e7   : > { %v3521_v37 = vmax.f32 %v3515_v6, 0.0  ;;  %v3522_v21 = vmax.f32 %v3516_v48, 0.0  ;;  %v3426_v42 = vadd.f32 %v3414_v60, %v5736_v15  ;;  %v3478_v15 = vld [vmem:[#allocation6 + $0x138] sm:$0xff]  ;;  %v3417_v41 = vadd.f32 %v3405_v27, %v3378_v52 }
 0x3e8   : > { %v3401_v59 = vpop.permute.xlu1 %3400  ;;  %v3494_v49 = vrot.slane %v3478_v15, 2 }
 0x3e9   : > { %3527 = vst.msk [vmem:[#allocation7] sm:$0xff] %vm519_vm0, %v3521_v37  ;;  %3528 = vst.msk [vmem:[#allocation7 + $0x8] sm:$0xff] %vm519_vm0, %v3522_v21  ;;  %v3415_v58 = vadd.f32 %v3401_v59, %v3376_v57 }
 0x3ea   : > { %v3403_v36 = vpop.permute.xlu0 %3402  ;;  %v3495_v46 = vsel %vm1557_vm2, %v3492_v25, %v3494_v49 }
 0x3eb   : > { %v3416_v2 = vadd.f32 %v3403_v36, %v3377_v20  ;;  %v3427_v4 = vadd.f32 %v3415_v58, %v5742_v56 }
 0x3ec   : > { %v3454_v12 = vpop.permute.xlu1 %3453 }
 0x3ed   : > { %v3469_v7 = vadd.f32 %v3454_v12, %v3426_v42  ;;  %v3428_v31 = vadd.f32 %v3416_v2, %v5760_v43  ;;  %v3429_v43 = vadd.f32 %v3423_v61, %v3417_v41 }
 0x3ef   : > { %v3504_v13 = vadd.f32 %v3491_v55, %v3469_v7 }
 0x3f0   : > { %v3533_v50 = vld [vmem:[#allocation7] sm:$0xff]  ;;  %v3456_v57 = vpop.permute.xlu1 %3455  ;;  %v3534_v44 = vld [vmem:[#allocation7 + $0x8] sm:$0xff] }
 0x3f1   : > { %v3539_v45 = vld [vmem:[#allocation7 + $0x1] sm:$0xff]  ;;  %v3517_v1 = vadd.f32 %v5819_v47, %v3504_v13  ;;  %v3470_v56 = vadd.f32 %v3456_v57, %v3427_v4 }
 0x3f2   : > { %v3545_v16 = vadd.f32 %v3539_v45, %v3533_v50  ;;  %v3551_v39 = vld [vmem:[#allocation7 + $0x2] sm:$0xff]  ;;  %v3458_v0 = vpop.permute.xlu0 %3457 }
 0x3f3   : > { %v3523_v11 = vmax.f32 %v3517_v1, 0.0  ;;  %v3505_v51 = vadd.f32 %v3493_v9, %v3470_v56  ;;  %v3471_v32 = vadd.f32 %v3458_v0, %v3428_v31  ;;  %v3563_v28 = vld [vmem:[#allocation7 + $0x3] sm:$0xff] }
 0x3f4   : > { %v3557_v20 = vadd.f32 %v3551_v39, %v3545_v16  ;;  %v3460_v33 = vpop.permute.xlu1 %3459  ;;  %v3575_v23 = vld [vmem:[#allocation7 + $0x4] sm:$0xff] }
 0x3f5   : > { %3529 = vst.msk [vmem:[#allocation7 + $0x10] sm:$0xff] %vm519_vm0, %v3523_v11  ;;  %v3518_v26 = vadd.f32 %v5819_v47, %v3505_v51  ;;  %v3506_v38 = vadd.f32 %v3495_v46, %v3471_v32  ;;  %v3472_v63 = vadd.f32 %v3460_v33, %v3429_v43 }
 0x3f6   : > { %v3569_v54 = vadd.f32 %v3563_v28, %v3557_v20  ;;  %v3615_v20 = vld [vmem:[%s5905_s6] sm:$0x1] }
 0x3f7   : > { %v3524_v24 = vmax.f32 %v3518_v26, 0.0  ;;  %v3519_v18 = vadd.f32 %v5819_v47, %v3506_v38  ;;  %v3507_v14 = vadd.f32 %v3494_v49, %v3472_v63 }
 0x3f8   : > { %v3581_v10 = vadd.f32 %v3575_v23, %v3569_v54 }
 0x3f9   : > { %3530 = vst.msk [vmem:[#allocation7 + $0x18] sm:$0xff] %vm519_vm0, %v3524_v24  ;;  %v3525_v40 = vmax.f32 %v3519_v18, 0.0  ;;  %v3520_v62 = vadd.f32 %v5819_v47, %v3507_v14 }
 0x3fa   : > { %3587 = vst.msk [vmem:[#allocation8] sm:$0xff] %vm519_vm0, %v3581_v10 }
 0x3fb   : > { %3531 = vst.msk [vmem:[#allocation7 + $0x20] sm:$0xff] %vm519_vm0, %v3525_v40  ;;  %v3526_v30 = vmax.f32 %v3520_v62, 0.0 }
 0x3fc   : > { %v3540_v5 = vld [vmem:[#allocation7 + $0x9] sm:$0xff] }
 0x3fd   : > { %v3546_v22 = vadd.f32 %v3540_v5, %v3534_v44  ;;  %3532 = vst.msk [vmem:[#allocation7 + $0x28] sm:$0x3f] %vm2633_vm9, %v3526_v30  ;;  %v3552_v3 = vld [vmem:[#allocation7 + $0xa] sm:$0xff] }
 0x3fe   : > { %v3535_v19 = vld [vmem:[#allocation7 + $0x10] sm:$0xff] }
 0x3ff   : > { %v3558_v8 = vadd.f32 %v3552_v3, %v3546_v22  ;;  %v3564_v6 = vld [vmem:[#allocation7 + $0xb] sm:$0xff] }
 0x400   : > { %v3541_v60 = vld [vmem:[#allocation7 + $0x11] sm:$0xff] }
 0x401   : > { %v3570_v48 = vadd.f32 %v3564_v6, %v3558_v8  ;;  %v3576_v53 = vld [vmem:[#allocation7 + $0xc] sm:$0xff]  ;;  %v3547_v27 = vadd.f32 %v3541_v60, %v3535_v19  ;;  %v3536_v37 = vld [vmem:[#allocation7 + $0x18] sm:$0xff] }
 0x402   : > { %v3553_v21 = vld [vmem:[#allocation7 + $0x12] sm:$0xff]  ;;  %v3537_v59 = vld [vmem:[#allocation7 + $0x20] sm:$0xff]  ;;  %v3594_v16 = vld [vmem:[#allocation8] ss:$64 sm:$0x1] }
 0x403   : > { %v3542_v42 = vld [vmem:[#allocation7 + $0x19] sm:$0xff]  ;;  %v3582_v47 = vadd.f32 %v3576_v53, %v3570_v48  ;;  %v3559_v17 = vadd.f32 %v3553_v21, %v3547_v27 }
 0x404   : > { %v3565_v29 = vld [vmem:[#allocation7 + $0x13] sm:$0xff]  ;;  %v3548_v58 = vadd.f32 %v3542_v42, %v3536_v37  ;;  %v3543_v36 = vld [vmem:[#allocation7 + $0x21] sm:$0xff] }
 0x405   : > { %v3554_v34 = vld [vmem:[#allocation7 + $0x1a] sm:$0xff]  ;;  %3588 = vst.msk [vmem:[#allocation8 + $0x8] sm:$0xff] %vm519_vm0, %v3582_v47  ;;  %v3571_v2 = vadd.f32 %v3565_v29, %v3559_v17  ;;  %v3549_v12 = vadd.f32 %v3543_v36, %v3537_v59  ;;  %v3555_v35 = vld [vmem:[#allocation7 + $0x22] sm:$0xff] }
 0x406   : > { %v3577_v4 = vld [vmem:[#allocation7 + $0x14] sm:$0xff]  ;;  %v3560_v52 = vadd.f32 %v3554_v34, %v3548_v58  ;;  %v3578_v55 = vld [vmem:[#allocation7 + $0x1c] sm:$0xff]  ;;  %v3579_v25 = vld [vmem:[#allocation7 + $0x24] sm:$0xff] }
 0x407   : > { %v3566_v7 = vld [vmem:[#allocation7 + $0x1b] sm:$0xff]  ;;  %v3583_v31 = vadd.f32 %v3577_v4, %v3571_v2  ;;  %v3561_v41 = vadd.f32 %v3555_v35, %v3549_v12  ;;  %v3567_v13 = vld [vmem:[#allocation7 + $0x23] sm:$0xff] }
 0x408   : > { %v3572_v15 = vadd.f32 %v3566_v7, %v3560_v52 }
 0x409   : > { %3589 = vst.msk [vmem:[#allocation8 + $0x10] sm:$0xff] %vm519_vm0, %v3583_v31  ;;  %v3573_v45 = vadd.f32 %v3567_v13, %v3561_v41 }
 0x40a   : > { %v3584_v50 = vadd.f32 %v3578_v55, %v3572_v15 }
 0x40b   : > { %v3585_v57 = vadd.f32 %v3579_v25, %v3573_v45 }
 0x40c   : > { %3590 = vst.msk [vmem:[#allocation8 + $0x18] sm:$0xff] %vm519_vm0, %v3584_v50  ;;  %v3596_v49 = vld [vmem:[#allocation8 + $0x8] ss:$64 sm:$0x1] }
 0x40d   : > { %3591 = vst.msk [vmem:[#allocation8 + $0x20] sm:$0xff] %vm519_vm0, %v3585_v57  ;;  %v3597_v1 = vadd.f32 %v3596_v49, %v3594_v16 }
 0x410   : > { %v3599_v56 = vld [vmem:[#allocation8 + $0x10] ss:$64 sm:$0x1] }
 0x411   : > { %v3600_v61 = vadd.f32 %v3599_v56, %v3597_v1 }
 0x413   : > { %v3602_v39 = vld [vmem:[#allocation8 + $0x18] ss:$64 sm:$0x1] }
 0x414   : > { %v3603_v9 = vadd.f32 %v3602_v39, %v3600_v61  ;;  %v3605_v0 = vld [vmem:[#allocation8 + $0x20] ss:$64 sm:$0x1] }
 0x416   : > { %v3606_v43 = vadd.f32 %v3605_v0, %v3603_v9 }
 0x418   : > { %4025 = vmatmul.mubr.msk.f32.vlgmr.msra.gmra.mrb[96].mxu1 %vm519_vm0, %v3606_v43 }
 0x4eb   : > { %v3685_v11 = vpop.f32.mrb[96].mxu1 }
 0x4ec   : > { %v3686_v51 = vadd.f32 %v3685_v11, %v3615_v20  ;;  %v4026_v32 = vpop.f32.mrb[97].mxu1 }
 0x4ee   : > { %3689 = vst [vmem:[%s271_s16] sm:$0x1] %v3686_v51 }
 0x4ef   : > { %4226 = shalt.err (!%p4223_p3)
}
 0x4f0   : > { %s4227_s9 = scalar_lea.hbm %s5857_s22, 16  ;;  %s4231_s17 = scalar_lea.hbm %s5906_s7, 32 }
 0x4f1   : > { %p4228_p4 = scmp.ne.s32.totalorder %s5857_s22, %s4227_s9  ;;  %p4232_p9 = scmp.lt.u32.totalorder %s5857_s22, %s5906_s7 }
 0x4f2   : > { %p4233_p10 = scmp.lt.u32.totalorder %s4231_s17, %s4227_s9  ;;  %p4235_p12 = scmp.lt.u32.totalorder %s4227_s9, %s5857_s22 }
 0x4f3   : > { %p4229_p7 = pnand %p4228_p4, %p4361_p5 }
 0x4f4   : > { %p4234_p11 = por %p4233_p10, %p4232_p9 }
 0x4f5   : > { %p4230_p8 = pneg %p4229_p7 }
 0x4f6   : > { %p4236_p13 = por %p4235_p12, %p4234_p11 }
 0x4f8   : > { %p4237_p0 = pnand %p4236_p13, %p4230_p8 }
 0x4fa   : > { %4240 = shalt.err (!%p4237_p0)
}
 0x4fb   : > { %4039 = dma.vmem_to_hbm [thread:$0]  (%p4361_p5), %s5859_s18, 16, %s5857_s22, %s3691_s23  }
 0x4fc PF: > { %p4045_p1 = scmp.ge.s32.totalorder %s4275_s27, 2  ;;  %s3715_s20 = sand.u32 1, %s4263_s24  }
 0x4fd   : > { %s3716_s21 = scalar_lea.sflag [#allocation10], %s3715_s20 }
 0x4fe   : > { %p4042_p2 = pnand %p4045_p1, %p4365_p6 }
 0x500   : > { %4258 = dma.done.wait (!%p4042_p2), %s3716_s21, 16  }
 0x501   : > { %4260 = vsyncadd (!%p4042_p2), %s3716_s21, 4294967280  ;;  %p17_p3 = scmp.ge.s32.totalorder %s4348_s30, 4   ;;  %s6048_s24 = smov %s4267_s25 }
 0x502   : > { %s6049_s25 = smov %s4271_s26  ;;  %s6050_s26 = smov %s4359_s10 }
 0x503   : > { %s6051_s27 = smov %s4348_s30  ;;  %19 = sbr.rel (!%p17_p3) target bundleno = 3 (0x3), region = 114 }
 0x50a   :  { %3720 = vsyncpa [#allocation10], 1 }
 0x50b   :  { %3722 = vsyncpa [#allocation10 + $0x1], 1 }

</bundles_post_ra>
